<compile_context>
chip_gen: v5e
topology: v5e:2x2
jax: 0.10.0
libtpu: 0.0.40
codegen_flags: <defaults>
</compile_context>

<pallas_src>
import math

import jax
import jax.numpy as jnp
from jax.experimental import pallas as pl
from jax.experimental.pallas import tpu as pltpu

EPS = 1e-5
_FFN_CHUNK = 256  # lane-chunk of `hidden` processed per unrolled step


# ---------------------------------------------------------------------------
# Fused PreNorm kernel:  o = fn(LayerNorm(x), *operand_refs)   (one pallas_call)
# ---------------------------------------------------------------------------

def _make_prenorm_kernel(fn, n_fn_operands):
    """Kernel computing o = fn(LayerNorm(x), *operand_refs) on one row tile."""

    def kernel(x_ref, g_ref, b_ref, *rest):
        op_refs, o_ref = rest[:n_fn_operands], rest[n_fn_operands]
        x = x_ref[...].astype(jnp.float32)                          # (tr, dim), f32 stats
        mu = jnp.mean(x, axis=-1, keepdims=True)
        var = jnp.mean(jnp.square(x - mu), axis=-1, keepdims=True)  # biased, as nn.LayerNorm
        y = (x - mu) * jax.lax.rsqrt(var + EPS) * g_ref[...] + b_ref[...]
        o_ref[...] = fn(y, *op_refs).astype(o_ref.dtype)

    return kernel


def _tensorcores_per_device():
    """Best-effort TensorCore-per-device count (v7x megacore -> 2, else 1)."""
    try:
        dev = jax.devices()[0]
        for attr in ("num_cores", "core_count"):
            v = getattr(dev, attr, None)
            if isinstance(v, int) and v >= 1:
                return min(v, 8)
        kind = str(getattr(dev, "device_kind", "")).lower()
        if "7" in kind:  # v7x-family: 2 TCs per chip
            return 2
    except Exception:
        pass
    return 1


def _pick_row_tile(rows, max_tile, min_steps):
    """Largest multiple-of-8 divisor of `rows` <= max_tile giving >= min_steps."""
    best = None
    for t in range(8, min(rows, max_tile) + 1, 8):
        if rows % t == 0 and rows // t >= min_steps:
            best = t
    if best is None:
        best = rows  # full block (exempt from the (8,128) rule as full extent)
    return best


def _vmem_limit_bytes(tr, dim, out_dim, x_dtype, out_dtype, operands):
    isz = lambda dt: jnp.dtype(dt).itemsize
    x_bytes = 2 * tr * dim * isz(x_dtype)                 # double-buffered input tile
    o_bytes = 2 * tr * out_dim * isz(out_dtype)           # double-buffered output tile
    ln_bytes = 2 * 2 * dim * 4
    w_bytes = 2 * sum(int(op.size) * op.dtype.itemsize for op in operands)  # worst case
    inter = 4 * tr * (dim + out_dim + _FFN_CHUNK) * 4     # f32 intermediates / spill headroom
    need = int(1.3 * (x_bytes + o_bytes + ln_bytes + w_bytes + inter))
    return int(min(max(need, 32 * 1024 * 1024), 64 * 1024 * 1024))


def fused_prenorm(x, gamma, beta, fn, fn_operands, out_dim, *,
                  out_dtype=None, max_row_tile=512, transcendentals_per_row=1):
    """PreNorm forward, fully fused: fn(LayerNorm(x)) in one pallas_call.

    x:           (..., dim) activations in their NATIVE dtype (f32 or bf16)
    gamma, beta: (dim,) LayerNorm affine parameters
    fn:          traced INSIDE the kernel: fn(y_f32_tile, *operand_refs) -> (tr, out_dim)
    fn_operands: 2-D weights / (1, n) biases kept fully VMEM-resident across row tiles
    """
    orig_shape = x.shape
    dim = orig_shape[-1]
    x2d = x.reshape(-1, dim)                       # keep native dtype (no wrapper f32 cast)
    rows = x2d.shape[0]
    out_dtype = x.dtype if out_dtype is None else out_dtype

    tr = _pick_row_tile(rows, max_row_tile, _tensorcores_per_device())
    assert rows % tr == 0

    g = gamma.reshape(1, dim).astype(jnp.float32)
    b = beta.reshape(1, dim).astype(jnp.float32)
    kernel = _make_prenorm_kernel(fn, len(fn_operands))

    weight_flops = 2 * rows * sum(
        int(op.shape[0]) * int(op.shape[1])
        for op in fn_operands if op.ndim == 2 and op.shape[0] > 1)
    cost = pl.CostEstimate(
        flops=int(weight_flops + 8 * rows * dim),
        transcendentals=int(rows * transcendentals_per_row),
        bytes_accessed=int(
            x2d.size * x2d.dtype.itemsize
            + sum(int(op.size) * op.dtype.itemsize for op in fn_operands)
            + 2 * dim * 4
            + rows * out_dim * jnp.dtype(out_dtype).itemsize))

    cparams = pltpu.CompilerParams(
        dimension_semantics=("parallel",),
        vmem_limit_bytes=_vmem_limit_bytes(tr, dim, out_dim, x2d.dtype, out_dtype, fn_operands))

    def build(single_buffer_residents):
        def resident(shape):
            nd = len(shape)
            idx = lambda i, nd=nd: (0,) * nd
            if single_buffer_residents:
                # Grid-invariant block: ask for a single buffer (no useless double-buffer).
                return pl.BlockSpec(shape, idx, pipeline_mode=pl.Buffered(1))
            return pl.BlockSpec(shape, idx)

        in_specs = ([pl.BlockSpec((tr, dim), lambda i: (i, 0)),
                     resident((1, dim)), resident((1, dim))]
                    + [resident(op.shape) for op in fn_operands])
        return pl.pallas_call(
            kernel,
            out_shape=jax.ShapeDtypeStruct((rows, out_dim), out_dtype),
            grid=(rows // tr,),
            in_specs=in_specs,
            out_specs=pl.BlockSpec((tr, out_dim), lambda i: (i, 0)),
            compiler_params=cparams,
            cost_estimate=cost,
        )

    args = (x2d, g, b) + tuple(fn_operands)
    try:
        out = build(True)(*args)
    except Exception:
        # pipeline_mode=pl.Buffered(1) unsupported on this JAX version/backend.
        out = build(False)(*args)
    return out.reshape(*orig_shape[:-1], out_dim)


# ---------------------------------------------------------------------------
# Concrete wrapped `fn`s (traced inside the kernel; they receive VMEM refs)
# ---------------------------------------------------------------------------

def _gelu_tanh(x):
    # tanh-approximate GELU; tanh rides the (otherwise idle) EUP slot.
    c = math.sqrt(2.0 / math.pi)
    return 0.5 * x * (1.0 + jnp.tanh(c * (x + 0.044715 * x * x * x)))


def _linear_fn(y, w_ref, b_ref):
    # bf16 MXU operands, f32 accumulation, bias add fused in the epilogue.
    return jnp.dot(y.astype(w_ref.dtype), w_ref[...],
                   preferred_element_type=jnp.float32) + b_ref[...]


def _ffn_fn(y, w1_ref, b1_ref, w2_ref, b2_ref):
    # Linear -> GELU(tanh) -> Linear, chunked over `hidden` so the (tr, hidden)
    # f32 intermediate never materializes at once (bounds vreg/VMEM pressure).
    hidden = w1_ref.shape[1]
    out_dim = w2_ref.shape[1]
    chunk = _FFN_CHUNK if hidden % _FFN_CHUNK == 0 else hidden
    y_lo = y.astype(w1_ref.dtype)

    acc = jnp.zeros((y.shape[0], out_dim), jnp.float32) + b2_ref[...]
    for c in range(hidden // chunk):      # short static loop -> unrolled, static ref slices
        s = c * chunk
        h = jnp.dot(y_lo, w1_ref[:, s:s + chunk],
                    preferred_element_type=jnp.float32) + b1_ref[:, s:s + chunk]
        h = _gelu_tanh(h)
        acc = acc + jnp.dot(h.astype(w2_ref.dtype), w2_ref[s:s + chunk, :],
                            preferred_element_type=jnp.float32)
    return acc


def prenorm_linear(params, x, out_dtype=None):
    """PreNorm(dim, Linear(dim, out)) — LayerNorm + matmul + bias in one kernel."""
    w, b = params["w"], params["b"]
    return fused_prenorm(
        x, params["gamma"], params["beta"], _linear_fn, (w, b.reshape(1, -1)),
        out_dim=w.shape[1], out_dtype=out_dtype,
        max_row_tile=512, transcendentals_per_row=1)


def prenorm_ffn(params, x, out_dtype=None):
    """PreNorm(dim, FeedForward(dim, hidden)) — LN + Linear + GELU + Linear fused."""
    w1, b1, w2, b2 = params["w1"], params["b1"], params["w2"], params["b2"]
    return fused_prenorm(
        x, params["gamma"], params["beta"], _ffn_fn,
        (w1, b1.reshape(1, -1), w2, b2.reshape(1, -1)),
        out_dim=w2.shape[1], out_dtype=out_dtype,
        max_row_tile=256,                                 # cap tr for FFN vreg pressure
        transcendentals_per_row=w1.shape[1] + 1)          # tanh per hidden + rsqrt


# ---------------------------------------------------------------------------
# Pure-JAX references (same casting discipline as the kernels)
# ---------------------------------------------------------------------------

def _layernorm_ref(x, gamma, beta):
    x = x.astype(jnp.float32)
    mu = jnp.mean(x, axis=-1, keepdims=True)
    var = jnp.mean(jnp.square(x - mu), axis=-1, keepdims=True)
    return (x - mu) * jax.lax.rsqrt(var + EPS) * gamma + beta


def prenorm_linear_ref(params, x):
    y = _layernorm_ref(x, params["gamma"], params["beta"])
    return (jnp.dot(y.astype(params["w"].dtype), params["w"],
                    preferred_element_type=jnp.float32) + params["b"])


def prenorm_ffn_ref(params, x):
    y = _layernorm_ref(x, params["gamma"], params["beta"])
    h = (jnp.dot(y.astype(params["w1"].dtype), params["w1"],
                 preferred_element_type=jnp.float32) + params["b1"])
    h = _gelu_tanh(h)
    return (jnp.dot(h.astype(params["w2"].dtype), params["w2"],
                    preferred_element_type=jnp.float32) + params["b2"])


# ---------------------------------------------------------------------------

if __name__ == "__main__":
    # rows = B*N = 256; dim / hidden multiples of 256 (fills the 256x256 MXU on
    # v6e/v7x); output 256 lanes wide -> lane-dense unmasked stores.
    B, N, dim, hidden = 2, 128, 256, 512

    key = jax.random.PRNGKey(0)
    kx, kg, kb, k1, k2, k3 = jax.random.split(key, 6)

    x = jax.random.normal(kx, (B, N, dim), jnp.float32)
    gamma = 1.0 + 0.1 * jax.random.normal(kg, (dim,), jnp.float32)
    beta = 0.1 * jax.random.normal(kb, (dim,), jnp.float32)

    lin_params = dict(
        gamma=gamma, beta=beta,
        w=(jax.random.normal(k1, (dim, dim), jnp.float32) / math.sqrt(dim)).astype(jnp.bfloat16),
        b=jnp.zeros((dim,), jnp.float32),
    )
    ffn_params = dict(
        gamma=gamma, beta=beta,
        w1=(jax.random.normal(k2, (dim, hidden), jnp.float32) / math.sqrt(dim)).astype(jnp.bfloat16),
        b1=jnp.zeros((hidden,), jnp.float32),
        w2=(jax.random.normal(k3, (hidden, dim), jnp.float32) / math.sqrt(hidden)).astype(jnp.bfloat16),
        b2=jnp.zeros((dim,), jnp.float32),
    )

    # Called eagerly (pallas_call compiles at call time) so the Buffered(1)
    # fallback inside fused_prenorm can take effect if the feature is rejected.
    out_lin = prenorm_linear(lin_params, x)
    out_ffn = prenorm_ffn(ffn_params, x)
    # bf16-in / bf16-out option (halves HBM read + writeback for bf16 pipelines).
    x_bf16 = x.astype(jnp.bfloat16)
    out_lin_bf16 = prenorm_linear(lin_params, x_bf16, out_dtype=jnp.bfloat16)
    jax.block_until_ready((out_lin, out_ffn, out_lin_bf16))

    ref_lin = prenorm_linear_ref(lin_params, x)
    ref_ffn = prenorm_ffn_ref(ffn_params, x)
    ref_lin_bf = prenorm_linear_ref(lin_params, x_bf16.astype(jnp.float32))

    assert out_lin.shape == (B, N, dim) and out_lin.dtype == jnp.float32
    assert out_ffn.shape == (B, N, dim) and out_ffn.dtype == jnp.float32
    assert out_lin_bf16.shape == (B, N, dim) and out_lin_bf16.dtype == jnp.bfloat16
    assert bool(jnp.allclose(out_lin, ref_lin, atol=1e-2, rtol=1e-2)), (
        float(jnp.max(jnp.abs(out_lin - ref_lin))))
    assert bool(jnp.allclose(out_ffn, ref_ffn, atol=1e-2, rtol=1e-2)), (
        float(jnp.max(jnp.abs(out_ffn - ref_ffn))))
    assert bool(jnp.allclose(out_lin_bf16.astype(jnp.float32), ref_lin_bf,
                             atol=3e-2, rtol=3e-2)), (
        float(jnp.max(jnp.abs(out_lin_bf16.astype(jnp.float32) - ref_lin_bf))))

    print("KERNEL_OK")
</pallas_src>

<mosaic_0001>
module attributes {stable_mosaic.version = 11 : i64} {
  func.func @kernel(%arg0: i32, %arg1: memref<256x256xf32, #tpu.memory_space<vmem>>, %arg2: memref<1x256xf32, #tpu.memory_space<vmem>>, %arg3: memref<1x256xf32, #tpu.memory_space<vmem>>, %arg4: memref<256x256xbf16, #tpu.memory_space<vmem>>, %arg5: memref<1x256xf32, #tpu.memory_space<vmem>>, %arg6: memref<256x256xf32, #tpu.memory_space<vmem>>) attributes {dimension_semantics = [#tpu.dimension_semantics<parallel>], iteration_bounds = array<i64: 1>, scalar_prefetch = 0 : i64, scratch_operands = 0 : i64, tpu.core_type = #tpu.core_type<tc>, window_params = [{transform_indices = @transform_0, window_bounds = array<i64: 256, 256>}, {pipeline_mode = #tpu.pipeline_mode<synchronous>, transform_indices = @transform_1, window_bounds = array<i64: 1, 256>}, {pipeline_mode = #tpu.pipeline_mode<synchronous>, transform_indices = @transform_2, window_bounds = array<i64: 1, 256>}, {pipeline_mode = #tpu.pipeline_mode<synchronous>, transform_indices = @transform_3, window_bounds = array<i64: 256, 256>}, {pipeline_mode = #tpu.pipeline_mode<synchronous>, transform_indices = @transform_4, window_bounds = array<i64: 1, 256>}, {transform_indices = @transform_5, window_bounds = array<i64: 256, 256>}]} {
    %c0 = arith.constant 0 : index
    %c0_0 = arith.constant 0 : index
    %0 = vector.load %arg1[%c0, %c0_0] : memref<256x256xf32, #tpu.memory_space<vmem>>, vector<256x256xf32>
    %cst = arith.constant dense<0.000000e+00> : vector<256xf32>
    %1 = vector.multi_reduction <add>, %0, %cst [1] : vector<256x256xf32> to vector<256xf32>
    %2 = vector.shape_cast %1 : vector<256xf32> to vector<256x1xf32>
    %cst_1 = arith.constant 2.560000e+02 : f32
    %3 = vector.broadcast %cst_1 : f32 to vector<256x1xf32>
    %4 = arith.divf %2, %3 : vector<256x1xf32>
    %5 = vector.broadcast %4 : vector<256x1xf32> to vector<256x256xf32>
    %6 = arith.subf %0, %5 : vector<256x256xf32>
    %7 = arith.mulf %6, %6 : vector<256x256xf32>
    %cst_2 = arith.constant dense<0.000000e+00> : vector<256xf32>
    %8 = vector.multi_reduction <add>, %7, %cst_2 [1] : vector<256x256xf32> to vector<256xf32>
    %9 = vector.shape_cast %8 : vector<256xf32> to vector<256x1xf32>
    %cst_3 = arith.constant 2.560000e+02 : f32
    %10 = vector.broadcast %cst_3 : f32 to vector<256x1xf32>
    %11 = arith.divf %9, %10 : vector<256x1xf32>
    %12 = vector.broadcast %4 : vector<256x1xf32> to vector<256x256xf32>
    %13 = arith.subf %0, %12 : vector<256x256xf32>
    %cst_4 = arith.constant 9.99999974E-6 : f32
    %14 = vector.broadcast %cst_4 : f32 to vector<256x1xf32>
    %15 = arith.addf %11, %14 : vector<256x1xf32>
    %16 = math.rsqrt %15 : vector<256x1xf32>
    %17 = vector.broadcast %16 : vector<256x1xf32> to vector<256x256xf32>
    %18 = arith.mulf %13, %17 : vector<256x256xf32>
    %c0_5 = arith.constant 0 : index
    %c0_6 = arith.constant 0 : index
    %19 = vector.load %arg2[%c0_5, %c0_6] : memref<1x256xf32, #tpu.memory_space<vmem>>, vector<1x256xf32>
    %20 = vector.broadcast %19 : vector<1x256xf32> to vector<256x256xf32>
    %21 = arith.mulf %18, %20 : vector<256x256xf32>
    %c0_7 = arith.constant 0 : index
    %c0_8 = arith.constant 0 : index
    %22 = vector.load %arg3[%c0_7, %c0_8] : memref<1x256xf32, #tpu.memory_space<vmem>>, vector<1x256xf32>
    %23 = vector.broadcast %22 : vector<1x256xf32> to vector<256x256xf32>
    %24 = arith.addf %21, %23 : vector<256x256xf32>
    %25 = arith.truncf %24 : vector<256x256xf32> to vector<256x256xbf16>
    %c0_9 = arith.constant 0 : index
    %c0_10 = arith.constant 0 : index
    %26 = vector.load %arg4[%c0_9, %c0_10] : memref<256x256xbf16, #tpu.memory_space<vmem>>, vector<256x256xbf16>
    %cst_11 = arith.constant dense<0.000000e+00> : vector<256x256xf32>
    %27 = tpu.matmul %25, %26, %cst_11 {dimension_numbers = #tpu.dot_dimension_numbers<[1], [0], [0], [1], [0, 0, 1, 1], [], []>} : vector<256x256xbf16>, vector<256x256xbf16>, vector<256x256xf32> -> vector<256x256xf32>
    %c0_12 = arith.constant 0 : index
    %c0_13 = arith.constant 0 : index
    %28 = vector.load %arg5[%c0_12, %c0_13] : memref<1x256xf32, #tpu.memory_space<vmem>>, vector<1x256xf32>
    %29 = vector.broadcast %28 : vector<1x256xf32> to vector<256x256xf32>
    %30 = arith.addf %27, %29 : vector<256x256xf32>
    %c0_14 = arith.constant 0 : index
    %c0_15 = arith.constant 0 : index
    %31 = vector.load %arg6[%c0_14, %c0_15] : memref<256x256xf32, #tpu.memory_space<vmem>>, vector<256x256xf32>
    tpu.vector_store %arg6[%c0_14, %c0_15], %30 {strides = array<i32>} : memref<256x256xf32, #tpu.memory_space<vmem>>, vector<256x256xf32>,
    return
  }
  func.func @transform_0(%arg0: i32) -> (i32, i32) {
    %c0_i32 = arith.constant 0 : i32
    %c0_i32_0 = arith.constant 0 : i32
    return %arg0, %c0_i32 : i32, i32
  }
  func.func @transform_1(%arg0: i32) -> (i32, i32) {
    %c0_i32 = arith.constant 0 : i32
    %c0_i32_0 = arith.constant 0 : i32
    %c0_i32_1 = arith.constant 0 : i32
    return %c0_i32, %c0_i32_0 : i32, i32
  }
  func.func @transform_2(%arg0: i32) -> (i32, i32) {
    %c0_i32 = arith.constant 0 : i32
    %c0_i32_0 = arith.constant 0 : i32
    %c0_i32_1 = arith.constant 0 : i32
    return %c0_i32, %c0_i32_0 : i32, i32
  }
  func.func @transform_3(%arg0: i32) -> (i32, i32) {
    %c0_i32 = arith.constant 0 : i32
    %c0_i32_0 = arith.constant 0 : i32
    %c0_i32_1 = arith.constant 0 : i32
    return %c0_i32, %c0_i32_0 : i32, i32
  }
  func.func @transform_4(%arg0: i32) -> (i32, i32) {
    %c0_i32 = arith.constant 0 : i32
    %c0_i32_0 = arith.constant 0 : i32
    %c0_i32_1 = arith.constant 0 : i32
    return %c0_i32, %c0_i32_0 : i32, i32
  }
  func.func @transform_5(%arg0: i32) -> (i32, i32) {
    %c0_i32 = arith.constant 0 : i32
    %c0_i32_0 = arith.constant 0 : i32
    return %arg0, %c0_i32 : i32, i32
  }
}

module attributes {stable_mosaic.version = 11 : i64} {
  func.func @kernel(%arg0: i32, %arg1: memref<256x256xf32, #tpu.memory_space<vmem>>, %arg2: memref<1x256xf32, #tpu.memory_space<vmem>>, %arg3: memref<1x256xf32, #tpu.memory_space<vmem>>, %arg4: memref<256x256xbf16, #tpu.memory_space<vmem>>, %arg5: memref<1x256xf32, #tpu.memory_space<vmem>>, %arg6: memref<256x256xf32, #tpu.memory_space<vmem>>) attributes {dimension_semantics = [#tpu.dimension_semantics<parallel>], iteration_bounds = array<i64: 1>, scalar_prefetch = 0 : i64, scratch_operands = 0 : i64, tpu.core_type = #tpu.core_type<tc>, window_params = [{transform_indices = @transform_0, window_bounds = array<i64: 256, 256>}, {pipeline_mode = #tpu.pipeline_mode<synchronous>, transform_indices = @transform_1, window_bounds = array<i64: 1, 256>}, {pipeline_mode = #tpu.pipeline_mode<synchronous>, transform_indices = @transform_2, window_bounds = array<i64: 1, 256>}, {pipeline_mode = #tpu.pipeline_mode<synchronous>, transform_indices = @transform_3, window_bounds = array<i64: 256, 256>}, {pipeline_mode = #tpu.pipeline_mode<synchronous>, transform_indices = @transform_4, window_bounds = array<i64: 1, 256>}, {transform_indices = @transform_5, window_bounds = array<i64: 256, 256>}]} {
    %c0 = arith.constant 0 : index
    %c0_0 = arith.constant 0 : index
    %0 = vector.load %arg1[%c0, %c0_0] : memref<256x256xf32, #tpu.memory_space<vmem>>, vector<256x256xf32>
    %cst = arith.constant dense<0.000000e+00> : vector<256xf32>
    %1 = vector.multi_reduction <add>, %0, %cst [1] : vector<256x256xf32> to vector<256xf32>
    %2 = vector.shape_cast %1 : vector<256xf32> to vector<256x1xf32>
    %cst_1 = arith.constant 2.560000e+02 : f32
    %3 = vector.broadcast %cst_1 : f32 to vector<256x1xf32>
    %4 = arith.divf %2, %3 : vector<256x1xf32>
    %5 = vector.broadcast %4 : vector<256x1xf32> to vector<256x256xf32>
    %6 = arith.subf %0, %5 : vector<256x256xf32>
    %7 = arith.mulf %6, %6 : vector<256x256xf32>
    %cst_2 = arith.constant dense<0.000000e+00> : vector<256xf32>
    %8 = vector.multi_reduction <add>, %7, %cst_2 [1] : vector<256x256xf32> to vector<256xf32>
    %9 = vector.shape_cast %8 : vector<256xf32> to vector<256x1xf32>
    %cst_3 = arith.constant 2.560000e+02 : f32
    %10 = vector.broadcast %cst_3 : f32 to vector<256x1xf32>
    %11 = arith.divf %9, %10 : vector<256x1xf32>
    %12 = vector.broadcast %4 : vector<256x1xf32> to vector<256x256xf32>
    %13 = arith.subf %0, %12 : vector<256x256xf32>
    %cst_4 = arith.constant 9.99999974E-6 : f32
    %14 = vector.broadcast %cst_4 : f32 to vector<256x1xf32>
    %15 = arith.addf %11, %14 : vector<256x1xf32>
    %16 = math.rsqrt %15 : vector<256x1xf32>
    %17 = vector.broadcast %16 : vector<256x1xf32> to vector<256x256xf32>
    %18 = arith.mulf %13, %17 : vector<256x256xf32>
    %c0_5 = arith.constant 0 : index
    %c0_6 = arith.constant 0 : index
    %19 = vector.load %arg2[%c0_5, %c0_6] : memref<1x256xf32, #tpu.memory_space<vmem>>, vector<1x256xf32>
    %20 = vector.broadcast %19 : vector<1x256xf32> to vector<256x256xf32>
    %21 = arith.mulf %18, %20 : vector<256x256xf32>
    %c0_7 = arith.constant 0 : index
    %c0_8 = arith.constant 0 : index
    %22 = vector.load %arg3[%c0_7, %c0_8] : memref<1x256xf32, #tpu.memory_space<vmem>>, vector<1x256xf32>
    %23 = vector.broadcast %22 : vector<1x256xf32> to vector<256x256xf32>
    %24 = arith.addf %21, %23 : vector<256x256xf32>
    %25 = arith.truncf %24 : vector<256x256xf32> to vector<256x256xbf16>
    %c0_9 = arith.constant 0 : index
    %c0_10 = arith.constant 0 : index
    %26 = vector.load %arg4[%c0_9, %c0_10] : memref<256x256xbf16, #tpu.memory_space<vmem>>, vector<256x256xbf16>
    %cst_11 = arith.constant dense<0.000000e+00> : vector<256x256xf32>
    %27 = tpu.matmul %25, %26, %cst_11 {dimension_numbers = #tpu.dot_dimension_numbers<[1], [0], [0], [1], [0, 0, 1, 1], [], []>} : vector<256x256xbf16>, vector<256x256xbf16>, vector<256x256xf32> -> vector<256x256xf32>
    %c0_12 = arith.constant 0 : index
    %c0_13 = arith.constant 0 : index
    %28 = vector.load %arg5[%c0_12, %c0_13] : memref<1x256xf32, #tpu.memory_space<vmem>>, vector<1x256xf32>
    %29 = vector.broadcast %28 : vector<1x256xf32> to vector<256x256xf32>
    %30 = arith.addf %27, %29 : vector<256x256xf32>
    %c0_14 = arith.constant 0 : index
    %c0_15 = arith.constant 0 : index
    %31 = vector.load %arg6[%c0_14, %c0_15] : memref<256x256xf32, #tpu.memory_space<vmem>>, vector<256x256xf32>
    tpu.vector_store %arg6[%c0_14, %c0_15], %30 {strides = array<i32>} : memref<256x256xf32, #tpu.memory_space<vmem>>, vector<256x256xf32>,
    return
  }
  func.func @transform_0(%arg0: i32) -> (i32, i32) {
    %c0_i32 = arith.constant 0 : i32
    %c0_i32_0 = arith.constant 0 : i32
    return %arg0, %c0_i32 : i32, i32
  }
  func.func @transform_1(%arg0: i32) -> (i32, i32) {
    %c0_i32 = arith.constant 0 : i32
    %c0_i32_0 = arith.constant 0 : i32
    %c0_i32_1 = arith.constant 0 : i32
    return %c0_i32, %c0_i32_0 : i32, i32
  }
  func.func @transform_2(%arg0: i32) -> (i32, i32) {
    %c0_i32 = arith.constant 0 : i32
    %c0_i32_0 = arith.constant 0 : i32
    %c0_i32_1 = arith.constant 0 : i32
    return %c0_i32, %c0_i32_0 : i32, i32
  }
  func.func @transform_3(%arg0: i32) -> (i32, i32) {
    %c0_i32 = arith.constant 0 : i32
    %c0_i32_0 = arith.constant 0 : i32
    %c0_i32_1 = arith.constant 0 : i32
    return %c0_i32, %c0_i32_0 : i32, i32
  }
  func.func @transform_4(%arg0: i32) -> (i32, i32) {
    %c0_i32 = arith.constant 0 : i32
    %c0_i32_0 = arith.constant 0 : i32
    %c0_i32_1 = arith.constant 0 : i32
    return %c0_i32, %c0_i32_0 : i32, i32
  }
  func.func @transform_5(%arg0: i32) -> (i32, i32) {
    %c0_i32 = arith.constant 0 : i32
    %c0_i32_0 = arith.constant 0 : i32
    return %arg0, %c0_i32 : i32, i32
  }
}

</mosaic_0001>

<bundles_post_ra>
// kernel: tpu_custom_call.1
= control target key start
LH: loop header
LB: loop body
LE: loop exit
PB: predicated region body
PF: predicated region fallthrough
CT: control target
= control target key end

     0   :  { %10 = vsyncpa [#allocation3], 0  ;;  %s3376_s0 = inlined_call_operand.hbm [shape: f32[256,256], index: 0, kind: input, shape index: {}]   ;;  %s3377_s1 = inlined_call_operand.hbm [shape: f32[1,256], index: 1, kind: input, shape index: {}]   ;;  %s3378_s2 = inlined_call_operand.hbm [shape: f32[1,256], index: 2, kind: input, shape index: {}]   ;;  %s3379_s3 = inlined_call_operand.hbm [shape: bf16[256,256], index: 3, kind: input, shape index: {}]   ;;  %s3380_s4 = inlined_call_operand.vmem [shape: f32[1,256], index: 4, kind: input, shape index: {}]   ;;  %s3381_s5 = inlined_call_operand.hbm [shape: f32[256,256], index: 5, kind: output, shape index: {}]  }
   0x1   :  { %11 = vsyncpa [#allocation6], 0 }
   0x2   :  { %12 = vsyncpa [#allocation9], 0  ;;  %s32_s20 = sshll.u32 %s3377_s1, 4  ;;  %s33_s20 = int_to_ptr.hbm [resolvable:$true] %s32_s20 }
   0x3   :  { %13 = vsyncpa [#allocation4], 0  ;;  %s2126_s21 = smov [#allocation5]   ;;  %s18_s25 = sshll.u32 %s3376_s0, 4  ;;  %s19_s25 = int_to_ptr.hbm [resolvable:$true] %s18_s25 }
   0x4   :  { %s34_s22 = sshll.u32 %s2126_s21, 4  ;;  %s2127_s26 = smov [#allocation2]   ;;  %s35_s22 = int_to_ptr.vmem [resolvable:$true] %s34_s22 }
   0x5   :  { %37 = dma.hbm_to_vmem [thread:$0]  %s33_s20, 32, %s35_s22, [#allocation6]  }
   0x6   :  { %s20_s27 = sshll.u32 %s2127_s26, 4  ;;  %s2128_s28 = smov 256   ;;  %s21_s27 = int_to_ptr.vmem [resolvable:$true] %s20_s27 }
   0x7   :  { %s2129_s29 = smov 16   ;;  %s43_s6 = sshll.u32 %s3378_s2, 4  ;;  %s44_s6 = int_to_ptr.hbm [resolvable:$true] %s43_s6 }
   0x8   :  { %26 = dma.hbm_to_vmem [thread:$0]  %s19_s25, 8192, %s21_s27, [#allocation3], %s2128_s28, %s2128_s28, %s2129_s29  }
   0x9   :  { %s2130_s7 = smov [#allocation7]   ;;  %s53_s10 = sshll.u32 %s3379_s3, 4  ;;  %s54_s10 = int_to_ptr.hbm [resolvable:$true] %s53_s10 }
   0xa   :  { %s45_s8 = sshll.u32 %s2130_s7, 4  ;;  %s2131_s11 = smov [#allocation8]   ;;  %s46_s8 = int_to_ptr.vmem [resolvable:$true] %s45_s8 }
   0xb   :  { %48 = dma.hbm_to_vmem [thread:$0]  %s44_s6, 32, %s46_s8, [#allocation6]  }
   0xc   :  { %s55_s12 = sshll.u32 %s2131_s11, 4  ;;  %s2132_s13 = smov 128   ;;  %s56_s12 = int_to_ptr.vmem [resolvable:$true] %s55_s12 }
   0xd   :  { %s2133_s14 = smov 8  }
   0xe   :  { %61 = dma.hbm_to_vmem [thread:$0]  %s54_s10, 4096, %s56_s12, [#allocation9], %s2132_s13, %s2132_s13, %s2133_s14  }
   0xf   :  { %2118 = dma.done.wait [#allocation3], 8192  }
  0x10   :  { %2119 = vsyncadd [#allocation3], 4294959104 }
  0x11   :  { %2120 = dma.done.wait [#allocation6], 64  }
  0x12   :  { %2121 = vsyncadd [#allocation6], 4294967232 }
  0x13   :  { %2122 = dma.done.wait [#allocation9], 4096  }
  0x14   :  { %2123 = vsyncadd [#allocation9], 4294963200  ;;  %v2181_v0 = vld [vmem:[#allocation2 + $0x20] sm:$0xff]  ;;  %v2183_v1 = vld [vmem:[#allocation2 + $0x28] sm:$0xff]  ;;  %v2134_v27 = vmov 256.0   ;;  %s1747_s18 = sshll.u32 %s3381_s5, 4  ;;  %s1748_s18 = int_to_ptr.hbm [resolvable:$true] %s1747_s18 }
  0x15   :  { %v80_v2 = vld [vmem:[#allocation2] sm:$0xff]  ;;  %v150_v3 = vadd.f32 %v2183_v1, %v2181_v0  ;;  %v81_v4 = vld [vmem:[#allocation2 + $0x8] sm:$0xff]  ;;  %v86_v8 = vld [vmem:[#allocation2 + $0x30] sm:$0xff]  ;;  %1932 = vrcp.f32 %v2134_v27 }
  0x16   :  { %v144_v5 = vadd.f32 %v81_v4, %v80_v2  ;;  %v88_v6 = vld [vmem:[#allocation2 + $0x40] sm:$0xff]  ;;  %v89_v7 = vld [vmem:[#allocation2 + $0x48] sm:$0xff]  ;;  %v87_v9 = vld [vmem:[#allocation2 + $0x38] sm:$0xff] }
  0x17   :  { %151 = vadd.xlane.f32.xlu1 %v150_v3  ;;  %v156_v10 = vadd.f32 %v89_v7, %v88_v6  ;;  %v82_v11 = vld [vmem:[#allocation2 + $0x10] sm:$0xff]  ;;  %v83_v12 = vld [vmem:[#allocation2 + $0x18] sm:$0xff]  ;;  %v153_v13 = vadd.f32 %v87_v9, %v86_v8  ;;  %v2197_v20 = vld [vmem:[#allocation2 + $0x60] sm:$0xff] }
  0x18   :  { %145 = vadd.xlane.f32.xlu0 %v144_v5  ;;  %v2187_v14 = vld [vmem:[#allocation2 + $0x50] sm:$0xff]  ;;  %v2189_v15 = vld [vmem:[#allocation2 + $0x58] sm:$0xff]  ;;  %v147_v16 = vadd.f32 %v83_v12, %v82_v11  ;;  %v2199_v21 = vld [vmem:[#allocation2 + $0x68] sm:$0xff] }
  0x19   :  { %157 = vadd.xlane.f32.xlu2 %v156_v10  ;;  %v159_v17 = vadd.f32 %v2189_v15, %v2187_v14  ;;  %v2193_v18 = vld [vmem:[#allocation2 + $0x70] sm:$0xff]  ;;  %v2195_v19 = vld [vmem:[#allocation2 + $0x78] sm:$0xff]  ;;  %v162_v23 = vadd.f32 %v2199_v21, %v2197_v20  ;;  %v2205_v24 = vld [vmem:[#allocation2 + $0x80] sm:$0xff] }
  0x1a   :  { %v165_v22 = vadd.f32 %v2195_v19, %v2193_v18  ;;  %v2207_v25 = vld [vmem:[#allocation2 + $0x88] sm:$0xff]  ;;  %v2224_v47 = vld [vmem:[#allocation2 + $0x90] sm:$0xff]  ;;  %v2226_v48 = vld [vmem:[#allocation2 + $0x98] sm:$0xff] }
  0x1b   :  { %v168_v26 = vadd.f32 %v2207_v25, %v2205_v24  ;;  %v1933_v28 = vpop.eup %1932  ;;  %v171_v55 = vadd.f32 %v2226_v48, %v2224_v47  ;;  %v2288_v27 = vld [vmem:[#allocation2 + $0xb0] sm:$0xff] }
  0x1c   :  { %v241_v29 = vmul.f32 256.0, %v1933_v28  ;;  %vm245_vm0 = vweird.f32 %v1933_v28 }
  0x1e   :  { %v242_v30 = vsub.f32 1.0, %v241_v29 }
  0x1f   :  { %154 = vadd.xlane.f32.xlu1 %v153_v13 }
  0x20   :  { %148 = vadd.xlane.f32.xlu0 %v147_v16  ;;  %v243_v31 = vmul.f32 %v1933_v28, %v242_v30 }
  0x21   :  { %160 = vadd.xlane.f32.xlu2 %v159_v17 }
  0x22   :  { %v244_v32 = vadd.f32 %v1933_v28, %v243_v31 }
  0x24   :  { %v2211_v33 = vsel %vm245_vm0, %v1933_v28, %v244_v32  ;;  %v2290_v28 = vld [vmem:[#allocation2 + $0xb8] sm:$0xff] }
  0x27   :  { %166 = vadd.xlane.f32.xlu1 %v165_v22 }
  0x28   :  { %163 = vadd.xlane.f32.xlu0 %v162_v23  ;;  %v2280_v23 = vld [vmem:[#allocation2 + $0xd0] sm:$0xff] }
  0x2f   :  { %169 = vadd.xlane.f32.xlu1 %v168_v26  ;;  %v2282_v26 = vld [vmem:[#allocation2 + $0xd8] sm:$0xff] }
  0x30   :  { %v183_v29 = vadd.f32 %v2282_v26, %v2280_v23 }
  0x8a   :  { %v152_v34 = vpop.xlane.xlu1 %151 }
  0x8b   :  { %v146_v35 = vpop.xlane.xlu0 %145  ;;  %v249_v49 = vmul.f32 %v2211_v33, %v152_v34 }
  0x8c   :  { %v247_v36 = vmul.f32 %v2211_v33, %v146_v35  ;;  %v158_v39 = vpop.xlane.xlu2 %157  ;;  %v177_v35 = vadd.f32 %v2290_v28, %v2288_v27 }
  0x8d   :  { %v251_v46 = vmul.f32 %v2211_v33, %v158_v39  ;;  %v2249_v60 = vsub.f32 %v2181_v0, %v249_v49  ;;  %v2252_v61 = vsub.f32 %v2183_v1, %v249_v49  ;;  %v2303_v39 = vld [vmem:[#allocation2 + $0xe0] sm:$0xff] }
  0x8e   :  { %v2214_v37 = vsub.f32 %v80_v2, %v247_v36  ;;  %v2216_v38 = vsub.f32 %v81_v4, %v247_v36 }
  0x8f   :  { %v2240_v56 = vsub.f32 %v88_v6, %v251_v46  ;;  %v2242_v57 = vsub.f32 %v89_v7, %v251_v46  ;;  %v347_v6 = vmul.f32 %v2249_v60, %v2249_v60  ;;  %v348_v7 = vmul.f32 %v2252_v61, %v2252_v61 }
  0x90   :  { %v343_v40 = vmul.f32 %v2214_v37, %v2214_v37  ;;  %v344_v41 = vmul.f32 %v2216_v38, %v2216_v38 }
  0x91   :  { %v351_v5 = vmul.f32 %v2240_v56, %v2240_v56  ;;  %v352_v0 = vmul.f32 %v2242_v57, %v2242_v57  ;;  %v413_v16 = vadd.f32 %v348_v7, %v347_v6  ;;  %v2352_v6 = vld [vmem:[#allocation2 + $0x110] sm:$0xff]  ;;  %v2354_v7 = vld [vmem:[#allocation2 + $0x118] sm:$0xff] }
  0x92   :  { %v155_v42 = vpop.xlane.xlu1 %154  ;;  %v407_v43 = vadd.f32 %v344_v41, %v343_v40  ;;  %v2305_v40 = vld [vmem:[#allocation2 + $0xe8] sm:$0xff]  ;;  %v2311_v41 = vld [vmem:[#allocation2 + $0xc0] sm:$0xff] }
  0x93   :  { %v250_v44 = vmul.f32 %v2211_v33, %v155_v42  ;;  %v149_v45 = vpop.xlane.xlu0 %148  ;;  %v419_v10 = vadd.f32 %v352_v0, %v351_v5  ;;  %v2313_v42 = vld [vmem:[#allocation2 + $0xc8] sm:$0xff]  ;;  %v2346_v0 = vld [vmem:[#allocation2 + $0x100] sm:$0xff] }
  0x94   :  { %v248_v50 = vmul.f32 %v2211_v33, %v149_v45  ;;  %408 = vadd.xlane.f32.xlu2 %v407_v43  ;;  %v161_v3 = vpop.xlane.xlu2 %160  ;;  %v186_v43 = vadd.f32 %v2305_v40, %v2303_v39  ;;  %v180_v46 = vadd.f32 %v2313_v42, %v2311_v41 }
  0x95   :  { %v2230_v51 = vsub.f32 %v86_v8, %v250_v44  ;;  %v2232_v52 = vsub.f32 %v87_v9, %v250_v44  ;;  %v252_v1 = vmul.f32 %v2211_v33, %v161_v3  ;;  %v2267_v8 = vld [vmem:[#allocation2 + $0xa0] sm:$0xff]  ;;  %v2269_v9 = vld [vmem:[#allocation2 + $0xa8] sm:$0xff] }
  0x96   :  { %v2234_v53 = vsub.f32 %v82_v11, %v248_v50  ;;  %v2236_v54 = vsub.f32 %v83_v12, %v248_v50  ;;  %v174_v13 = vadd.f32 %v2269_v9, %v2267_v8 }
  0x97   :  { %v349_v58 = vmul.f32 %v2230_v51, %v2230_v51  ;;  %v350_v59 = vmul.f32 %v2232_v52, %v2232_v52  ;;  %v2272_v11 = vsub.f32 %v2187_v14, %v252_v1  ;;  %v2275_v12 = vsub.f32 %v2189_v15, %v252_v1  ;;  %v2348_v1 = vld [vmem:[#allocation2 + $0x108] sm:$0xff] }
  0x98   :  { %v345_v62 = vmul.f32 %v2234_v53, %v2234_v53  ;;  %v346_v63 = vmul.f32 %v2236_v54, %v2236_v54 }
  0x99   :  { %v416_v2 = vadd.f32 %v350_v59, %v349_v58  ;;  %v353_v14 = vmul.f32 %v2272_v11, %v2272_v11  ;;  %v354_v15 = vmul.f32 %v2275_v12, %v2275_v12  ;;  %v2330_v59 = vld [vmem:[#allocation2 + $0xf0] sm:$0xff] }
  0x9a   :  { %v410_v4 = vadd.f32 %v346_v63, %v345_v62  ;;  %v167_v30 = vpop.xlane.xlu1 %166 }
  0x9b   :  { %417 = vadd.xlane.f32.xlu1 %v416_v2  ;;  %v164_v17 = vpop.xlane.xlu0 %163  ;;  %v422_v34 = vadd.f32 %v354_v15, %v353_v14  ;;  %v254_v36 = vmul.f32 %v2211_v33, %v167_v30  ;;  %v1905_v14 = vld [vmem:[#allocation8 + $0x74] sm:$0xf0]  ;;  %v1884_v15 = vld [vmem:[#allocation8 + $0xf0] sm:$0xf] }
  0x9c   :  { %172 = vadd.xlane.f32.xlu2 %v171_v55  ;;  %411 = vadd.xlane.f32.xlu0 %v410_v4  ;;  %v253_v22 = vmul.f32 %v2211_v33, %v164_v17  ;;  %v1921_v30 = vld [vmem:[#allocation8 + $0xf4] sm:$0xf0] }
  0x9d   :  { %v2318_v44 = vsub.f32 %v2193_v18, %v254_v36  ;;  %v2321_v45 = vsub.f32 %v2195_v19, %v254_v36  ;;  %v2332_v19 = vld [vmem:[#allocation2 + $0xf8] sm:$0xff]  ;;  %v1885_v36 = vor.u32 %v1921_v30, %v1884_v15 }
  0x9e   :  { %v2295_v31 = vsub.f32 %v2197_v20, %v253_v22  ;;  %v2298_v32 = vsub.f32 %v2199_v21, %v253_v22  ;;  %v189_v3 = vadd.f32 %v2332_v19, %v2330_v59  ;;  %v1820_v22 = vld [vmem:[#allocation8 + $0x70] sm:$0xf]  ;;  %v1900_v30 = vld [vmem:[#allocation8 + $0x54] sm:$0xf] }
  0x9f   :  { %v357_v58 = vmul.f32 %v2318_v44, %v2318_v44  ;;  %v358_v18 = vmul.f32 %v2321_v45, %v2321_v45  ;;  %1410 = vmatpush.bf16.msra.mxu1 %v1885_v36 }
  0xa0   :  { %v355_v20 = vmul.f32 %v2295_v31, %v2295_v31  ;;  %v356_v21 = vmul.f32 %v2298_v32, %v2298_v32 }
  0xa1   :  { %v428_v2 = vadd.f32 %v358_v18, %v357_v58  ;;  %v1919_v18 = vld [vmem:[#allocation8 + $0xe4] sm:$0xf0] }
  0xa2   :  { %v425_v49 = vadd.f32 %v356_v21, %v355_v20  ;;  %v170_v50 = vpop.xlane.xlu1 %169  ;;  %v1920_v21 = vld [vmem:[#allocation8 + $0xf4] sm:$0xf] }
  0xa3   :  { %420 = vadd.xlane.f32.xlu1 %v419_v10  ;;  %v255_v55 = vmul.f32 %v2211_v33, %v170_v50  ;;  %v195_v10 = vadd.f32 %v2354_v7, %v2352_v6  ;;  %v1903_v50 = vld [vmem:[#allocation8 + $0x64] sm:$0xf0] }
  0xa4   :  { %175 = vadd.xlane.f32.xlu2 %v174_v13  ;;  %414 = vadd.xlane.f32.xlu0 %v413_v16  ;;  %v2358_v13 = vld [vmem:[#allocation2 + $0x120] sm:$0xff]  ;;  %v2360_v16 = vld [vmem:[#allocation2 + $0x128] sm:$0xff] }
  0xa5   :  { %v2335_v62 = vsub.f32 %v2205_v24, %v255_v55  ;;  %v2338_v63 = vsub.f32 %v2207_v25, %v255_v55  ;;  %v192_v25 = vadd.f32 %v2348_v1, %v2346_v0  ;;  %v198_v17 = vadd.f32 %v2360_v16, %v2358_v13  ;;  %v1876_v55 = vld [vmem:[#allocation8 + $0xe0] sm:$0xf] }
  0xa7   :  { %3409 = vst [vmem:[#allocation15_spill] sm:$0xff] %v2335_v62  ;;  %v359_v4 = vmul.f32 %v2335_v62, %v2335_v62  ;;  %v360_v5 = vmul.f32 %v2338_v63, %v2338_v63 }
  0xa8   :  { %3410 = vst [vmem:[#allocation16_spill] sm:$0xff] %v2338_v63 }
  0xa9   :  { %v431_v24 = vadd.f32 %v360_v5, %v359_v4  ;;  %v1877_v4 = vor.u32 %v1919_v18, %v1876_v55  ;;  %v1898_v18 = vld [vmem:[#allocation8 + $0x44] sm:$0xf] }
  0xab   :  { %184 = vadd.xlane.f32.xlu1 %v183_v29  ;;  %v1821_v29 = vor.u32 %v1905_v14, %v1820_v22  ;;  %1411 = vmatpush.bf16.msra.mxu1 %v1877_v4  ;;  %v1901_v22 = vld [vmem:[#allocation8 + $0x54] sm:$0xf0]  ;;  %v1868_v14 = vld [vmem:[#allocation8 + $0xd0] sm:$0xf] }
  0xac   :  { %423 = vadd.xlane.f32.xlu2 %v422_v34  ;;  %178 = vadd.xlane.f32.xlu0 %v177_v35  ;;  %v1904_v34 = vld [vmem:[#allocation8 + $0x74] sm:$0xf]  ;;  %v1822_v35 = vld [vmem:[#allocation8 + $0x78] sm:$0xf0] }
  0xad   :  { %v1825_v20 = vor.u32 %v1904_v34, %v1822_v35  ;;  %1321 = vmatpush.bf16.msra.mxu0 %v1821_v29  ;;  %v1917_v29 = vld [vmem:[#allocation8 + $0xd4] sm:$0xf0]  ;;  %v1806_v34 = vld [vmem:[#allocation8 + $0x58] sm:$0xf0] }
  0xae   :  { %v1869_v35 = vor.u32 %v1917_v29, %v1868_v14  ;;  %v1809_v36 = vor.u32 %v1900_v30, %v1806_v34  ;;  %v1896_v29 = vld [vmem:[#allocation8 + $0x34] sm:$0xf]  ;;  %v1790_v30 = vld [vmem:[#allocation8 + $0x38] sm:$0xf0] }
  0xaf   :  { %1499 = vmatpush.bf16.msra.mxu2 %v1825_v20  ;;  %v1916_v20 = vld [vmem:[#allocation8 + $0xd4] sm:$0xf] }
  0xb0   :  { %1412 = vmatpush.bf16.msra.mxu1 %v1869_v35  ;;  %v1793_v35 = vor.u32 %v1896_v29, %v1790_v30  ;;  %v1892_v29 = vld [vmem:[#allocation8 + $0x14] sm:$0xf]  ;;  %v1774_v30 = vld [vmem:[#allocation8 + $0x18] sm:$0xf0] }
  0xb3   :  { %187 = vadd.xlane.f32.xlu1 %v186_v43  ;;  %v1886_v43 = vld [vmem:[#allocation8 + $0xf8] sm:$0xf0] }
  0xb4   :  { %181 = vadd.xlane.f32.xlu0 %v180_v46  ;;  %426 = vadd.xlane.f32.xlu2 %v425_v49  ;;  %v1889_v46 = vor.u32 %v1920_v21, %v1886_v43  ;;  %v1812_v49 = vld [vmem:[#allocation8 + $0x60] sm:$0xf]  ;;  %v1870_v21 = vld [vmem:[#allocation8 + $0xd8] sm:$0xf0] }
  0xb5   :  { %v1813_v58 = vor.u32 %v1903_v50, %v1812_v49  ;;  %v1873_v43 = vor.u32 %v1916_v20, %v1870_v21  ;;  %v1899_v49 = vld [vmem:[#allocation8 + $0x44] sm:$0xf0]  ;;  %v1860_v50 = vld [vmem:[#allocation8 + $0xc0] sm:$0xf]  ;;  %v1854_v20 = vld [vmem:[#allocation8 + $0xb8] sm:$0xf0] }
  0xb6   :  { %1588 = vmatpush.bf16.msra.mxu3 %v1889_v46  ;;  %v1796_v46 = vld [vmem:[#allocation8 + $0x40] sm:$0xf] }
  0xb7   :  { %1322 = vmatpush.bf16.msra.mxu0 %v1813_v58  ;;  %v1797_v55 = vor.u32 %v1899_v49, %v1796_v46  ;;  %v1915_v58 = vld [vmem:[#allocation8 + $0xc4] sm:$0xf0]  ;;  %v1844_v49 = vld [vmem:[#allocation8 + $0xa0] sm:$0xf] }
  0xb8   :  { %v1895_v46 = vld [vmem:[#allocation8 + $0x24] sm:$0xf0] }
  0xbc   :  { %429 = vadd.xlane.f32.xlu0 %v428_v2  ;;  %190 = vadd.xlane.f32.xlu2 %v189_v3  ;;  %v1902_v2 = vld [vmem:[#allocation8 + $0x64] sm:$0xf]  ;;  %v1814_v3 = vld [vmem:[#allocation8 + $0x68] sm:$0xf0] }
  0xbd   :  { %v1817_v5 = vor.u32 %v1902_v2, %v1814_v3  ;;  %v1798_v2 = vld [vmem:[#allocation8 + $0x48] sm:$0xf0]  ;;  %v1861_v3 = vor.u32 %v1915_v58, %v1860_v50  ;;  %v1894_v58 = vld [vmem:[#allocation8 + $0x24] sm:$0xf] }
  0xbe   :  { %v1801_v4 = vor.u32 %v1898_v18, %v1798_v2  ;;  %v1782_v18 = vld [vmem:[#allocation8 + $0x28] sm:$0xf0] }
  0xbf   :  { %1500 = vmatpush.bf16.msra.mxu2 %v1817_v5  ;;  %v1914_v5 = vld [vmem:[#allocation8 + $0xc4] sm:$0xf]  ;;  %1413 = vmatpush.bf16.msra.mxu1 %v1861_v3  ;;  %v1785_v3 = vor.u32 %v1894_v58, %v1782_v18  ;;  %v1828_v58 = vld [vmem:[#allocation8 + $0x80] sm:$0xf]  ;;  %v1907_v18 = vld [vmem:[#allocation8 + $0x84] sm:$0xf0] }
  0xc3   :  { %1501 = vmatpush.bf16.msra.mxu2 %v1809_v36  ;;  %v1912_v36 = vld [vmem:[#allocation8 + $0xb4] sm:$0xf] }
  0xc4   :  { %432 = vadd.xlane.f32.xlu0 %v431_v24  ;;  %193 = vadd.xlane.f32.xlu2 %v192_v25  ;;  %v1918_v24 = vld [vmem:[#allocation8 + $0xe4] sm:$0xf]  ;;  %v1878_v25 = vld [vmem:[#allocation8 + $0xe8] sm:$0xf0]  ;;  %v1857_v21 = vor.u32 %v1912_v36, %v1854_v20  ;;  %v1777_v36 = vor.u32 %v1892_v29, %v1774_v30  ;;  %v1908_v20 = vld [vmem:[#allocation8 + $0x94] sm:$0xf] }
  0xc7   :  { %1502 = vmatpush.bf16.msra.mxu2 %v1801_v4  ;;  %v1910_v4 = vld [vmem:[#allocation8 + $0xa4] sm:$0xf] }
  0xcb   :  { %1503 = vmatpush.bf16.msra.mxu2 %v1793_v35 }
  0xcc   :  { %196 = vadd.xlane.f32.xlu0 %v195_v10  ;;  %v1881_v10 = vor.u32 %v1918_v24, %v1878_v25  ;;  %v1862_v24 = vld [vmem:[#allocation8 + $0xc8] sm:$0xf0] }
  0xcd   :  { %v1865_v25 = vor.u32 %v1914_v5, %v1862_v24  ;;  %v1846_v5 = vld [vmem:[#allocation8 + $0xa8] sm:$0xf0] }
  0xce   :  { %1589 = vmatpush.bf16.msra.mxu3 %v1881_v10  ;;  %v1788_v10 = vld [vmem:[#allocation8 + $0x30] sm:$0xf]  ;;  %v1849_v24 = vor.u32 %v1910_v4, %v1846_v5  ;;  %v1766_v4 = vld [vmem:[#allocation8 + $0x8] sm:$0xf0]  ;;  %v1906_v5 = vld [vmem:[#allocation8 + $0x84] sm:$0xf] }
  0xcf   :  { %1504 = vmatpush.bf16.msra.mxu2 %v1785_v3  ;;  %v1829_v3 = vor.u32 %v1907_v18, %v1828_v58 }
  0xd2   :  { %1590 = vmatpush.bf16.msra.mxu3 %v1873_v43  ;;  %v1780_v43 = vld [vmem:[#allocation8 + $0x20] sm:$0xf] }
  0xd3   :  { %v1781_v50 = vor.u32 %v1895_v46, %v1780_v43  ;;  %1505 = vmatpush.bf16.msra.mxu2 %v1777_v36 }
  0xd4   :  { %199 = vadd.xlane.f32.xlu0 %v198_v17  ;;  %v1804_v17 = vld [vmem:[#allocation8 + $0x50] sm:$0xf] }
  0xd5   :  { %v1805_v15 = vor.u32 %v1901_v22, %v1804_v17  ;;  %v1897_v17 = vld [vmem:[#allocation8 + $0x34] sm:$0xf0]  ;;  %v1852_v22 = vld [vmem:[#allocation8 + $0xb0] sm:$0xf] }
  0xd6   :  { %1591 = vmatpush.bf16.msra.mxu3 %v1865_v25  ;;  %v1789_v14 = vor.u32 %v1897_v17, %v1788_v10  ;;  %v1772_v25 = vld [vmem:[#allocation8 + $0x10] sm:$0xf]  ;;  %v1893_v10 = vld [vmem:[#allocation8 + $0x14] sm:$0xf0] }
  0xd7   :  { %1323 = vmatpush.bf16.msra.mxu0 %v1805_v15  ;;  %v1913_v15 = vld [vmem:[#allocation8 + $0xb4] sm:$0xf0]  ;;  %v1836_v17 = vld [vmem:[#allocation8 + $0x90] sm:$0xf] }
  0xd8   :  { %v1853_v34 = vor.u32 %v1913_v15, %v1852_v22  ;;  %v1909_v15 = vld [vmem:[#allocation8 + $0x94] sm:$0xf0] }
  0xd9   :  { %v1837_v35 = vor.u32 %v1909_v15, %v1836_v17 }
  0xda   :  { %1414 = vmatpush.bf16.msra.mxu1 %v1853_v34  ;;  %1592 = vmatpush.bf16.msra.mxu3 %v1857_v21  ;;  %v1838_v21 = vld [vmem:[#allocation8 + $0x98] sm:$0xf0] }
  0xdb   :  { %1324 = vmatpush.bf16.msra.mxu0 %v1797_v55  ;;  %v1911_v55 = vld [vmem:[#allocation8 + $0xa4] sm:$0xf0]  ;;  %v1841_v43 = vor.u32 %v1908_v20, %v1838_v21 }
  0xdc   :  { %v1845_v2 = vor.u32 %v1911_v55, %v1844_v49  ;;  %v1764_v49 = vld [vmem:[#allocation8] sm:$0xf] }
  0xde   :  { %1415 = vmatpush.bf16.msra.mxu1 %v1845_v2  ;;  %1593 = vmatpush.bf16.msra.mxu3 %v1849_v24  ;;  %v1890_v2 = vld [vmem:[#allocation8 + $0x4] sm:$0xf]  ;;  %v1830_v24 = vld [vmem:[#allocation8 + $0x88] sm:$0xf0] }
  0xdf   :  { %1325 = vmatpush.bf16.msra.mxu0 %v1789_v14  ;;  %v1773_v14 = vor.u32 %v1893_v10, %v1772_v25  ;;  %v1769_v25 = vor.u32 %v1890_v2, %v1766_v4  ;;  %v1833_v10 = vor.u32 %v1906_v5, %v1830_v24 }
  0xe1   :  { %1506 = vmatpush.bf16.msra.mxu2 %v1769_v25 }
  0xe2   :  { %1416 = vmatpush.bf16.msra.mxu1 %v1837_v35  ;;  %1594 = vmatpush.bf16.msra.mxu3 %v1841_v43 }
  0xe3   :  { %1326 = vmatpush.bf16.msra.mxu0 %v1781_v50  ;;  %v1891_v50 = vld [vmem:[#allocation8 + $0x4] sm:$0xf0] }
  0xe4   :  { %v1765_v55 = vor.u32 %v1891_v50, %v1764_v49 }
  0xe6   :  { %1417 = vmatpush.bf16.msra.mxu1 %v1829_v3  ;;  %1595 = vmatpush.bf16.msra.mxu3 %v1833_v10 }
  0xe7   :  { %1327 = vmatpush.bf16.msra.mxu0 %v1773_v14 }
  0xeb   :  { %1328 = vmatpush.bf16.msra.mxu0 %v1765_v55 }
 0x107   :  { %v409_v22 = vpop.xlane.xlu2 %408 }
 0x108   :  { %v503_v34 = vmul.f32 %v409_v22, %v2211_v33 }
 0x10a   :  { %v2365_v46 = vadd.f32 1e-05, %v503_v34 }
 0x10c   :  { %1934 = vrsqrt.f32 %v2365_v46  ;;  %vm573_vm2 = vweird.f32 %v2365_v46 }
 0x10e   :  { %v418_v17 = vpop.xlane.xlu1 %417 }
 0x10f   :  { %v506_v22 = vmul.f32 %v418_v17, %v2211_v33  ;;  %v173_v14 = vpop.xlane.xlu2 %172  ;;  %v412_v15 = vpop.xlane.xlu0 %411  ;;  %v951_v17 = vld [vmem:[#allocation5] sm:$0x3] }
 0x110   :  { %v256_v29 = vmul.f32 %v2211_v33, %v173_v14  ;;  %v504_v30 = vmul.f32 %v412_v15, %v2211_v33 }
 0x111   :  { %v2371_v34 = vadd.f32 1e-05, %v506_v22 }
 0x112   :  { %v1935_v35 = vpop.eup %1934  ;;  %v2374_v36 = vsub.f32 %v2224_v47, %v256_v29  ;;  %v2377_v20 = vsub.f32 %v2226_v48, %v256_v29  ;;  %v2379_v21 = vadd.f32 1e-05, %v504_v30 }
 0x113   :  { %v568_v43 = vmul.f32 %v1935_v35, %v2365_v46  ;;  %1936 = vrsqrt.f32 %v2371_v34  ;;  %vm574_vm1 = vweird.f32 %v1935_v35  ;;  %v2426_v46 = vperm.slane %v951_v17, 1 }
 0x114   :  { %3411 = vst [vmem:[#allocation17_spill] sm:$0xff] %v2374_v36  ;;  %1938 = vrsqrt.f32 %v2379_v21  ;;  %v361_v49 = vmul.f32 %v2374_v36, %v2374_v36  ;;  %v362_v50 = vmul.f32 %v2377_v20, %v2377_v20  ;;  %vm575_vm3 = vmor %vm573_vm2, %vm574_vm1  ;;  %vm583_vm4 = vweird.f32 %v2379_v21 }
 0x115   :  { %3412 = vst [vmem:[#allocation18_spill] sm:$0xff] %v2377_v20  ;;  %v569_v55 = vmul.f32 %v1935_v35, %v568_v43  ;;  %vm603_vm5 = vweird.f32 %v2371_v34 }
 0x116   :  { %v421_v47 = vpop.xlane.xlu1 %420  ;;  %v434_v58 = vadd.f32 %v362_v50, %v361_v49  ;;  %v1021_v49 = vld [vmem:[#allocation7] sm:$0x3] }
 0x117   :  { %v570_v18 = vmul.f32 0.5, %v569_v55  ;;  %v507_v48 = vmul.f32 %v421_v47, %v2211_v33  ;;  %v176_v2 = vpop.xlane.xlu2 %175  ;;  %v415_v3 = vpop.xlane.xlu0 %414  ;;  %v2411_v47 = vperm.slane %v951_v17, 0  ;;  %v2433_v63 = vperm.slane %v1021_v49, 1 }
 0x118   :  { %v257_v4 = vmul.f32 %v2211_v33, %v176_v2  ;;  %v505_v5 = vmul.f32 %v415_v3, %v2211_v33  ;;  %435 = vadd.xlane.f32.xlu1 %v434_v58  ;;  %v2418_v58 = vld [vmem:[#allocation2 + $0x130] sm:$0xff]  ;;  %v2424_v3 = vperm.slane %v1021_v49, 0 }
 0x119   :  { %v2391_v24 = vpop.eup %1936  ;;  %v571_v25 = vsub.f32 1.5, %v570_v18  ;;  %v2393_v10 = vadd.f32 1e-05, %v507_v48  ;;  %v2420_v18 = vld [vmem:[#allocation2 + $0x138] sm:$0xff] }
 0x11a   :  { %v2395_v22 = vpop.eup %1938  ;;  %v598_v14 = vmul.f32 %v2391_v24, %v2371_v34  ;;  %v2400_v15 = vsub.f32 %v2267_v8, %v257_v4  ;;  %v2403_v29 = vsub.f32 %v2269_v9, %v257_v4  ;;  %v2407_v50 = vadd.f32 1e-05, %v505_v5  ;;  %3415 = vst [vmem:[#allocation21_spill] sm:$0xff] %v2420_v18 }
 0x11b   :  { %v572_v30 = vmul.f32 %v1935_v35, %v571_v25  ;;  %v578_v43 = vmul.f32 %v2395_v22, %v2379_v21  ;;  %1940 = vrsqrt.f32 %v2393_v10  ;;  %vm584_vm6 = vweird.f32 %v2395_v22 }
 0x11c   :  { %3413 = vst [vmem:[#allocation19_spill] sm:$0xff] %v2400_v15  ;;  %v363_v55 = vmul.f32 %v2400_v15, %v2400_v15  ;;  %v364_v9 = vmul.f32 %v2403_v29, %v2403_v29  ;;  %v599_v48 = vmul.f32 %v2391_v24, %v598_v14  ;;  %1942 = vrsqrt.f32 %v2407_v50  ;;  %vm585_vm8 = vmor %vm583_vm4, %vm584_vm6 }
 0x11d   :  { %3414 = vst [vmem:[#allocation20_spill] sm:$0xff] %v2403_v29  ;;  %v579_v8 = vmul.f32 %v2395_v22, %v578_v43  ;;  %v576_v15 = vsel %vm575_vm3, %v1935_v35, %v572_v30  ;;  %v201_v14 = vadd.f32 %v2420_v18, %v2418_v58  ;;  %v2442_v35 = vld [vmem:[#allocation2 + $0x140] sm:$0xff]  ;;  %v2444_v30 = vld [vmem:[#allocation2 + $0x148] sm:$0xff]  ;;  %vm604_vm7 = vweird.f32 %v2391_v24 }
 0x11e   :  { %v185_v2 = vpop.xlane.xlu1 %184  ;;  %v437_v29 = vadd.f32 %v364_v9, %v363_v55  ;;  %3418 = vst [vmem:[#allocation24_spill] sm:$0xff] %v2442_v35  ;;  %v600_v55 = vmul.f32 0.5, %v599_v48  ;;  %v887_v9 = vmul.f32 %v576_v15, %v2214_v37  ;;  %v888_v37 = vmul.f32 %v576_v15, %v2216_v38  ;;  %vm2513_vm11 = vmor %vm603_vm5, %vm604_vm7 }
 0x11f   :  { %v580_v4 = vmul.f32 0.5, %v579_v8  ;;  %v260_v5 = vmul.f32 %v2211_v33, %v185_v2  ;;  %v424_v25 = vpop.xlane.xlu2 %423  ;;  %v179_v43 = vpop.xlane.xlu0 %178  ;;  %3419 = vst [vmem:[#allocation25_spill] sm:$0xff] %v2444_v30  ;;  %vm593_vm10 = vweird.f32 %v2407_v50  ;;  %vm613_vm15 = vweird.f32 %v2393_v10 }
 0x120   :  { %v508_v20 = vmul.f32 %v424_v25, %v2211_v33  ;;  %v258_v36 = vmul.f32 %v2211_v33, %v179_v43  ;;  %438 = vadd.xlane.f32.xlu1 %v437_v29  ;;  %v957_v15 = vmul.f32 %v2411_v47, %v887_v9 }
 0x121   :  { %v581_v62 = vsub.f32 1.5, %v580_v4  ;;  %v2437_v17 = vsub.f32 %v2280_v23, %v260_v5  ;;  %v2440_v8 = vsub.f32 %v2282_v26, %v260_v5  ;;  %v2451_v2 = vpop.eup %1940  ;;  %v601_v5 = vsub.f32 1.5, %v600_v55 }
 0x122   :  { %v2448_v49 = vadd.f32 1e-05, %v508_v20  ;;  %v2455_v26 = vsub.f32 %v2288_v27, %v258_v36  ;;  %v2458_v29 = vsub.f32 %v2290_v28, %v258_v36  ;;  %v1943_v4 = vpop.eup %1942  ;;  %vm614_vm0 = vweird.f32 %v2451_v2 }
 0x123   :  { %3416 = vst [vmem:[#allocation22_spill] sm:$0xff] %v2437_v17  ;;  %v582_v23 = vmul.f32 %v2395_v22, %v581_v62  ;;  %v369_v48 = vmul.f32 %v2437_v17, %v2437_v17  ;;  %v370_v20 = vmul.f32 %v2440_v8, %v2440_v8  ;;  %v204_v62 = vadd.f32 %v2444_v30, %v2442_v35  ;;  %vm615_vm2 = vmor %vm613_vm15, %vm614_vm0 }
 0x124   :  { %3417 = vst [vmem:[#allocation23_spill] sm:$0xff] %v2440_v8  ;;  %1944 = vrsqrt.f32 %v2448_v49  ;;  %v588_v27 = vmul.f32 %v1943_v4, %v2407_v50  ;;  %v365_v28 = vmul.f32 %v2455_v26, %v2455_v26  ;;  %v366_v36 = vmul.f32 %v2458_v29, %v2458_v29 }
 0x125   :  { %3420 = vst [vmem:[#allocation26_spill] sm:$0xff] %v2455_v26  ;;  %v446_v43 = vadd.f32 %v370_v20, %v369_v48  ;;  %v586_v38 = vsel %vm585_vm8, %v2395_v22, %v582_v23  ;;  %v608_v26 = vmul.f32 %v2451_v2, %v2393_v10  ;;  %v958_v22 = vmul.f32 %v2426_v46, %v888_v37 }
 0x126   :  { %3421 = vst [vmem:[#allocation27_spill] sm:$0xff] %v2458_v29  ;;  %v188_v25 = vpop.xlane.xlu1 %187  ;;  %v589_v8 = vmul.f32 %v1943_v4, %v588_v27  ;;  %v440_v35 = vadd.f32 %v366_v36, %v365_v28  ;;  %v889_v18 = vmul.f32 %v586_v38, %v2234_v53  ;;  %v890_v55 = vmul.f32 %v586_v38, %v2236_v54 }
 0x127   :  { %v261_v17 = vmul.f32 %v2211_v33, %v188_v25  ;;  %v427_v21 = vpop.xlane.xlu2 %426  ;;  %v182_v30 = vpop.xlane.xlu0 %181  ;;  %447 = vadd.xlane.f32.xlu0 %v446_v43  ;;  %vm594_vm9 = vweird.f32 %v1943_v4  ;;  %v609_v25 = vmul.f32 %v2451_v2, %v608_v26  ;;  %vm623_vm13 = vweird.f32 %v2448_v49 }
 0x128   :  { %v259_v29 = vmul.f32 %v2211_v33, %v182_v30  ;;  %v590_v23 = vmul.f32 0.5, %v589_v8  ;;  %202 = vadd.xlane.f32.xlu1 %v201_v14  ;;  %441 = vadd.xlane.f32.xlu2 %v440_v35  ;;  %v959_v48 = vmul.f32 %v2411_v47, %v889_v18  ;;  %v1027_v8 = vadd.f32 %v2424_v3, %v957_v15  ;;  %vm595_vm12 = vmor %vm593_vm10, %vm594_vm9 }
 0x129   :  { %v2486_v9 = vsub.f32 %v2303_v39, %v261_v17  ;;  %v2492_v20 = vsub.f32 %v2305_v40, %v261_v17  ;;  %v509_v14 = vmul.f32 %v427_v21, %v2211_v33  ;;  %v602_v35 = vmul.f32 %v2391_v24, %v601_v5 }
 0x12a   :  { %v2489_v53 = vpop.eup %1944  ;;  %v2495_v30 = vsub.f32 %v2311_v41, %v259_v29  ;;  %v2498_v54 = vsub.f32 %v2313_v42, %v259_v29  ;;  %v591_v37 = vsub.f32 1.5, %v590_v23  ;;  %v1029_v18 = vadd.f32 %v2424_v3, %v959_v48 }
 0x12b   :  { %v618_v39 = vmul.f32 %v2489_v53, %v2448_v49  ;;  %v960_v40 = vmul.f32 %v2426_v46, %v890_v55  ;;  %v1028_v41 = vadd.f32 %v2433_v63, %v958_v22  ;;  %v371_v28 = vmul.f32 %v2486_v9, %v2486_v9 }
 0x12c   :  { %v592_v17 = vmul.f32 %v1943_v4, %v591_v37  ;;  %v1091_v27 = vpack.c.bf16 %v1029_v18, %v1027_v8  ;;  %v372_v36 = vmul.f32 %v2492_v20, %v2492_v20  ;;  %v367_v34 = vmul.f32 %v2495_v30, %v2495_v30 }
 0x12d   :  { %v619_v29 = vmul.f32 %v2489_v53, %v618_v39  ;;  %v1030_v50 = vadd.f32 %v2433_v63, %v960_v40  ;;  %v368_v5 = vmul.f32 %v2498_v54, %v2498_v54  ;;  %v2529_v43 = vadd.f32 1e-05, %v509_v14  ;;  %v2556_v40 = vld [vmem:[#allocation2 + $0x150] sm:$0xff] }
 0x12e   :  { %1329 = vmatmul.bf16.vlgmr.msra.gmra.mxu0 %v1091_v27  ;;  %1507 = vmatmul.bf16.vlgmr.msra.gmra.mxu2 %v1091_v27  ;;  %v596_v21 = vsel %vm595_vm12, %v1943_v4, %v592_v17  ;;  %v449_v48 = vadd.f32 %v372_v36, %v371_v28  ;;  %v606_v37 = vsel %vm2513_vm11, %v2391_v24, %v602_v35  ;;  %v2550_v35 = vld [vmem:[#allocation2 + $0x178] sm:$0xff]  ;;  %vm624_vm14 = vweird.f32 %v2489_v53 }
 0x12f   :  { %v191_v38 = vpop.xlane.xlu2 %190  ;;  %v430_v15 = vpop.xlane.xlu0 %429  ;;  %v1092_v55 = vpack.c.bf16 %v1030_v50, %v1028_v41  ;;  %v443_v8 = vadd.f32 %v368_v5, %v367_v34  ;;  %v891_v26 = vmul.f32 %v596_v21, %v2249_v60  ;;  %v620_v39 = vmul.f32 0.5, %v619_v29  ;;  %v2558_v41 = vld [vmem:[#allocation2 + $0x158] sm:$0xff]  ;;  %vm2591_vm1 = vmor %vm623_vm13, %vm624_vm14 }
 0x130   :  { %v262_v22 = vmul.f32 %v2211_v33, %v191_v38  ;;  %v510_v23 = vmul.f32 %v430_v15, %v2211_v33  ;;  %205 = vadd.xlane.f32.xlu1 %v204_v62  ;;  %1946 = vrsqrt.f32 %v2529_v43  ;;  %450 = vadd.xlane.f32.xlu0 %v449_v48  ;;  %v2546_v62 = vld [vmem:[#allocation2 + $0x170] sm:$0xff]  ;;  %v893_v24 = vmul.f32 %v606_v37, %v2230_v51 }
 0x131   :  { %1418 = vmatmul.bf16.vlgmr.msra.gmra.mxu1 %v1092_v55  ;;  %1596 = vmatmul.bf16.vlgmr.msra.gmra.mxu3 %v1092_v55  ;;  %v610_v60 = vmul.f32 0.5, %v609_v25  ;;  %v961_v42 = vmul.f32 %v2411_v47, %v891_v26  ;;  %v892_v17 = vmul.f32 %v596_v21, %v2252_v61  ;;  %v621_v51 = vsub.f32 1.5, %v620_v39 }
 0x132   :  { %v2538_v14 = vsub.f32 %v2330_v59, %v262_v22  ;;  %v2541_v4 = vsub.f32 %v2332_v19, %v262_v22  ;;  %v2543_v18 = vadd.f32 1e-05, %v510_v23  ;;  %444 = vadd.xlane.f32.xlu2 %v443_v8  ;;  %v894_v27 = vmul.f32 %v606_v37, %v2232_v52  ;;  %v2637_v8 = vld [vmem:[#allocation2 + $0x190] sm:$0xff] }
 0x133   :  { %v213_v36 = vadd.f32 %v2550_v35, %v2546_v62  ;;  %v207_v34 = vadd.f32 %v2558_v41, %v2556_v40  ;;  %v963_v5 = vmul.f32 %v2411_v47, %v893_v24  ;;  %v611_v25 = vsub.f32 1.5, %v610_v60  ;;  %v2604_v24 = vld [vmem:[#allocation2 + $0x188] sm:$0xff] }
 0x134   :  { %1948 = vrsqrt.f32 %v2543_v18  ;;  %v373_v59 = vmul.f32 %v2538_v14, %v2538_v14  ;;  %v374_v19 = vmul.f32 %v2541_v4, %v2541_v4  ;;  %v962_v52 = vmul.f32 %v2426_v46, %v892_v17 }
 0x135   :  { %v1031_v15 = vadd.f32 %v2424_v3, %v961_v42  ;;  %v622_v55 = vmul.f32 %v2489_v53, %v621_v51  ;;  %v964_v48 = vmul.f32 %v2426_v46, %v894_v27  ;;  %v1033_v26 = vadd.f32 %v2424_v3, %v963_v5 }
 0x136   :  { %v452_v29 = vadd.f32 %v374_v19, %v373_v59  ;;  %v2574_v38 = vpop.eup %1946  ;;  %v1032_v49 = vadd.f32 %v2433_v63, %v962_v52  ;;  %v2608_v59 = vld [vmem:[#allocation2 + $0x160] sm:$0xff]  ;;  %v2610_v19 = vld [vmem:[#allocation2 + $0x168] sm:$0xff]  ;;  %vm643_vm3 = vweird.f32 %v2543_v18  ;;  %vm633_vm5 = vweird.f32 %v2529_v43 }
 0x137   :  { %v194_v28 = vpop.xlane.xlu2 %193  ;;  %v2564_v50 = vpop.xlane.xlu0 %432  ;;  %v628_v39 = vmul.f32 %v2574_v38, %v2529_v43  ;;  %v1093_v42 = vpack.c.bf16 %v1033_v26, %v1031_v15  ;;  %v626_v27 = vsel %vm2591_vm1, %v2489_v53, %v622_v55  ;;  %vm634_vm6 = vweird.f32 %v2574_v38 }
 0x138   :  { %v263_v61 = vmul.f32 %v2211_v33, %v194_v28  ;;  %453 = vadd.xlane.f32.xlu1 %v452_v29  ;;  %214 = vadd.xlane.f32.xlu0 %v213_v36  ;;  %v1034_v29 = vadd.f32 %v2433_v63, %v964_v48  ;;  %v897_v53 = vmul.f32 %v626_v27, %v2272_v11  ;;  %vm635_vm8 = vmor %vm633_vm5, %vm634_vm6 }
 0x139   :  { %v629_v5 = vmul.f32 %v2574_v38, %v628_v39 }
 0x13a   :  { %v2579_v21 = vpop.eup %1948  ;;  %v2583_v22 = vsub.f32 %v2346_v0, %v263_v61  ;;  %v2586_v23 = vsub.f32 %v2348_v1, %v263_v61  ;;  %208 = vadd.xlane.f32.xlu2 %v207_v34  ;;  %v2598_v0 = vld [vmem:[#allocation2 + $0x180] sm:$0xff]  ;;  %v612_v1 = vmul.f32 %v2451_v2, %v611_v25  ;;  %v210_v34 = vadd.f32 %v2610_v19, %v2608_v59 }
 0x13b   :  { %v638_v37 = vmul.f32 %v2579_v21, %v2543_v18  ;;  %v216_v36 = vadd.f32 %v2604_v24, %v2598_v0  ;;  %v1094_v25 = vpack.c.bf16 %v1034_v29, %v1032_v49  ;;  %v630_v26 = vmul.f32 0.5, %v629_v5  ;;  %v2669_v5 = vld [vmem:[#allocation2 + $0x1a8] sm:$0xff] }
 0x13c   :  { %3424 = vst [vmem:[#allocation28_spill] sm:$0xff] %v2586_v23  ;;  %v375_v60 = vmul.f32 %v2583_v22, %v2583_v22  ;;  %v376_v17 = vmul.f32 %v2586_v23, %v2586_v23  ;;  %v616_v52 = vsel %vm615_vm2, %v2451_v2, %v612_v1  ;;  %v967_v39 = vmul.f32 %v2411_v47, %v897_v53 }
 0x13d   :  { %v639_v51 = vmul.f32 %v2579_v21, %v638_v37  ;;  %v2639_v37 = vld [vmem:[#allocation2 + $0x198] sm:$0xff]  ;;  %v895_v2 = vmul.f32 %v616_v52, %v2240_v56  ;;  %vm644_vm4 = vweird.f32 %v2579_v21 }
 0x13e   :  { %1334 = vmatmul.bf16.gmra.mxu0 %v1093_v42  ;;  %1512 = vmatmul.bf16.gmra.mxu2 %v1093_v42  ;;  %v455_v10 = vadd.f32 %v376_v17, %v375_v60  ;;  %v896_v60 = vmul.f32 %v616_v52, %v2242_v57  ;;  %v1037_v57 = vadd.f32 %v2424_v3, %v967_v39  ;;  %vm645_vm7 = vmor %vm643_vm3, %vm644_vm4  ;;  %v2693_v39 = vld [vmem:[#allocation2 + $0x1b8] sm:$0xff] }
 0x13f   :  { %v197_v28 = vpop.xlane.xlu0 %196  ;;  %v640_v15 = vmul.f32 0.5, %v639_v51  ;;  %v965_v17 = vmul.f32 %v2411_v47, %v895_v2  ;;  %v631_v51 = vsub.f32 1.5, %v630_v26 }
 0x140   :  { %v264_v61 = vmul.f32 %v2211_v33, %v197_v28  ;;  %456 = vadd.xlane.f32.xlu1 %v455_v10  ;;  %217 = vadd.xlane.f32.xlu0 %v216_v36  ;;  %v966_v10 = vmul.f32 %v2426_v46, %v896_v60 }
 0x141   :  { %1423 = vmatmul.bf16.gmra.mxu1 %v1094_v25  ;;  %1601 = vmatmul.bf16.gmra.mxu3 %v1094_v25  ;;  %v641_v49 = vsub.f32 1.5, %v640_v15  ;;  %v1035_v25 = vadd.f32 %v2424_v3, %v965_v17 }
 0x142   :  { %v2632_v55 = vsub.f32 %v2352_v6, %v264_v61  ;;  %v2635_v48 = vsub.f32 %v2354_v7, %v264_v61  ;;  %211 = vadd.xlane.f32.xlu2 %v210_v34  ;;  %v898_v6 = vmul.f32 %v626_v27, %v2275_v12  ;;  %v219_v7 = vadd.f32 %v2639_v37, %v2637_v8  ;;  %v2667_v34 = vld [vmem:[#allocation2 + $0x1a0] sm:$0xff] }
 0x143   :  { %v642_v27 = vmul.f32 %v2579_v21, %v641_v49  ;;  %v632_v61 = vmul.f32 %v2574_v38, %v631_v51  ;;  %v1095_v18 = vpack.c.bf16 %v1037_v57, %v1035_v25  ;;  %v222_v53 = vadd.f32 %v2669_v5, %v2667_v34  ;;  %v2706_v51 = vld [vmem:[#allocation2 + $0x1c0] sm:$0xff] }
 0x144   :  { %v377_v11 = vmul.f32 %v2632_v55, %v2632_v55  ;;  %v378_v1 = vmul.f32 %v2635_v48, %v2635_v48  ;;  %v968_v12 = vmul.f32 %v2426_v46, %v898_v6  ;;  %v1036_v15 = vadd.f32 %v2433_v63, %v966_v10 }
 0x145   :  { %v646_v2 = vsel %vm645_vm7, %v2579_v21, %v642_v27  ;;  %v511_v10 = vmul.f32 %v2564_v50, %v2211_v33 }
 0x146   :  { %v458_v42 = vadd.f32 %v378_v1, %v377_v11  ;;  %v636_v1 = vsel %vm635_vm8, %v2574_v38, %v632_v61  ;;  %v901_v6 = vmul.f32 %v646_v2, %v2318_v44  ;;  %v902_v21 = vmul.f32 %v646_v2, %v2321_v45 }
 0x147   :  { %v200_v56 = vpop.xlane.xlu0 %199  ;;  %v899_v43 = vmul.f32 %v636_v1, %v2295_v31  ;;  %v900_v60 = vmul.f32 %v636_v1, %v2298_v32  ;;  %v543_v25 = vadd.f32 1e-05, %v511_v10 }
 0x148   :  { %v265_v29 = vmul.f32 %v2211_v33, %v200_v56  ;;  %220 = vadd.xlane.f32.xlu1 %v219_v7  ;;  %v2691_v7 = vld [vmem:[#allocation2 + $0x1b0] sm:$0xff]  ;;  %v971_v49 = vmul.f32 %v2411_v47, %v901_v6  ;;  %v972_v56 = vmul.f32 %v2426_v46, %v902_v21 }
 0x149   :  { %v225_v38 = vadd.f32 %v2693_v39, %v2691_v7  ;;  %v969_v44 = vmul.f32 %v2411_v47, %v899_v43  ;;  %v970_v31 = vmul.f32 %v2426_v46, %v900_v60  ;;  %1950 = vrsqrt.f32 %v543_v25 }
 0x14a   :  { %v2661_v28 = vsub.f32 %v2358_v13, %v265_v29  ;;  %v2664_v36 = vsub.f32 %v2360_v16, %v265_v29  ;;  %459 = vadd.xlane.f32.xlu2 %v458_v42  ;;  %v1038_v13 = vadd.f32 %v2433_v63, %v968_v12  ;;  %v1041_v42 = vadd.f32 %v2424_v3, %v971_v49  ;;  %v2708_v29 = vld [vmem:[#allocation2 + $0x1c8] sm:$0xff] }
 0x14b   :  { %v1039_v17 = vadd.f32 %v2424_v3, %v969_v44  ;;  %v1042_v45 = vadd.f32 %v2433_v63, %v972_v56  ;;  %v1040_v12 = vadd.f32 %v2433_v63, %v970_v31  ;;  %v228_v57 = vadd.f32 %v2708_v29, %v2706_v51 }
 0x14c   :  { %3427 = vst [vmem:[#allocation29_spill] sm:$0xff] %v2661_v28  ;;  %v379_v16 = vmul.f32 %v2661_v28, %v2661_v28  ;;  %v380_v52 = vmul.f32 %v2664_v36, %v2664_v36  ;;  %v1096_v11 = vpack.c.bf16 %v1038_v13, %v1036_v15  ;;  %vm653_vm9 = vweird.f32 %v543_v25  ;;  %v3449_v28 = vld [vmem:[#allocation20_spill] sm:$0xff] }
 0x14d   :  { %3428 = vst [vmem:[#allocation30_spill] sm:$0xff] %v2664_v36  ;;  %v1097_v32 = vpack.c.bf16 %v1041_v42, %v1039_v17  ;;  %v1098_v27 = vpack.c.bf16 %v1042_v45, %v1040_v12  ;;  %v3429_v12 = vld [vmem:[#allocation15_spill] sm:$0xff] }
 0x14e   :  { %1339 = vmatmul.bf16.gmra.mxu0 %v1095_v18  ;;  %1517 = vmatmul.bf16.gmra.mxu2 %v1095_v18  ;;  %v461_v26 = vadd.f32 %v380_v52, %v379_v16  ;;  %v2848_v36 = vld [vmem:[#allocation2 + $0x1e0] sm:$0xff] }
 0x14f   :  { %v1951_v61 = vpop.eup %1950 }
 0x150   :  { %223 = vadd.xlane.f32.xlu1 %v222_v53  ;;  %v648_v13 = vmul.f32 %v1951_v61, %v543_v25  ;;  %vm654_vm10 = vweird.f32 %v1951_v61 }
 0x151   :  { %1428 = vmatmul.bf16.gmra.mxu1 %v1096_v11  ;;  %1606 = vmatmul.bf16.gmra.mxu3 %v1096_v11  ;;  %vm655_vm11 = vmor %vm653_vm9, %vm654_vm10 }
 0x152   :  { %462 = vadd.xlane.f32.xlu2 %v461_v26  ;;  %v649_v16 = vmul.f32 %v1951_v61, %v648_v13 }
 0x154   :  { %v650_v15 = vmul.f32 0.5, %v649_v16  ;;  %v3432_v16 = vld [vmem:[#allocation21_spill] sm:$0xff] }
 0x156   :  { %v651_v2 = vsub.f32 1.5, %v650_v15 }
 0x158   :  { %v652_v6 = vmul.f32 %v1951_v61, %v651_v2 }
 0x15a   :  { %226 = vadd.xlane.f32.xlu2 %v225_v38  ;;  %v656_v38 = vsel %vm655_vm11, %v1951_v61, %v652_v6 }
 0x15e   :  { %1344 = vmatmul.bf16.gmra.mxu0 %v1097_v32  ;;  %1522 = vmatmul.bf16.gmra.mxu2 %v1097_v32 }
 0x161   :  { %1433 = vmatmul.bf16.gmra.mxu1 %v1098_v27  ;;  %1611 = vmatmul.bf16.gmra.mxu3 %v1098_v27  ;;  %v3430_v27 = vld [vmem:[#allocation16_spill] sm:$0xff] }
 0x162   :  { %229 = vadd.xlane.f32.xlu2 %v228_v57  ;;  %v903_v57 = vmul.f32 %v656_v38, %v3429_v12  ;;  %v904_v10 = vmul.f32 %v656_v38, %v3430_v27 }
 0x164   :  { %v973_v6 = vmul.f32 %v2411_v47, %v903_v57  ;;  %v974_v38 = vmul.f32 %v2426_v46, %v904_v10  ;;  %v3436_v10 = vld [vmem:[#allocation24_spill] sm:$0xff] }
 0x18b   :  { %v436_v52 = vpop.xlane.xlu1 %435 }
 0x18c   :  { %v512_v18 = vmul.f32 %v436_v52, %v2211_v33 }
 0x18e   :  { %v544_v53 = vadd.f32 1e-05, %v512_v18 }
 0x190   :  { %1952 = vrsqrt.f32 %v544_v53  ;;  %vm663_vm13 = vweird.f32 %v544_v53 }
 0x193   :  { %v439_v26 = vpop.xlane.xlu1 %438 }
 0x194   :  { %v513_v11 = vmul.f32 %v439_v26, %v2211_v33 }
 0x196   :  { %v1953_v1 = vpop.eup %1952  ;;  %v2717_v43 = vadd.f32 1e-05, %v513_v11 }
 0x197   :  { %v658_v50 = vmul.f32 %v1953_v1, %v544_v53  ;;  %vm664_vm12 = vweird.f32 %v1953_v1 }
 0x198   :  { %1954 = vrsqrt.f32 %v2717_v43  ;;  %vm665_vm14 = vmor %vm663_vm13, %vm664_vm12  ;;  %vm673_vm0 = vweird.f32 %v2717_v43 }
 0x199   :  { %v659_v21 = vmul.f32 %v1953_v1, %v658_v50  ;;  %v3434_v50 = vld [vmem:[#allocation17_spill] sm:$0xff] }
 0x19a   :  { %v448_v60 = vpop.xlane.xlu0 %447 }
 0x19b   :  { %v660_v49 = vmul.f32 0.5, %v659_v21  ;;  %v203_v44 = vpop.xlane.xlu1 %202  ;;  %v442_v56 = vpop.xlane.xlu2 %441  ;;  %v516_v42 = vmul.f32 %v448_v60, %v2211_v33 }
 0x19c   :  { %v266_v17 = vmul.f32 %v2211_v33, %v203_v44  ;;  %v514_v45 = vmul.f32 %v442_v56, %v2211_v33 }
 0x19d   :  { %v661_v31 = vsub.f32 1.5, %v660_v49  ;;  %v2723_v32 = vadd.f32 1e-05, %v516_v42  ;;  %v3435_v49 = vld [vmem:[#allocation18_spill] sm:$0xff] }
 0x19e   :  { %v2727_v25 = vpop.eup %1954  ;;  %v2730_v61 = vsub.f32 %v2418_v58, %v266_v17  ;;  %v2733_v52 = vsub.f32 %v3432_v16, %v266_v17  ;;  %v2735_v18 = vadd.f32 1e-05, %v514_v45  ;;  %v3438_v16 = vld [vmem:[#allocation25_spill] sm:$0xff] }
 0x19f   :  { %v662_v13 = vmul.f32 %v1953_v1, %v661_v31  ;;  %v668_v15 = vmul.f32 %v2727_v25, %v2717_v43  ;;  %1956 = vrsqrt.f32 %v2723_v32  ;;  %vm674_vm15 = vweird.f32 %v2727_v25 }
 0x1a0   :  { %3431 = vst [vmem:[#allocation15_spill] sm:$0xff] %v2730_v61  ;;  %1958 = vrsqrt.f32 %v2735_v18  ;;  %v381_v2 = vmul.f32 %v2730_v61, %v2730_v61  ;;  %v382_v58 = vmul.f32 %v2733_v52, %v2733_v52  ;;  %vm683_vm1 = vweird.f32 %v2735_v18  ;;  %vm675_vm2 = vmor %vm673_vm0, %vm674_vm15 }
 0x1a1   :  { %3433 = vst [vmem:[#allocation16_spill] sm:$0xff] %v2733_v52  ;;  %v669_v26 = vmul.f32 %v2727_v25, %v668_v15  ;;  %v666_v11 = vsel %vm665_vm14, %v1953_v1, %v662_v13  ;;  %v1155_v1 = vld [vmem:[%s3380_s4] sm:$0x3]  ;;  %vm703_vm5 = vweird.f32 %v2723_v32  ;;  %s2135_s4 = smov [#allocation10]  }
 0x1a2   :  { %v464_v53 = vadd.f32 %v382_v58, %v381_v2  ;;  %v905_v21 = vmul.f32 %v666_v11, %v3434_v50  ;;  %v906_v60 = vmul.f32 %v666_v11, %v3435_v49  ;;  %v1043_v2 = vadd.f32 %v2424_v3, %v973_v6  ;;  %s1745_s15 = sshll.u32 %s2135_s4, 4  ;;  %s1746_s15 = int_to_ptr.vmem [resolvable:$true] %s1745_s15 }
 0x1a3   :  { %v206_v44 = vpop.xlane.xlu1 %205  ;;  %v670_v56 = vmul.f32 0.5, %v669_v26  ;;  %v451_v57 = vpop.xlane.xlu0 %450  ;;  %v1044_v58 = vadd.f32 %v2433_v63, %v974_v38  ;;  %v2773_v50 = vperm.slane %v1155_v1, 0 }
 0x1a4   :  { %v267_v42 = vmul.f32 %v2211_v33, %v206_v44  ;;  %465 = vadd.xlane.f32.xlu0 %v464_v53  ;;  %v975_v31 = vmul.f32 %v2411_v47, %v905_v21  ;;  %v976_v17 = vmul.f32 %v2426_v46, %v906_v60  ;;  %v517_v49 = vmul.f32 %v451_v57, %v2211_v33 }
 0x1a5   :  { %v2756_v45 = vpop.eup %1956  ;;  %v445_v12 = vpop.xlane.xlu2 %444  ;;  %v671_v21 = vsub.f32 1.5, %v670_v56 }
 0x1a6   :  { %v2758_v27 = vpop.eup %1958  ;;  %v2761_v13 = vsub.f32 %v3436_v10, %v267_v42  ;;  %v2764_v15 = vsub.f32 %v3438_v16, %v267_v42  ;;  %v698_v11 = vmul.f32 %v2756_v45, %v2723_v32  ;;  %v515_v53 = vmul.f32 %v445_v12, %v2211_v33 }
 0x1a7   :  { %v678_v26 = vmul.f32 %v2758_v27, %v2735_v18  ;;  %v1045_v60 = vadd.f32 %v2424_v3, %v975_v31  ;;  %v1046_v44 = vadd.f32 %v2433_v63, %v976_v17  ;;  %v2785_v12 = vadd.f32 1e-05, %v517_v49 }
 0x1a8   :  { %3437 = vst [vmem:[#allocation21_spill] sm:$0xff] %v2761_v13  ;;  %v2779_v38 = vadd.f32 1e-05, %v515_v53  ;;  %v383_v42 = vmul.f32 %v2761_v13, %v2761_v13  ;;  %v384_v10 = vmul.f32 %v2764_v15, %v2764_v15  ;;  %v699_v57 = vmul.f32 %v2756_v45, %v698_v11 }
 0x1a9   :  { %3439 = vst [vmem:[#allocation17_spill] sm:$0xff] %v2764_v15  ;;  %v679_v6 = vmul.f32 %v2758_v27, %v678_v26  ;;  %v1099_v16 = vpack.c.bf16 %v1045_v60, %v1043_v2  ;;  %v1100_v56 = vpack.c.bf16 %v1046_v44, %v1044_v58  ;;  %v672_v15 = vmul.f32 %v2727_v25, %v671_v21  ;;  %v2800_v21 = vld [vmem:[#allocation2 + $0x1d0] sm:$0xff] }
 0x1aa   :  { %1960 = vrsqrt.f32 %v2779_v38  ;;  %v467_v26 = vadd.f32 %v384_v10, %v383_v42  ;;  %v2798_v10 = vperm.slane %v1155_v1, 1  ;;  %3440 = vst [vmem:[#allocation18_spill] sm:$0xff] %v2800_v21  ;;  %vm684_vm3 = vweird.f32 %v2758_v27 }
 0x1ab   :  { %v680_v52 = vmul.f32 0.5, %v679_v6  ;;  %v454_v31 = vpop.xlane.xlu1 %453  ;;  %v1330_v17 = vpop.f32.mrf.mxu0  ;;  %1962 = vrsqrt.f32 %v2785_v12  ;;  %1349 = vmatmul.bf16.gmra.mxu0 %v1099_v16  ;;  %1438 = vmatmul.bf16.gmra.mxu1 %v1100_v56  ;;  %vm685_vm4 = vmor %vm683_vm1, %vm684_vm3  ;;  %vm704_vm6 = vweird.f32 %v2756_v45  ;;  %vm693_vm9 = vweird.f32 %v2779_v38 }
 0x1ac   :  { %v518_v53 = vmul.f32 %v454_v31, %v2211_v33  ;;  %1527 = vmatmul.bf16.gmra.mxu2 %v1099_v16  ;;  %1616 = vmatmul.bf16.gmra.mxu3 %v1100_v56  ;;  %v1331_v58 = vadd.f32 %v1330_v17, %v2773_v50  ;;  %v215_v49 = vpop.xlane.xlu0 %214  ;;  %v2802_v31 = vld [vmem:[#allocation2 + $0x1d8] sm:$0xff]  ;;  %vm2930_vm8 = vmor %vm703_vm5, %vm704_vm6  ;;  %vm713_vm11 = vweird.f32 %v2785_v12 }
 0x1ad   :  { %v681_v2 = vsub.f32 1.5, %v680_v52  ;;  %v209_v11 = vpop.xlane.xlu2 %208  ;;  %v270_v42 = vmul.f32 %v2211_v33, %v215_v49  ;;  %468 = vadd.xlane.f32.xlu0 %v467_v26  ;;  %3441 = vst [vmem:[#allocation24_spill] sm:$0xff] %v2802_v31  ;;  %v700_v52 = vmul.f32 0.5, %v699_v57 }
 0x1ae   :  { %v2794_v60 = vadd.f32 1e-05, %v518_v53  ;;  %v1419_v44 = vpop.f32.mrf.mxu1  ;;  %v268_v6 = vmul.f32 %v2211_v33, %v209_v11  ;;  %v231_v53 = vadd.f32 %v2802_v31, %v2800_v21 }
 0x1af   :  { %v1420_v16 = vadd.f32 %v1419_v44, %v1331_v58  ;;  %v682_v56 = vmul.f32 %v2758_v27, %v681_v2  ;;  %v2820_v43 = vsub.f32 %v2546_v62, %v270_v42  ;;  %v676_v2 = vsel %vm675_vm2, %v2727_v25, %v672_v15 }
 0x1b0   :  { %v2811_v1 = vsub.f32 %v2556_v40, %v268_v6  ;;  %v2814_v17 = vsub.f32 %v2558_v41, %v268_v6  ;;  %v2816_v26 = vpop.eup %1960  ;;  %1964 = vrsqrt.f32 %v2794_v60  ;;  %v2830_v41 = vsub.f32 %v2550_v35, %v270_v42 }
 0x1b1   :  { %1677 = vst [vmem:[#allocation10] sm:$0xff] %v1420_v16  ;;  %v1508_v57 = vpop.f32.mrf.mxu2  ;;  %v2825_v58 = vpop.eup %1962  ;;  %v688_v40 = vmul.f32 %v2816_v26, %v2779_v38  ;;  %v701_v49 = vsub.f32 1.5, %v700_v52  ;;  %v686_v16 = vsel %vm685_vm4, %v2758_v27, %v682_v56  ;;  %v389_v27 = vmul.f32 %v2820_v43, %v2820_v43 }
 0x1b2   :  { %3442 = vst [vmem:[#allocation25_spill] sm:$0xff] %v2811_v1  ;;  %v1509_v11 = vadd.f32 %v1508_v57, %v2798_v10  ;;  %v385_v62 = vmul.f32 %v2811_v1, %v2811_v1  ;;  %v386_v44 = vmul.f32 %v2814_v17, %v2814_v17  ;;  %v3446_v57 = vld [vmem:[#allocation19_spill] sm:$0xff]  ;;  %v708_v13 = vmul.f32 %v2825_v58, %v2785_v12 }
 0x1b3   :  { %3443 = vst [vmem:[#allocation31_spill] sm:$0xff] %v2814_v17  ;;  %v457_v25 = vpop.xlane.xlu1 %456  ;;  %v1332_v15 = vpop.f32.mrf.mxu0  ;;  %v689_v6 = vmul.f32 %v2816_v26, %v688_v40  ;;  %v907_v1 = vmul.f32 %v676_v2, %v3446_v57  ;;  %v2850_v17 = vld [vmem:[#allocation2 + $0x1e8] sm:$0xff]  ;;  %v390_v56 = vmul.f32 %v2830_v41, %v2830_v41  ;;  %v908_v23 = vmul.f32 %v676_v2, %v3449_v28 }
 0x1b4   :  { %3444 = vst [vmem:[#allocation32_spill] sm:$0xff] %v2820_v43  ;;  %v1597_v35 = vpop.f32.mrf.mxu3  ;;  %v1333_v42 = vadd.f32 %v1332_v15, %v2773_v50  ;;  %v519_v52 = vmul.f32 %v457_v25, %v2211_v33  ;;  %v218_v31 = vpop.xlane.xlu0 %217  ;;  %v470_v21 = vadd.f32 %v386_v44, %v385_v62  ;;  %v3448_v44 = vld [vmem:[#allocation26_spill] sm:$0xff]  ;;  %vm694_vm7 = vweird.f32 %v2816_v26  ;;  %v3450_v43 = vld [vmem:[#allocation27_spill] sm:$0xff] }
 0x1b5   :  { %3445 = vst [vmem:[#allocation33_spill] sm:$0xff] %v2830_v41  ;;  %v1598_v18 = vadd.f32 %v1597_v35, %v1509_v11  ;;  %v212_v61 = vpop.xlane.xlu2 %211  ;;  %232 = vadd.xlane.f32.xlu0 %v231_v53  ;;  %v690_v25 = vmul.f32 0.5, %v689_v6  ;;  %v271_v62 = vmul.f32 %v2211_v33, %v218_v31  ;;  %v909_v57 = vmul.f32 %v686_v16, %v3448_v44  ;;  %vm695_vm10 = vmor %vm693_vm9, %vm694_vm7 }
 0x1b6   :  { %3447 = vst [vmem:[#allocation19_spill] sm:$0xff] %v2850_v17  ;;  %v1421_v40 = vpop.f32.mrf.mxu1  ;;  %v269_v15 = vmul.f32 %v2211_v33, %v212_v61  ;;  %v2857_v11 = vpop.eup %1964  ;;  %471 = vadd.xlane.f32.xlu1 %v470_v21  ;;  %v234_v61 = vadd.f32 %v2850_v17, %v2848_v36  ;;  %v2865_v53 = vmul.f32 %v2756_v45, %v701_v49  ;;  %vm723_vm12 = vweird.f32 %v2794_v60 }
 0x1b7   :  { %1678 = vst [vmem:[#allocation10 + $0x8] sm:$0xff] %v1598_v18  ;;  %v1422_v35 = vadd.f32 %v1421_v40, %v1333_v42  ;;  %v709_v6 = vmul.f32 %v2825_v58, %v708_v13  ;;  %v2870_v42 = vadd.f32 1e-05, %v519_v52  ;;  %v977_v31 = vmul.f32 %v2411_v47, %v907_v1 }
 0x1b8   :  { %v718_v28 = vmul.f32 %v2857_v11, %v2794_v60  ;;  %v2877_v2 = vsub.f32 %v2608_v59, %v269_v15  ;;  %v476_v49 = vadd.f32 %v390_v56, %v389_v27  ;;  %v691_v40 = vsub.f32 1.5, %v690_v25 }
 0x1b9   :  { %1679 = vst [vmem:[#allocation10 + $0x10] sm:$0xff] %v1422_v35  ;;  %v1510_v21 = vpop.f32.mrf.mxu2  ;;  %v2881_v13 = vsub.f32 %v2610_v19, %v269_v15  ;;  %v2884_v52 = vsub.f32 %v2598_v0, %v271_v62  ;;  %v979_v1 = vmul.f32 %v2411_v47, %v909_v57  ;;  %v910_v17 = vmul.f32 %v686_v16, %v3450_v43 }
 0x1ba   :  { %v1511_v18 = vadd.f32 %v1510_v21, %v2798_v10  ;;  %477 = vadd.xlane.f32.xlu2 %v476_v49  ;;  %v978_v59 = vmul.f32 %v2426_v46, %v908_v23  ;;  %v2892_v19 = vsub.f32 %v2604_v24, %v271_v62  ;;  %v1047_v0 = vadd.f32 %v2424_v3, %v977_v31 }
 0x1bb   :  { %v221_v35 = vpop.xlane.xlu1 %220  ;;  %v1335_v44 = vpop.f32.mrf.mxu0  ;;  %v1049_v25 = vadd.f32 %v2424_v3, %v979_v1  ;;  %v2896_v21 = vmul.f32 0.5, %v709_v6  ;;  %v719_v49 = vmul.f32 %v2857_v11, %v718_v28  ;;  %v980_v43 = vmul.f32 %v2426_v46, %v910_v17 }
 0x1bc   :  { %v1599_v41 = vpop.f32.mrf.mxu3  ;;  %v272_v27 = vmul.f32 %v2211_v33, %v221_v35  ;;  %v1336_v56 = vadd.f32 %v1335_v44, %v2773_v50  ;;  %v387_v16 = vmul.f32 %v2877_v2, %v2877_v2  ;;  %1966 = vrsqrt.f32 %v2870_v42 }
 0x1bd   :  { %v1600_v15 = vadd.f32 %v1599_v41, %v1511_v18  ;;  %v460_v57 = vpop.xlane.xlu2 %459  ;;  %235 = vadd.xlane.f32.xlu0 %v234_v61  ;;  %v1101_v24 = vpack.c.bf16 %v1049_v25, %v1047_v0  ;;  %v1048_v41 = vadd.f32 %v2433_v63, %v978_v59  ;;  %v1050_v6 = vadd.f32 %v2433_v63, %v980_v43 }
 0x1be   :  { %v1424_v23 = vpop.f32.mrf.mxu1  ;;  %v2904_v62 = vsub.f32 %v2637_v8, %v272_v27  ;;  %v2907_v31 = vsub.f32 %v2639_v37, %v272_v27  ;;  %v520_v17 = vmul.f32 %v460_v57, %v2211_v33  ;;  %v388_v61 = vmul.f32 %v2881_v13, %v2881_v13 }
 0x1bf   :  { %1680 = vst [vmem:[#allocation10 + $0x18] sm:$0xff] %v1600_v15  ;;  %v1425_v28 = vadd.f32 %v1424_v23, %v1336_v56  ;;  %v692_v18 = vmul.f32 %v2816_v26, %v691_v40  ;;  %1354 = vmatmul.bf16.gmra.mxu0 %v1101_v24  ;;  %1532 = vmatmul.bf16.gmra.mxu2 %v1101_v24  ;;  %v720_v56 = vmul.f32 0.5, %v719_v49  ;;  %v711_v38 = vsub.f32 1.5, %v2896_v21 }
 0x1c0   :  { %v391_v8 = vmul.f32 %v2884_v52, %v2884_v52  ;;  %v392_v37 = vmul.f32 %v2892_v19, %v2892_v19  ;;  %v1102_v35 = vpack.c.bf16 %v1050_v6, %v1048_v41  ;;  %v2919_v44 = vadd.f32 1e-05, %v520_v17  ;;  %v2946_v17 = vld [vmem:[#allocation2 + $0x1f8] sm:$0xff] }
 0x1c1   :  { %v1513_v1 = vpop.f32.mrf.mxu2  ;;  %1681 = vst [vmem:[#allocation10 + $0x20] sm:$0xff] %v1425_v28  ;;  %v473_v59 = vadd.f32 %v388_v61, %v387_v16  ;;  %v393_v25 = vmul.f32 %v2904_v62, %v2904_v62  ;;  %v394_v57 = vmul.f32 %v2907_v31, %v2907_v31  ;;  %v2944_v28 = vld [vmem:[#allocation2 + $0x1f0] sm:$0xff]  ;;  %v696_v61 = vsel %vm695_vm10, %v2816_v26, %v692_v18 }
 0x1c2   :  { %v1514_v27 = vadd.f32 %v1513_v1, %v2798_v10  ;;  %v479_v40 = vadd.f32 %v392_v37, %v391_v8  ;;  %1443 = vmatmul.bf16.gmra.mxu1 %v1102_v35  ;;  %1621 = vmatmul.bf16.gmra.mxu3 %v1102_v35  ;;  %1968 = vrsqrt.f32 %v2919_v44  ;;  %v2949_v8 = vpop.eup %1966  ;;  %v721_v37 = vsub.f32 1.5, %v720_v56 }
 0x1c3   :  { %v224_v15 = vpop.xlane.xlu1 %223  ;;  %v1337_v0 = vpop.f32.mrf.mxu0  ;;  %474 = vadd.xlane.f32.xlu1 %v473_v59  ;;  %v482_v41 = vadd.f32 %v394_v57, %v393_v25  ;;  %v706_v21 = vsel %vm2930_vm8, %v2756_v45, %v2865_v53  ;;  %vm714_vm13 = vweird.f32 %v2825_v58  ;;  %v911_v35 = vmul.f32 %v696_v61, %v2495_v30  ;;  %v3453_v59 = vld [vmem:[#allocation22_spill] sm:$0xff]  ;;  %v3454_v45 = vld [vmem:[#allocation23_spill] sm:$0xff] }
 0x1c4   :  { %v1602_v49 = vpop.f32.mrf.mxu3  ;;  %v1338_v23 = vadd.f32 %v1337_v0, %v2773_v50  ;;  %480 = vadd.xlane.f32.xlu2 %v479_v40  ;;  %v273_v32 = vmul.f32 %v2211_v33, %v224_v15  ;;  %v912_v26 = vmul.f32 %v696_v61, %v2498_v54  ;;  %v237_v40 = vadd.f32 %v2946_v17, %v2944_v28  ;;  %vm3000_vm0 = vmor %vm713_vm11, %vm714_vm13 }
 0x1c5   :  { %v1603_v16 = vadd.f32 %v1602_v49, %v1514_v27  ;;  %v2940_v24 = vpop.xlane.xlu2 %462  ;;  %483 = vadd.xlane.f32.xlu0 %v482_v41  ;;  %v913_v27 = vmul.f32 %v706_v21, %v3453_v59  ;;  %v914_v53 = vmul.f32 %v706_v21, %v3454_v45  ;;  %v712_v30 = vmul.f32 %v2825_v58, %v711_v38 }
 0x1c6   :  { %v1426_v6 = vpop.f32.mrf.mxu1  ;;  %v2961_v18 = vsub.f32 %v2667_v34, %v273_v32  ;;  %v2964_v56 = vsub.f32 %v2669_v5, %v273_v32  ;;  %vm724_vm14 = vweird.f32 %v2857_v11  ;;  %v981_v34 = vmul.f32 %v2411_v47, %v911_v35 }
 0x1c7   :  { %1682 = vst [vmem:[#allocation10 + $0x28] sm:$0xff] %v1603_v16  ;;  %v1427_v1 = vadd.f32 %v1426_v6, %v1338_v23  ;;  %v722_v5 = vmul.f32 %v2857_v11, %v721_v37  ;;  %v983_v57 = vmul.f32 %v2411_v47, %v913_v27  ;;  %v982_v43 = vmul.f32 %v2426_v46, %v912_v26  ;;  %vm2987_vm15 = vmor %vm723_vm12, %vm724_vm14 }
 0x1c8   :  { %v2969_v0 = vpop.eup %1968  ;;  %v728_v23 = vmul.f32 %v2949_v8, %v2870_v42  ;;  %v1051_v32 = vadd.f32 %v2424_v3, %v981_v34  ;;  %v984_v41 = vmul.f32 %v2426_v46, %v914_v53  ;;  %v395_v21 = vmul.f32 %v2961_v18, %v2961_v18 }
 0x1c9   :  { %1683 = vst [vmem:[#allocation10 + $0x30] sm:$0xff] %v1427_v1  ;;  %v1515_v15 = vpop.f32.mrf.mxu2  ;;  %v738_v25 = vmul.f32 %v2969_v0, %v2919_v44  ;;  %v1053_v37 = vadd.f32 %v2424_v3, %v983_v57  ;;  %v396_v35 = vmul.f32 %v2964_v56, %v2964_v56  ;;  %v1052_v59 = vadd.f32 %v2433_v63, %v982_v43 }
 0x1ca   :  { %v1516_v54 = vadd.f32 %v1515_v15, %v2798_v10  ;;  %v1054_v53 = vadd.f32 %v2433_v63, %v984_v41  ;;  %v726_v34 = vsel %vm2987_vm15, %v2857_v11, %v722_v5  ;;  %v729_v57 = vmul.f32 %v2949_v8, %v728_v23 }
 0x1cb   :  { %v1340_v49 = vpop.f32.mrf.mxu0  ;;  %238 = vadd.xlane.f32.xlu1 %v237_v40  ;;  %v739_v40 = vmul.f32 %v2969_v0, %v738_v25  ;;  %v1103_v15 = vpack.c.bf16 %v1053_v37, %v1051_v32  ;;  %v485_v25 = vadd.f32 %v396_v35, %v395_v21  ;;  %v917_v23 = vmul.f32 %v726_v34, %v2538_v14 }
 0x1cc   :  { %v1604_v16 = vpop.f32.mrf.mxu3  ;;  %v1341_v38 = vadd.f32 %v1340_v49, %v2773_v50  ;;  %v716_v49 = vsel %vm3000_vm0, %v2825_v58, %v712_v30  ;;  %v730_v58 = vmul.f32 0.5, %v729_v57  ;;  %v918_v35 = vmul.f32 %v726_v34, %v2541_v4 }
 0x1cd   :  { %v1605_v61 = vadd.f32 %v1604_v16, %v1516_v54  ;;  %v227_v1 = vpop.xlane.xlu2 %226  ;;  %v740_v32 = vmul.f32 0.5, %v739_v40  ;;  %v915_v37 = vmul.f32 %v716_v49, %v2486_v9  ;;  %v987_v60 = vmul.f32 %v2411_v47, %v917_v23 }
 0x1ce   :  { %v1429_v27 = vpop.f32.mrf.mxu1  ;;  %v274_v26 = vmul.f32 %v2211_v33, %v227_v1  ;;  %v916_v40 = vmul.f32 %v716_v49, %v2492_v20  ;;  %v731_v9 = vsub.f32 1.5, %v730_v58  ;;  %vm743_vm1 = vweird.f32 %v2919_v44 }
 0x1cf   :  { %1684 = vst [vmem:[#allocation10 + $0x38] sm:$0xff] %v1605_v61  ;;  %v1430_v45 = vadd.f32 %v1429_v27, %v1341_v38  ;;  %1359 = vmatmul.bf16.gmra.mxu0 %v1103_v15  ;;  %1537 = vmatmul.bf16.gmra.mxu2 %v1103_v15  ;;  %vm744_vm2 = vweird.f32 %v2969_v0  ;;  %v985_v15 = vmul.f32 %v2411_v47, %v915_v37  ;;  %vm733_vm3 = vweird.f32 %v2870_v42 }
 0x1d0   :  { %v3009_v54 = vsub.f32 %v2691_v7, %v274_v26  ;;  %v3012_v12 = vsub.f32 %v2693_v39, %v274_v26  ;;  %v1104_v7 = vpack.c.bf16 %v1054_v53, %v1052_v59  ;;  %v741_v59 = vsub.f32 1.5, %v740_v32  ;;  %vm745_vm5 = vmor %vm743_vm1, %vm744_vm2 }
 0x1d1   :  { %1685 = vst [vmem:[#allocation10 + $0x40] sm:$0xff] %v1430_v45  ;;  %v1518_v43 = vpop.f32.mrf.mxu2  ;;  %v988_v53 = vmul.f32 %v2426_v46, %v918_v35  ;;  %vm734_vm4 = vweird.f32 %v2949_v8  ;;  %v1057_v20 = vadd.f32 %v2424_v3, %v987_v60 }
 0x1d2   :  { %v1519_v16 = vadd.f32 %v1518_v43, %v2798_v10  ;;  %v397_v39 = vmul.f32 %v3009_v54, %v3009_v54  ;;  %v398_v11 = vmul.f32 %v3012_v12, %v3012_v12  ;;  %1448 = vmatmul.bf16.gmra.mxu1 %v1104_v7  ;;  %1626 = vmatmul.bf16.gmra.mxu3 %v1104_v7  ;;  %vm735_vm6 = vmor %vm733_vm3, %vm734_vm4 }
 0x1d3   :  { %v1342_v5 = vpop.f32.mrf.mxu0  ;;  %486 = vadd.xlane.f32.xlu1 %v485_v25  ;;  %v742_v57 = vmul.f32 %v2969_v0, %v741_v59  ;;  %v986_v43 = vmul.f32 %v2426_v46, %v916_v40 }
 0x1d4   :  { %v1607_v41 = vpop.f32.mrf.mxu3  ;;  %v1343_v38 = vadd.f32 %v1342_v5, %v2773_v50  ;;  %v488_v6 = vadd.f32 %v398_v11, %v397_v39  ;;  %v1055_v39 = vadd.f32 %v2424_v3, %v985_v15  ;;  %v732_v11 = vmul.f32 %v2949_v8, %v731_v9  ;;  %v3459_v9 = vld [vmem:[#allocation28_spill] sm:$0xff] }
 0x1d5   :  { %v1608_v30 = vadd.f32 %v1607_v41, %v1519_v16  ;;  %v230_v61 = vpop.xlane.xlu2 %229  ;;  %v1058_v5 = vadd.f32 %v2433_v63, %v988_v53  ;;  %v1056_v44 = vadd.f32 %v2433_v63, %v986_v43  ;;  %v521_v43 = vmul.f32 %v2940_v24, %v2211_v33 }
 0x1d6   :  { %v1431_v1 = vpop.f32.mrf.mxu1  ;;  %v275_v21 = vmul.f32 %v2211_v33, %v230_v61  ;;  %489 = vadd.xlane.f32.xlu2 %v488_v6  ;;  %v1105_v32 = vpack.c.bf16 %v1057_v20, %v1055_v39  ;;  %v736_v61 = vsel %vm735_vm6, %v2949_v8, %v732_v11 }
 0x1d7   :  { %1686 = vst [vmem:[#allocation10 + $0x48] sm:$0xff] %v1608_v30  ;;  %v1432_v14 = vadd.f32 %v1431_v1, %v1343_v38  ;;  %v746_v38 = vsel %vm745_vm5, %v2969_v0, %v742_v57  ;;  %v1106_v58 = vpack.c.bf16 %v1058_v5, %v1056_v44  ;;  %v919_v0 = vmul.f32 %v736_v61, %v2583_v22 }
 0x1d8   :  { %v3033_v27 = vsub.f32 %v2706_v51, %v275_v21  ;;  %v3036_v26 = vsub.f32 %v2708_v29, %v275_v21  ;;  %v921_v42 = vmul.f32 %v746_v38, %v2632_v55  ;;  %v922_v60 = vmul.f32 %v746_v38, %v2635_v48 }
 0x1d9   :  { %1687 = vst [vmem:[#allocation10 + $0x50] sm:$0xff] %v1432_v14  ;;  %v1520_v4 = vpop.f32.mrf.mxu2  ;;  %v920_v8 = vmul.f32 %v736_v61, %v3459_v9  ;;  %v989_v55 = vmul.f32 %v2411_v47, %v919_v0 }
 0x1da   :  { %v1521_v45 = vadd.f32 %v1520_v4, %v2798_v10  ;;  %v399_v51 = vmul.f32 %v3033_v27, %v3033_v27  ;;  %v400_v29 = vmul.f32 %v3036_v26, %v3036_v26  ;;  %v991_v40 = vmul.f32 %v2411_v47, %v921_v42 }
 0x1db   :  { %v1345_v34 = vpop.f32.mrf.mxu0 }
 0x1dc   :  { %v1609_v25 = vpop.f32.mrf.mxu3  ;;  %v1346_v49 = vadd.f32 %v1345_v34, %v2773_v50  ;;  %v491_v7 = vadd.f32 %v400_v29, %v399_v51  ;;  %v1061_v53 = vadd.f32 %v2424_v3, %v991_v40  ;;  %v990_v51 = vmul.f32 %v2426_v46, %v920_v8 }
 0x1dd   :  { %v1610_v16 = vadd.f32 %v1609_v25, %v1521_v45  ;;  %v992_v45 = vmul.f32 %v2426_v46, %v922_v60  ;;  %v1059_v29 = vadd.f32 %v2424_v3, %v989_v55  ;;  %v3461_v60 = vld [vmem:[#allocation30_spill] sm:$0xff] }
 0x1de   :  { %v1434_v23 = vpop.f32.mrf.mxu1  ;;  %492 = vadd.xlane.f32.xlu0 %v491_v7  ;;  %v1060_v57 = vadd.f32 %v2433_v63, %v990_v51 }
 0x1df   :  { %1688 = vst [vmem:[#allocation10 + $0x58] sm:$0xff] %v1610_v16  ;;  %v1435_v41 = vadd.f32 %v1434_v23, %v1346_v49  ;;  %1364 = vmatmul.bf16.gmra.mxu0 %v1105_v32  ;;  %1542 = vmatmul.bf16.gmra.mxu2 %v1105_v32  ;;  %v1062_v20 = vadd.f32 %v2433_v63, %v992_v45  ;;  %v553_v49 = vadd.f32 1e-05, %v521_v43 }
 0x1e0   :  { %v1107_v34 = vpack.c.bf16 %v1061_v53, %v1059_v29  ;;  %v3462_v29 = vld [vmem:[#allocation18_spill] sm:$0xff] }
 0x1e1   :  { %1689 = vst [vmem:[#allocation10 + $0x60] sm:$0xff] %v1435_v41  ;;  %v1523_v6 = vpop.f32.mrf.mxu2  ;;  %v1108_v25 = vpack.c.bf16 %v1062_v20, %v1060_v57  ;;  %1970 = vrsqrt.f32 %v553_v49  ;;  %vm753_vm7 = vweird.f32 %v553_v49  ;;  %v3463_v57 = vld [vmem:[#allocation24_spill] sm:$0xff] }
 0x1e2   :  { %v1524_v30 = vadd.f32 %v1523_v6, %v2798_v10  ;;  %1453 = vmatmul.bf16.gmra.mxu1 %v1106_v58  ;;  %1631 = vmatmul.bf16.gmra.mxu3 %v1106_v58 }
 0x1e3   :  { %v1347_v37 = vpop.f32.mrf.mxu0 }
 0x1e4   :  { %v1612_v1 = vpop.f32.mrf.mxu3  ;;  %v1348_v21 = vadd.f32 %v1347_v37, %v2773_v50 }
 0x1e5   :  { %v1613_v35 = vadd.f32 %v1612_v1, %v1524_v30  ;;  %v3460_v1 = vld [vmem:[#allocation29_spill] sm:$0xff] }
 0x1e6   :  { %v1436_v14 = vpop.f32.mrf.mxu1 }
 0x1e7   :  { %1690 = vst [vmem:[#allocation10 + $0x68] sm:$0xff] %v1613_v35  ;;  %v1437_v59 = vadd.f32 %v1436_v14, %v1348_v21  ;;  %v1971_v7 = vpop.eup %1970 }
 0x1e8   :  { %v748_v16 = vmul.f32 %v1971_v7, %v553_v49  ;;  %vm754_vm8 = vweird.f32 %v1971_v7 }
 0x1e9   :  { %1691 = vst [vmem:[#allocation10 + $0x70] sm:$0xff] %v1437_v59  ;;  %v1525_v4 = vpop.f32.mrf.mxu2  ;;  %vm755_vm9 = vmor %vm753_vm7, %vm754_vm8 }
 0x1ea   :  { %v1526_v15 = vadd.f32 %v1525_v4, %v2798_v10  ;;  %v749_v39 = vmul.f32 %v1971_v7, %v748_v16 }
 0x1ec   :  { %v1614_v22 = vpop.f32.mrf.mxu3  ;;  %v750_v23 = vmul.f32 0.5, %v749_v39 }
 0x1ed   :  { %v1615_v48 = vadd.f32 %v1614_v22, %v1526_v15 }
 0x1ee   :  { %v751_v41 = vsub.f32 1.5, %v750_v23  ;;  %v3464_v23 = vld [vmem:[#allocation15_spill] sm:$0xff] }
 0x1ef   :  { %1692 = vst [vmem:[#allocation10 + $0x78] sm:$0xff] %v1615_v48  ;;  %1369 = vmatmul.bf16.gmra.mxu0 %v1107_v34  ;;  %1547 = vmatmul.bf16.gmra.mxu2 %v1107_v34 }
 0x1f0   :  { %v752_v44 = vmul.f32 %v1971_v7, %v751_v41  ;;  %v3465_v41 = vld [vmem:[#allocation16_spill] sm:$0xff] }
 0x1f2   :  { %1458 = vmatmul.bf16.gmra.mxu1 %v1108_v25  ;;  %1636 = vmatmul.bf16.gmra.mxu3 %v1108_v25  ;;  %v756_v37 = vsel %vm755_vm9, %v1971_v7, %v752_v44 }
 0x1f3   :  { %v923_v21 = vmul.f32 %v756_v37, %v3460_v1  ;;  %v924_v59 = vmul.f32 %v756_v37, %v3461_v60 }
 0x1f5   :  { %v993_v22 = vmul.f32 %v2411_v47, %v923_v21  ;;  %v994_v34 = vmul.f32 %v2426_v46, %v924_v59 }
 0x1f7   :  { %v1064_v37 = vadd.f32 %v2433_v63, %v994_v34 }
 0x217   :  { %v466_v11 = vpop.xlane.xlu0 %465 }
 0x218   :  { %v522_v5 = vmul.f32 %v466_v11, %v2211_v33 }
 0x21a   :  { %v554_v32 = vadd.f32 1e-05, %v522_v5 }
 0x21c   :  { %1972 = vrsqrt.f32 %v554_v32  ;;  %vm763_vm11 = vweird.f32 %v554_v32 }
 0x220   :  { %v469_v38 = vpop.xlane.xlu0 %468 }
 0x221   :  { %v523_v24 = vmul.f32 %v469_v38, %v2211_v33 }
 0x222   :  { %v1973_v6 = vpop.eup %1972 }
 0x223   :  { %v758_v58 = vmul.f32 %v1973_v6, %v554_v32  ;;  %v3087_v30 = vadd.f32 1e-05, %v523_v24  ;;  %vm764_vm10 = vweird.f32 %v1973_v6 }
 0x224   :  { %vm765_vm12 = vmor %vm763_vm11, %vm764_vm10 }
 0x225   :  { %v759_v61 = vmul.f32 %v1973_v6, %v758_v58  ;;  %1974 = vrsqrt.f32 %v3087_v30  ;;  %vm773_vm14 = vweird.f32 %v3087_v30 }
 0x227   :  { %v760_v42 = vmul.f32 0.5, %v759_v61  ;;  %v1063_v61 = vadd.f32 %v2424_v3, %v993_v22  ;;  %v3466_v22 = vld [vmem:[#allocation19_spill] sm:$0xff] }
 0x228   :  { %v1350_v0 = vpop.f32.mrf.mxu0  ;;  %v1439_v14 = vpop.f32.mrf.mxu1 }
 0x229   :  { %v761_v35 = vsub.f32 1.5, %v760_v42  ;;  %v472_v40 = vpop.xlane.xlu1 %471  ;;  %v1351_v9 = vadd.f32 %v1350_v0, %v2773_v50  ;;  %v233_v8 = vpop.xlane.xlu0 %232 }
 0x22a   :  { %v524_v55 = vmul.f32 %v472_v40, %v2211_v33  ;;  %v276_v15 = vmul.f32 %v2211_v33, %v233_v8 }
 0x22b   :  { %v762_v4 = vmul.f32 %v1973_v6, %v761_v35  ;;  %v1975_v45 = vpop.eup %1974  ;;  %v1440_v53 = vadd.f32 %v1439_v14, %v1351_v9 }
 0x22c   :  { %v768_v51 = vmul.f32 %v1975_v45, %v3087_v30  ;;  %v3097_v48 = vadd.f32 1e-05, %v524_v55  ;;  %v3100_v20 = vsub.f32 %v3462_v29, %v276_v15  ;;  %v3104_v25 = vsub.f32 %v3463_v57, %v276_v15 }
 0x22d   :  { %1693 = vst [vmem:[#allocation10 + $0x80] sm:$0xff] %v1440_v53  ;;  %v766_v43 = vsel %vm765_vm12, %v1973_v6, %v762_v4  ;;  %v478_v7 = vpop.xlane.xlu2 %477  ;;  %vm774_vm13 = vweird.f32 %v1975_v45 }
 0x22e   :  { %v769_v49 = vmul.f32 %v1975_v45, %v768_v51  ;;  %1976 = vrsqrt.f32 %v3097_v48  ;;  %v401_v16 = vmul.f32 %v3100_v20, %v3100_v20  ;;  %v526_v39 = vmul.f32 %v478_v7, %v2211_v33  ;;  %vm775_vm15 = vmor %vm773_vm14, %vm774_vm13 }
 0x22f   :  { %v1528_v11 = vpop.f32.mrf.mxu2  ;;  %v402_v5 = vmul.f32 %v3104_v25, %v3104_v25  ;;  %v925_v32 = vmul.f32 %v766_v43, %v3464_v23  ;;  %v926_v44 = vmul.f32 %v766_v43, %v3465_v41  ;;  %v1617_v24 = vpop.f32.mrf.mxu3  ;;  %vm783_vm1 = vweird.f32 %v3097_v48 }
 0x230   :  { %v770_v38 = vmul.f32 0.5, %v769_v49  ;;  %v1529_v6 = vadd.f32 %v1528_v11, %v2798_v10  ;;  %v1352_v58 = vpop.f32.mrf.mxu0  ;;  %v3117_v42 = vadd.f32 1e-05, %v526_v39  ;;  %v1441_v59 = vpop.f32.mrf.mxu1 }
 0x231   :  { %v1353_v1 = vadd.f32 %v1352_v58, %v2773_v50  ;;  %v236_v21 = vpop.xlane.xlu0 %235  ;;  %v494_v35 = vadd.f32 %v402_v5, %v401_v16  ;;  %v995_v0 = vmul.f32 %v2411_v47, %v925_v32  ;;  %v996_v9 = vmul.f32 %v2426_v46, %v926_v44 }
 0x232   :  { %v771_v14 = vsub.f32 1.5, %v770_v38  ;;  %v1618_v60 = vadd.f32 %v1617_v24, %v1529_v6  ;;  %v277_v40 = vmul.f32 %v2211_v33, %v236_v21  ;;  %1978 = vrsqrt.f32 %v3117_v42 }
 0x233   :  { %v1442_v8 = vadd.f32 %v1441_v59, %v1353_v1  ;;  %495 = vadd.xlane.f32.xlu1 %v494_v35  ;;  %v1065_v4 = vadd.f32 %v2424_v3, %v995_v0  ;;  %v1066_v29 = vadd.f32 %v2433_v63, %v996_v9  ;;  %v3467_v35 = vld [vmem:[#allocation21_spill] sm:$0xff]  ;;  %vm803_vm3 = vweird.f32 %v3117_v42 }
 0x234   :  { %v1977_v55 = vpop.eup %1976  ;;  %v772_v15 = vmul.f32 %v1975_v45, %v771_v14  ;;  %1694 = vst [vmem:[#allocation10 + $0x88] sm:$0xff] %v1618_v60  ;;  %v3126_v53 = vsub.f32 %v2848_v36, %v277_v40  ;;  %v3129_v51 = vsub.f32 %v3466_v22, %v277_v40  ;;  %v3468_v60 = vld [vmem:[#allocation17_spill] sm:$0xff] }
 0x235   :  { %v778_v34 = vmul.f32 %v1977_v55, %v3097_v48  ;;  %1695 = vst [vmem:[#allocation10 + $0x90] sm:$0xff] %v1442_v8  ;;  %v1109_v57 = vpack.c.bf16 %v1065_v4, %v1063_v61  ;;  %v1110_v43 = vpack.c.bf16 %v1066_v29, %v1064_v37  ;;  %vm784_vm0 = vweird.f32 %v1977_v55 }
 0x236   :  { %v403_v49 = vmul.f32 %v3126_v53, %v3126_v53  ;;  %v404_v36 = vmul.f32 %v3129_v51, %v3129_v51  ;;  %v475_v16 = vpop.xlane.xlu1 %474  ;;  %v776_v11 = vsel %vm775_vm15, %v1975_v45, %v772_v15  ;;  %vm785_vm2 = vmor %vm783_vm1, %vm784_vm0 }
 0x237   :  { %v779_v7 = vmul.f32 %v1977_v55, %v778_v34  ;;  %v481_v39 = vpop.xlane.xlu2 %480  ;;  %1374 = vmatmul.bf16.gmra.mxu0 %v1109_v57  ;;  %1552 = vmatmul.bf16.gmra.mxu2 %v1109_v57  ;;  %v525_v30 = vmul.f32 %v475_v16, %v2211_v33  ;;  %v1530_v23 = vpop.f32.mrf.mxu2  ;;  %v927_v0 = vmul.f32 %v776_v11, %v3467_v35 }
 0x238   :  { %v527_v5 = vmul.f32 %v481_v39, %v2211_v33  ;;  %1463 = vmatmul.bf16.gmra.mxu1 %v1110_v43  ;;  %1641 = vmatmul.bf16.gmra.mxu3 %v1110_v43  ;;  %v497_v32 = vadd.f32 %v404_v36, %v403_v49  ;;  %v3141_v41 = vpop.eup %1978  ;;  %v1531_v38 = vadd.f32 %v1530_v23, %v2798_v10  ;;  %v1619_v61 = vpop.f32.mrf.mxu3  ;;  %v3469_v43 = vld [vmem:[#allocation25_spill] sm:$0xff]  ;;  %v3470_v36 = vld [vmem:[#allocation31_spill] sm:$0xff] }
 0x239   :  { %v780_v44 = vmul.f32 0.5, %v779_v7  ;;  %v484_v6 = vpop.xlane.xlu0 %483  ;;  %v798_v24 = vmul.f32 %v3141_v41, %v3117_v42  ;;  %v3146_v58 = vadd.f32 1e-05, %v525_v30  ;;  %v928_v59 = vmul.f32 %v776_v11, %v3468_v60 }
 0x23a   :  { %v3148_v45 = vadd.f32 1e-05, %v527_v5  ;;  %498 = vadd.xlane.f32.xlu2 %v497_v32  ;;  %v1620_v1 = vadd.f32 %v1619_v61, %v1531_v38  ;;  %v528_v21 = vmul.f32 %v484_v6, %v2211_v33  ;;  %v997_v34 = vmul.f32 %v2411_v47, %v927_v0 }
 0x23b   :  { %v781_v37 = vsub.f32 1.5, %v780_v44  ;;  %v799_v14 = vmul.f32 %v3141_v41, %v798_v24  ;;  %1980 = vrsqrt.f32 %v3146_v58  ;;  %v998_v16 = vmul.f32 %v2426_v46, %v928_v59 }
 0x23c   :  { %1982 = vrsqrt.f32 %v3148_v45  ;;  %1696 = vst [vmem:[#allocation10 + $0x98] sm:$0xff] %v1620_v1  ;;  %v1355_v9 = vpop.f32.mrf.mxu0  ;;  %v3157_v8 = vadd.f32 1e-05, %v528_v21  ;;  %vm804_vm4 = vweird.f32 %v3141_v41  ;;  %v1067_v24 = vadd.f32 %v2424_v3, %v997_v34 }
 0x23d   :  { %v782_v40 = vmul.f32 %v1977_v55, %v781_v37  ;;  %v800_v4 = vmul.f32 0.5, %v799_v14  ;;  %v1356_v15 = vadd.f32 %v1355_v9, %v2773_v50  ;;  %v1068_v61 = vadd.f32 %v2433_v63, %v998_v16  ;;  %vm3205_vm5 = vmor %vm803_vm3, %vm804_vm4 }
 0x23e   :  { %v239_v22 = vpop.xlane.xlu1 %238  ;;  %1984 = vrsqrt.f32 %v3157_v8  ;;  %vm793_vm7 = vweird.f32 %v3146_v58  ;;  %vm823_vm9 = vweird.f32 %v3157_v8  ;;  %vm813_vm11 = vweird.f32 %v3148_v45 }
 0x23f   :  { %v786_v29 = vsel %vm785_vm2, %v1977_v55, %v782_v40  ;;  %v278_v57 = vmul.f32 %v2211_v33, %v239_v22  ;;  %v1444_v48 = vpop.f32.mrf.mxu1  ;;  %v801_v30 = vsub.f32 1.5, %v800_v4 }
 0x240   :  { %v929_v49 = vmul.f32 %v786_v29, %v3469_v43  ;;  %v930_v7 = vmul.f32 %v786_v29, %v3470_v36  ;;  %v1445_v39 = vadd.f32 %v1444_v48, %v1356_v15 }
 0x241   :  { %v3167_v11 = vpop.eup %1980  ;;  %v3170_v5 = vsub.f32 %v2944_v28, %v278_v57  ;;  %v3173_v55 = vsub.f32 %v2946_v17, %v278_v57  ;;  %v802_v60 = vmul.f32 %v3141_v41, %v801_v30 }
 0x242   :  { %v999_v23 = vmul.f32 %v2411_v47, %v929_v49  ;;  %v3176_v32 = vpop.eup %1982  ;;  %v788_v44 = vmul.f32 %v3167_v11, %v3146_v58  ;;  %1697 = vst [vmem:[#allocation10 + $0xa0] sm:$0xff] %v1445_v39  ;;  %v1533_v38 = vpop.f32.mrf.mxu2  ;;  %v1000_v6 = vmul.f32 %v2426_v46, %v930_v7  ;;  %vm794_vm6 = vweird.f32 %v3167_v11 }
 0x243   :  { %v1534_v28 = vadd.f32 %v1533_v38, %v2798_v10  ;;  %v405_v17 = vmul.f32 %v3170_v5, %v3170_v5  ;;  %v406_v35 = vmul.f32 %v3173_v55, %v3173_v55  ;;  %v808_v59 = vmul.f32 %v3176_v32, %v3148_v45  ;;  %vm795_vm8 = vmor %vm793_vm7, %vm794_vm6 }
 0x244   :  { %v3188_v37 = vpop.eup %1984  ;;  %v789_v1 = vmul.f32 %v3167_v11, %v788_v44  ;;  %v1357_v21 = vpop.f32.mrf.mxu0  ;;  %v1069_v0 = vadd.f32 %v2424_v3, %v999_v23  ;;  %v1070_v14 = vadd.f32 %v2433_v63, %v1000_v6  ;;  %v806_v38 = vsel %vm3205_vm5, %v3141_v41, %v802_v60 }
 0x245   :  { %v818_v40 = vmul.f32 %v3188_v37, %v3157_v8  ;;  %v1622_v9 = vpop.f32.mrf.mxu3  ;;  %v1358_v4 = vadd.f32 %v1357_v21, %v2773_v50  ;;  %v500_v57 = vadd.f32 %v406_v35, %v405_v17  ;;  %v809_v23 = vmul.f32 %v3176_v32, %v808_v59  ;;  %v3473_v21 = vld [vmem:[#allocation32_spill] sm:$0xff]  ;;  %v3474_v59 = vld [vmem:[#allocation33_spill] sm:$0xff] }
 0x246   :  { %v790_v22 = vmul.f32 0.5, %v789_v1  ;;  %v1623_v29 = vadd.f32 %v1622_v9, %v1534_v28  ;;  %v487_v34 = vpop.xlane.xlu1 %486  ;;  %v1111_v48 = vpack.c.bf16 %v1069_v0, %v1067_v24  ;;  %v1112_v7 = vpack.c.bf16 %v1070_v14, %v1068_v61 }
 0x247   :  { %v819_v43 = vmul.f32 %v3188_v37, %v818_v40  ;;  %v529_v49 = vmul.f32 %v487_v34, %v2211_v33  ;;  %v1446_v36 = vpop.f32.mrf.mxu1  ;;  %501 = vadd.xlane.f32.xlu0 %v500_v57  ;;  %v933_v58 = vmul.f32 %v806_v38, %v3473_v21  ;;  %v810_v35 = vmul.f32 0.5, %v809_v23 }
 0x248   :  { %v791_v39 = vsub.f32 1.5, %v790_v22  ;;  %1698 = vst [vmem:[#allocation10 + $0xa8] sm:$0xff] %v1623_v29  ;;  %v1447_v42 = vadd.f32 %v1446_v36, %v1358_v4  ;;  %1379 = vmatmul.bf16.gmra.mxu0 %v1111_v48  ;;  %1468 = vmatmul.bf16.gmra.mxu1 %v1112_v7  ;;  %v934_v40 = vmul.f32 %v806_v38, %v3474_v59  ;;  %vm824_vm10 = vweird.f32 %v3188_v37 }
 0x249   :  { %v490_v16 = vpop.xlane.xlu2 %489  ;;  %v3214_v44 = vadd.f32 1e-05, %v529_v49  ;;  %1557 = vmatmul.bf16.gmra.mxu2 %v1111_v48  ;;  %1646 = vmatmul.bf16.gmra.mxu3 %v1112_v7  ;;  %v820_v24 = vmul.f32 0.5, %v819_v43  ;;  %v1003_v34 = vmul.f32 %v2411_v47, %v933_v58  ;;  %v811_v48 = vsub.f32 1.5, %v810_v35  ;;  %vm825_vm13 = vmor %vm823_vm9, %vm824_vm10 }
 0x24a   :  { %v530_v30 = vmul.f32 %v490_v16, %v2211_v33  ;;  %v792_v6 = vmul.f32 %v3167_v11, %v791_v39  ;;  %1699 = vst [vmem:[#allocation10 + $0xb0] sm:$0xff] %v1447_v42  ;;  %v1535_v28 = vpop.f32.mrf.mxu2  ;;  %v1004_v43 = vmul.f32 %v2426_v46, %v934_v40  ;;  %vm814_vm12 = vweird.f32 %v3176_v32 }
 0x24b   :  { %1986 = vrsqrt.f32 %v3214_v44  ;;  %v1536_v61 = vadd.f32 %v1535_v28, %v2798_v10  ;;  %v821_v4 = vsub.f32 1.5, %v820_v24  ;;  %v812_v38 = vmul.f32 %v3176_v32, %v811_v48  ;;  %vm815_vm14 = vmor %vm813_vm11, %vm814_vm12 }
 0x24c   :  { %v3221_v17 = vadd.f32 1e-05, %v530_v30  ;;  %v1360_v1 = vpop.f32.mrf.mxu0  ;;  %v796_v41 = vsel %vm795_vm8, %v3167_v11, %v792_v6  ;;  %v1073_v30 = vadd.f32 %v2424_v3, %v1003_v34  ;;  %vm833_vm1 = vweird.f32 %v3214_v44 }
 0x24d   :  { %v1624_v0 = vpop.f32.mrf.mxu3  ;;  %v1361_v14 = vadd.f32 %v1360_v1, %v2773_v50  ;;  %v931_v60 = vmul.f32 %v796_v41, %v2877_v2  ;;  %v932_v29 = vmul.f32 %v796_v41, %v2881_v13  ;;  %v822_v7 = vmul.f32 %v3188_v37, %v821_v4 }
 0x24e   :  { %1988 = vrsqrt.f32 %v3221_v17  ;;  %v1625_v9 = vadd.f32 %v1624_v0, %v1536_v61  ;;  %v1074_v61 = vadd.f32 %v2433_v63, %v1004_v43  ;;  %vm843_vm15 = vweird.f32 %v3221_v17 }
 0x24f   :  { %v1449_v15 = vpop.f32.mrf.mxu1  ;;  %v1001_v22 = vmul.f32 %v2411_v47, %v931_v60  ;;  %v1002_v2 = vmul.f32 %v2426_v46, %v932_v29  ;;  %v826_v41 = vsel %vm825_vm13, %v3188_v37, %v822_v7 }
 0x250   :  { %1700 = vst [vmem:[#allocation10 + $0xb8] sm:$0xff] %v1625_v9  ;;  %v1450_v11 = vadd.f32 %v1449_v15, %v1361_v14  ;;  %v816_v14 = vsel %vm815_vm14, %v3176_v32, %v812_v38  ;;  %v937_v45 = vmul.f32 %v826_v41, %v2904_v62  ;;  %v938_v37 = vmul.f32 %v826_v41, %v2907_v31 }
 0x251   :  { %v3237_v57 = vpop.eup %1986  ;;  %v1071_v36 = vadd.f32 %v2424_v3, %v1001_v22  ;;  %v1072_v23 = vadd.f32 %v2433_v63, %v1002_v2  ;;  %v935_v4 = vmul.f32 %v816_v14, %v2884_v52  ;;  %v936_v22 = vmul.f32 %v816_v14, %v2892_v19 }
 0x252   :  { %1701 = vst [vmem:[#allocation10 + $0xc0] sm:$0xff] %v1450_v11  ;;  %v1538_v13 = vpop.f32.mrf.mxu2  ;;  %v828_v6 = vmul.f32 %v3237_v57, %v3214_v44  ;;  %v1007_v62 = vmul.f32 %v2411_v47, %v937_v45  ;;  %v1008_v43 = vmul.f32 %v2426_v46, %v938_v37  ;;  %vm834_vm2 = vweird.f32 %v3237_v57 }
 0x253   :  { %v1539_v39 = vadd.f32 %v1538_v13, %v2798_v10  ;;  %v1113_v1 = vpack.c.bf16 %v1073_v30, %v1071_v36  ;;  %v1114_v35 = vpack.c.bf16 %v1074_v61, %v1072_v23  ;;  %v1005_v13 = vmul.f32 %v2411_v47, %v935_v4  ;;  %vm835_vm4 = vmor %vm833_vm1, %vm834_vm2 }
 0x254   :  { %v3242_v49 = vpop.eup %1988  ;;  %v1362_v42 = vpop.f32.mrf.mxu0  ;;  %v829_v60 = vmul.f32 %v3237_v57, %v828_v6  ;;  %v1006_v52 = vmul.f32 %v2426_v46, %v936_v22  ;;  %v1077_v7 = vadd.f32 %v2424_v3, %v1007_v62 }
 0x255   :  { %v838_v16 = vmul.f32 %v3242_v49, %v3221_v17  ;;  %v1627_v28 = vpop.f32.mrf.mxu3  ;;  %v1363_v24 = vadd.f32 %v1362_v42, %v2773_v50  ;;  %vm844_vm0 = vweird.f32 %v3242_v49  ;;  %v1078_v42 = vadd.f32 %v2433_v63, %v1008_v43 }
 0x256   :  { %v1628_v8 = vadd.f32 %v1627_v28, %v1539_v39  ;;  %v830_v32 = vmul.f32 0.5, %v829_v60  ;;  %vm845_vm3 = vmor %vm843_vm15, %vm844_vm0  ;;  %v1075_v30 = vadd.f32 %v2424_v3, %v1005_v13  ;;  %v1076_v28 = vadd.f32 %v2433_v63, %v1006_v52 }
 0x257   :  { %v839_v21 = vmul.f32 %v3242_v49, %v838_v16  ;;  %v1451_v58 = vpop.f32.mrf.mxu1 }
 0x258   :  { %1702 = vst [vmem:[#allocation10 + $0xc8] sm:$0xff] %v1628_v8  ;;  %v1452_v0 = vadd.f32 %v1451_v58, %v1363_v24  ;;  %1384 = vmatmul.bf16.gmra.mxu0 %v1113_v1  ;;  %1473 = vmatmul.bf16.gmra.mxu1 %v1114_v35  ;;  %v831_v36 = vsub.f32 1.5, %v830_v32  ;;  %v1115_v61 = vpack.c.bf16 %v1077_v7, %v1075_v30 }
 0x259   :  { %1562 = vmatmul.bf16.gmra.mxu2 %v1113_v1  ;;  %1651 = vmatmul.bf16.gmra.mxu3 %v1114_v35  ;;  %v840_v40 = vmul.f32 0.5, %v839_v21  ;;  %v1116_v41 = vpack.c.bf16 %v1078_v42, %v1076_v28 }
 0x25a   :  { %1703 = vst [vmem:[#allocation10 + $0xd0] sm:$0xff] %v1452_v0  ;;  %v1540_v59 = vpop.f32.mrf.mxu2  ;;  %v832_v23 = vmul.f32 %v3237_v57, %v831_v36 }
 0x25b   :  { %v1541_v9 = vadd.f32 %v1540_v59, %v2798_v10  ;;  %v841_v48 = vsub.f32 1.5, %v840_v40 }
 0x25c   :  { %v1365_v15 = vpop.f32.mrf.mxu0  ;;  %v836_v58 = vsel %vm835_vm4, %v3237_v57, %v832_v23 }
 0x25d   :  { %v1629_v29 = vpop.f32.mrf.mxu3  ;;  %v1366_v34 = vadd.f32 %v1365_v15, %v2773_v50  ;;  %v842_v16 = vmul.f32 %v3242_v49, %v841_v48  ;;  %v940_v45 = vmul.f32 %v836_v58, %v2964_v56 }
 0x25e   :  { %v1630_v11 = vadd.f32 %v1629_v29, %v1541_v9 }
 0x25f   :  { %v1454_v2 = vpop.f32.mrf.mxu1  ;;  %v846_v8 = vsel %vm845_vm3, %v3242_v49, %v842_v16  ;;  %v939_v49 = vmul.f32 %v836_v58, %v2961_v18  ;;  %v1010_v15 = vmul.f32 %v2426_v46, %v940_v45 }
 0x260   :  { %1704 = vst [vmem:[#allocation10 + $0xd8] sm:$0xff] %v1630_v11  ;;  %v1455_v31 = vadd.f32 %v1454_v2, %v1366_v34  ;;  %v941_v35 = vmul.f32 %v846_v8, %v3009_v54  ;;  %v942_v44 = vmul.f32 %v846_v8, %v3012_v12 }
 0x261   :  { %v1009_v12 = vmul.f32 %v2411_v47, %v939_v49  ;;  %v1080_v48 = vadd.f32 %v2433_v63, %v1010_v15 }
 0x262   :  { %1705 = vst [vmem:[#allocation10 + $0xe0] sm:$0xff] %v1455_v31  ;;  %v1543_v19 = vpop.f32.mrf.mxu2  ;;  %v1011_v40 = vmul.f32 %v2411_v47, %v941_v35  ;;  %v1012_v54 = vmul.f32 %v2426_v46, %v942_v44 }
 0x263   :  { %v1544_v39 = vadd.f32 %v1543_v19, %v2798_v10  ;;  %v1079_v11 = vadd.f32 %v2424_v3, %v1009_v12 }
 0x264   :  { %v1367_v17 = vpop.f32.mrf.mxu0  ;;  %v1081_v22 = vadd.f32 %v2424_v3, %v1011_v40  ;;  %v1082_v32 = vadd.f32 %v2433_v63, %v1012_v54 }
 0x265   :  { %v1632_v38 = vpop.f32.mrf.mxu3  ;;  %v1368_v6 = vadd.f32 %v1367_v17, %v2773_v50 }
 0x266   :  { %v1633_v24 = vadd.f32 %v1632_v38, %v1544_v39  ;;  %v1117_v43 = vpack.c.bf16 %v1081_v22, %v1079_v11  ;;  %v1118_v13 = vpack.c.bf16 %v1082_v32, %v1080_v48  ;;  %v493_v39 = vpop.xlane.xlu0 %492 }
 0x267   :  { %v1456_v1 = vpop.f32.mrf.mxu1  ;;  %v531_v42 = vmul.f32 %v493_v39, %v2211_v33 }
 0x268   :  { %1706 = vst [vmem:[#allocation10 + $0xe8] sm:$0xff] %v1633_v24  ;;  %v1457_v21 = vadd.f32 %v1456_v1, %v1368_v6  ;;  %1389 = vmatmul.bf16.gmra.mxu0 %v1115_v61  ;;  %1478 = vmatmul.bf16.gmra.mxu1 %v1116_v41 }
 0x269   :  { %1567 = vmatmul.bf16.gmra.mxu2 %v1115_v61  ;;  %1656 = vmatmul.bf16.gmra.mxu3 %v1116_v41  ;;  %v563_v17 = vadd.f32 1e-05, %v531_v42 }
 0x26a   :  { %1707 = vst [vmem:[#allocation10 + $0xf0] sm:$0xff] %v1457_v21  ;;  %v1545_v0 = vpop.f32.mrf.mxu2 }
 0x26b   :  { %v1546_v14 = vadd.f32 %v1545_v0, %v2798_v10  ;;  %1990 = vrsqrt.f32 %v563_v17  ;;  %vm853_vm5 = vweird.f32 %v563_v17 }
 0x26c   :  { %v1370_v60 = vpop.f32.mrf.mxu0 }
 0x26d   :  { %v1634_v59 = vpop.f32.mrf.mxu3  ;;  %v1371_v37 = vadd.f32 %v1370_v60, %v2773_v50 }
 0x26e   :  { %v1635_v57 = vadd.f32 %v1634_v59, %v1546_v14 }
 0x26f   :  { %v1459_v9 = vpop.f32.mrf.mxu1 }
 0x270   :  { %1708 = vst [vmem:[#allocation10 + $0xf8] sm:$0xff] %v1635_v57  ;;  %v1460_v4 = vadd.f32 %v1459_v9, %v1371_v37 }
 0x271   :  { %v1991_v30 = vpop.eup %1990 }
 0x272   :  { %1709 = vst [vmem:[#allocation10 + $0x100] sm:$0xff] %v1460_v4  ;;  %v1548_v18 = vpop.f32.mrf.mxu2  ;;  %v848_v23 = vmul.f32 %v1991_v30, %v563_v17  ;;  %vm854_vm6 = vweird.f32 %v1991_v30 }
 0x273   :  { %v1549_v56 = vadd.f32 %v1548_v18, %v2798_v10  ;;  %vm855_vm7 = vmor %vm853_vm5, %vm854_vm6 }
 0x274   :  { %v1372_v29 = vpop.f32.mrf.mxu0  ;;  %v849_v38 = vmul.f32 %v1991_v30, %v848_v23 }
 0x275   :  { %v1637_v34 = vpop.f32.mrf.mxu3  ;;  %v1373_v62 = vadd.f32 %v1372_v29, %v2773_v50 }
 0x276   :  { %v1638_v2 = vadd.f32 %v1637_v34, %v1549_v56  ;;  %v850_v61 = vmul.f32 0.5, %v849_v38 }
 0x277   :  { %v1461_v31 = vpop.f32.mrf.mxu1 }
 0x278   :  { %1710 = vst [vmem:[#allocation10 + $0x108] sm:$0xff] %v1638_v2  ;;  %v1462_v36 = vadd.f32 %v1461_v31, %v1373_v62  ;;  %1394 = vmatmul.bf16.gmra.mxu0 %v1117_v43  ;;  %1483 = vmatmul.bf16.gmra.mxu1 %v1118_v13  ;;  %v851_v1 = vsub.f32 1.5, %v850_v61 }
 0x279   :  { %1572 = vmatmul.bf16.gmra.mxu2 %v1117_v43  ;;  %1661 = vmatmul.bf16.gmra.mxu3 %v1118_v13 }
 0x27a   :  { %1711 = vst [vmem:[#allocation10 + $0x110] sm:$0xff] %v1462_v36  ;;  %v1550_v52 = vpop.f32.mrf.mxu2  ;;  %v852_v35 = vmul.f32 %v1991_v30, %v851_v1 }
 0x27b   :  { %v1551_v19 = vadd.f32 %v1550_v52, %v2798_v10 }
 0x27c   :  { %v856_v45 = vsel %vm855_vm7, %v1991_v30, %v852_v35 }
 0x27d   :  { %v1639_v7 = vpop.f32.mrf.mxu3  ;;  %v943_v9 = vmul.f32 %v856_v45, %v3033_v27  ;;  %v944_v4 = vmul.f32 %v856_v45, %v3036_v26 }
 0x27e   :  { %v1640_v16 = vadd.f32 %v1639_v7, %v1551_v19 }
 0x27f   :  { %v1013_v26 = vmul.f32 %v2411_v47, %v943_v9  ;;  %v1014_v31 = vmul.f32 %v2426_v46, %v944_v4 }
 0x280   :  { %1712 = vst [vmem:[#allocation10 + $0x118] sm:$0xff] %v1640_v16 }
 0x281   :  { %v1084_v16 = vadd.f32 %v2433_v63, %v1014_v31 }
 0x2a6   :  { %v496_v6 = vpop.xlane.xlu1 %495 }
 0x2a7   :  { %v532_v28 = vmul.f32 %v496_v6, %v2211_v33 }
 0x2a9   :  { %v564_v24 = vadd.f32 1e-05, %v532_v28 }
 0x2ab   :  { %1992 = vrsqrt.f32 %v564_v24  ;;  %vm863_vm9 = vweird.f32 %v564_v24 }
 0x2ad   :  { %v499_v8 = vpop.xlane.xlu2 %498 }
 0x2ae   :  { %v533_v41 = vmul.f32 %v499_v8, %v2211_v33 }
 0x2b0   :  { %v3312_v21 = vadd.f32 1e-05, %v533_v41 }
 0x2b1   :  { %v1993_v58 = vpop.eup %1992 }
 0x2b2   :  { %v858_v0 = vmul.f32 %v1993_v58, %v564_v24  ;;  %1994 = vrsqrt.f32 %v3312_v21  ;;  %vm864_vm8 = vweird.f32 %v1993_v58  ;;  %vm873_vm11 = vweird.f32 %v3312_v21 }
 0x2b3   :  { %vm865_vm10 = vmor %vm863_vm9, %vm864_vm8 }
 0x2b4   :  { %v859_v44 = vmul.f32 %v1993_v58, %v858_v0  ;;  %v1375_v14 = vpop.f32.mrf.mxu0 }
 0x2b5   :  { %v1376_v49 = vadd.f32 %v1375_v14, %v2773_v50  ;;  %v1464_v60 = vpop.f32.mrf.mxu1 }
 0x2b6   :  { %v860_v59 = vmul.f32 0.5, %v859_v44 }
 0x2b7   :  { %v1465_v37 = vadd.f32 %v1464_v60, %v1376_v49 }
 0x2b8   :  { %v1995_v57 = vpop.eup %1994  ;;  %v861_v40 = vsub.f32 1.5, %v860_v59 }
 0x2b9   :  { %v868_v54 = vmul.f32 %v1995_v57, %v3312_v21  ;;  %1713 = vst [vmem:[#allocation10 + $0x120] sm:$0xff] %v1465_v37  ;;  %vm874_vm12 = vweird.f32 %v1995_v57 }
 0x2ba   :  { %v862_v12 = vmul.f32 %v1993_v58, %v861_v40  ;;  %v1553_v15 = vpop.f32.mrf.mxu2  ;;  %v502_v29 = vpop.xlane.xlu0 %501  ;;  %vm875_vm13 = vmor %vm873_vm11, %vm874_vm12 }
 0x2bb   :  { %v869_v18 = vmul.f32 %v1995_v57, %v868_v54  ;;  %v1554_v22 = vadd.f32 %v1553_v15, %v2798_v10  ;;  %v1642_v56 = vpop.f32.mrf.mxu3  ;;  %v534_v62 = vmul.f32 %v502_v29, %v2211_v33 }
 0x2bc   :  { %v866_v32 = vsel %vm865_vm10, %v1993_v58, %v862_v12  ;;  %v1377_v11 = vpop.f32.mrf.mxu0 }
 0x2bd   :  { %v945_v34 = vmul.f32 %v866_v32, %v3100_v20  ;;  %v946_v27 = vmul.f32 %v866_v32, %v3104_v25  ;;  %v1466_v48 = vpop.f32.mrf.mxu1  ;;  %v1643_v2 = vadd.f32 %v1642_v56, %v1554_v22  ;;  %v1378_v43 = vadd.f32 %v1377_v11, %v2773_v50 }
 0x2be   :  { %v870_v13 = vmul.f32 0.5, %v869_v18  ;;  %v566_v36 = vadd.f32 1e-05, %v534_v62  ;;  %v1083_v25 = vadd.f32 %v2424_v3, %v1013_v26 }
 0x2bf   :  { %v1015_v52 = vmul.f32 %v2411_v47, %v945_v34  ;;  %v1016_v19 = vmul.f32 %v2426_v46, %v946_v27  ;;  %1714 = vst [vmem:[#allocation10 + $0x128] sm:$0xff] %v1643_v2  ;;  %v1467_v20 = vadd.f32 %v1466_v48, %v1378_v43 }
 0x2c0   :  { %1996 = vrsqrt.f32 %v566_v36  ;;  %v871_v42 = vsub.f32 1.5, %v870_v13  ;;  %vm883_vm15 = vweird.f32 %v566_v36 }
 0x2c1   :  { %v1085_v33 = vadd.f32 %v2424_v3, %v1015_v52  ;;  %1715 = vst [vmem:[#allocation10 + $0x130] sm:$0xff] %v1467_v20  ;;  %v1086_v39 = vadd.f32 %v2433_v63, %v1016_v19 }
 0x2c2   :  { %v1555_v7 = vpop.f32.mrf.mxu2  ;;  %v872_v61 = vmul.f32 %v1995_v57, %v871_v42 }
 0x2c3   :  { %v1556_v17 = vadd.f32 %v1555_v7, %v2798_v10  ;;  %v1119_v30 = vpack.c.bf16 %v1085_v33, %v1083_v25  ;;  %v1644_v23 = vpop.f32.mrf.mxu3  ;;  %v1120_v38 = vpack.c.bf16 %v1086_v39, %v1084_v16 }
 0x2c4   :  { %v876_v0 = vsel %vm875_vm13, %v1995_v57, %v872_v61 }
 0x2c5   :  { %v1645_v6 = vadd.f32 %v1644_v23, %v1556_v17  ;;  %1399 = vmatmul.bf16.gmra.mxu0 %v1119_v30  ;;  %1577 = vmatmul.bf16.gmra.mxu2 %v1119_v30  ;;  %v1380_v28 = vpop.f32.mrf.mxu0  ;;  %v1469_v1 = vpop.f32.mrf.mxu1  ;;  %v947_v49 = vmul.f32 %v876_v0, %v3126_v53  ;;  %v948_v37 = vmul.f32 %v876_v0, %v3129_v51 }
 0x2c6   :  { %1488 = vmatmul.bf16.gmra.mxu1 %v1120_v38  ;;  %1666 = vmatmul.bf16.gmra.mxu3 %v1120_v38  ;;  %v1997_v24 = vpop.eup %1996  ;;  %v1381_v8 = vadd.f32 %v1380_v28, %v2773_v50 }
 0x2c7   :  { %1716 = vst [vmem:[#allocation10 + $0x138] sm:$0xff] %v1645_v6  ;;  %v878_v41 = vmul.f32 %v1997_v24, %v566_v36  ;;  %vm884_vm14 = vweird.f32 %v1997_v24  ;;  %v1017_v53 = vmul.f32 %v2411_v47, %v947_v49  ;;  %v1018_v22 = vmul.f32 %v2426_v46, %v948_v37 }
 0x2c8   :  { %v1470_v58 = vadd.f32 %v1469_v1, %v1381_v8  ;;  %vm885_vm0 = vmor %vm883_vm15, %vm884_vm14 }
 0x2c9   :  { %v879_v35 = vmul.f32 %v1997_v24, %v878_v41  ;;  %v1087_v34 = vadd.f32 %v2424_v3, %v1017_v53 }
 0x2ca   :  { %1717 = vst [vmem:[#allocation10 + $0x140] sm:$0xff] %v1470_v58 }
 0x2cb   :  { %v880_v44 = vmul.f32 0.5, %v879_v35 }
 0x2cc   :  { %v1558_v14 = vpop.f32.mrf.mxu2  ;;  %v1647_v21 = vpop.f32.mrf.mxu3 }
 0x2cd   :  { %v881_v60 = vsub.f32 1.5, %v880_v44  ;;  %v1559_v45 = vadd.f32 %v1558_v14, %v2798_v10  ;;  %v1382_v59 = vpop.f32.mrf.mxu0  ;;  %v1471_v9 = vpop.f32.mrf.mxu1 }
 0x2ce   :  { %v1383_v40 = vadd.f32 %v1382_v59, %v2773_v50 }
 0x2cf   :  { %v882_v54 = vmul.f32 %v1997_v24, %v881_v60  ;;  %v1648_v4 = vadd.f32 %v1647_v21, %v1559_v45 }
 0x2d0   :  { %v1472_v57 = vadd.f32 %v1471_v9, %v1383_v40 }
 0x2d1   :  { %v886_v12 = vsel %vm885_vm0, %v1997_v24, %v882_v54  ;;  %1718 = vst [vmem:[#allocation10 + $0x148] sm:$0xff] %v1648_v4 }
 0x2d2   :  { %v949_v15 = vmul.f32 %v886_v12, %v3170_v5  ;;  %v950_v18 = vmul.f32 %v886_v12, %v3173_v55  ;;  %1719 = vst [vmem:[#allocation10 + $0x150] sm:$0xff] %v1472_v57  ;;  %v1088_v5 = vadd.f32 %v2433_v63, %v1018_v22 }
 0x2d4   :  { %v1560_v51 = vpop.f32.mrf.mxu2  ;;  %v1019_v56 = vmul.f32 %v2411_v47, %v949_v15  ;;  %v1020_v32 = vmul.f32 %v2426_v46, %v950_v18  ;;  %v1649_v11 = vpop.f32.mrf.mxu3 }
 0x2d5   :  { %v1561_v29 = vadd.f32 %v1560_v51, %v2798_v10  ;;  %v1385_v27 = vpop.f32.mrf.mxu0  ;;  %v1474_v26 = vpop.f32.mrf.mxu1 }
 0x2d6   :  { %v1089_v62 = vadd.f32 %v2424_v3, %v1019_v56  ;;  %v1090_v55 = vadd.f32 %v2433_v63, %v1020_v32  ;;  %v1386_v48 = vadd.f32 %v1385_v27, %v2773_v50 }
 0x2d7   :  { %v1650_v2 = vadd.f32 %v1649_v11, %v1561_v29 }
 0x2d8   :  { %v1121_v43 = vpack.c.bf16 %v1089_v62, %v1087_v34  ;;  %v1122_v47 = vpack.c.bf16 %v1090_v55, %v1088_v5  ;;  %v1475_v31 = vadd.f32 %v1474_v26, %v1386_v48 }
 0x2d9   :  { %1720 = vst [vmem:[#allocation10 + $0x158] sm:$0xff] %v1650_v2 }
 0x2da   :  { %1404 = vmatmul.bf16.gmra.mxu0 %v1121_v43  ;;  %1493 = vmatmul.bf16.gmra.mxu1 %v1122_v47  ;;  %1721 = vst [vmem:[#allocation10 + $0x160] sm:$0xff] %v1475_v31 }
 0x2db   :  { %1582 = vmatmul.bf16.gmra.mxu2 %v1121_v43  ;;  %1671 = vmatmul.bf16.gmra.mxu3 %v1122_v47 }
 0x2dc   :  { %v1563_v46 = vpop.f32.mrf.mxu2  ;;  %v1652_v13 = vpop.f32.mrf.mxu3 }
 0x2dd   :  { %v1564_v3 = vadd.f32 %v1563_v46, %v2798_v10  ;;  %v1387_v36 = vpop.f32.mrf.mxu0  ;;  %v1476_v52 = vpop.f32.mrf.mxu1 }
 0x2de   :  { %v1388_v63 = vadd.f32 %v1387_v36, %v2773_v50 }
 0x2df   :  { %v1653_v19 = vadd.f32 %v1652_v13, %v1564_v3 }
 0x2e0   :  { %v1477_v20 = vadd.f32 %v1476_v52, %v1388_v63 }
 0x2e1   :  { %1722 = vst [vmem:[#allocation10 + $0x168] sm:$0xff] %v1653_v19 }
 0x2e2   :  { %1723 = vst [vmem:[#allocation10 + $0x170] sm:$0xff] %v1477_v20 }
 0x2e4   :  { %v1565_v25 = vpop.f32.mrf.mxu2  ;;  %v1654_v7 = vpop.f32.mrf.mxu3 }
 0x2e5   :  { %v1566_v33 = vadd.f32 %v1565_v25, %v2798_v10  ;;  %v1390_v16 = vpop.f32.mrf.mxu0  ;;  %v1479_v42 = vpop.f32.mrf.mxu1 }
 0x2e6   :  { %v1391_v39 = vadd.f32 %v1390_v16, %v2773_v50 }
 0x2e7   :  { %v1655_v17 = vadd.f32 %v1654_v7, %v1566_v33 }
 0x2e8   :  { %v1480_v30 = vadd.f32 %v1479_v42, %v1391_v39 }
 0x2e9   :  { %1724 = vst [vmem:[#allocation10 + $0x178] sm:$0xff] %v1655_v17 }
 0x2ea   :  { %1725 = vst [vmem:[#allocation10 + $0x180] sm:$0xff] %v1480_v30 }
 0x2ec   :  { %v1568_v23 = vpop.f32.mrf.mxu2  ;;  %v1657_v6 = vpop.f32.mrf.mxu3 }
 0x2ed   :  { %v1569_v38 = vadd.f32 %v1568_v23, %v2798_v10  ;;  %v1392_v28 = vpop.f32.mrf.mxu0  ;;  %v1481_v61 = vpop.f32.mrf.mxu1 }
 0x2ee   :  { %v1393_v24 = vadd.f32 %v1392_v28, %v2773_v50 }
 0x2ef   :  { %v1658_v8 = vadd.f32 %v1657_v6, %v1569_v38 }
 0x2f0   :  { %v1482_v1 = vadd.f32 %v1481_v61, %v1393_v24 }
 0x2f1   :  { %1726 = vst [vmem:[#allocation10 + $0x188] sm:$0xff] %v1658_v8 }
 0x2f2   :  { %1727 = vst [vmem:[#allocation10 + $0x190] sm:$0xff] %v1482_v1 }
 0x2f4   :  { %v1570_v41 = vpop.f32.mrf.mxu2  ;;  %v1659_v35 = vpop.f32.mrf.mxu3 }
 0x2f5   :  { %v1571_v58 = vadd.f32 %v1570_v41, %v2798_v10  ;;  %v1395_v0 = vpop.f32.mrf.mxu0  ;;  %v1484_v14 = vpop.f32.mrf.mxu1 }
 0x2f6   :  { %v1396_v44 = vadd.f32 %v1395_v0, %v2773_v50 }
 0x2f7   :  { %v1660_v49 = vadd.f32 %v1659_v35, %v1571_v58 }
 0x2f8   :  { %v1485_v60 = vadd.f32 %v1484_v14, %v1396_v44 }
 0x2f9   :  { %1728 = vst [vmem:[#allocation10 + $0x198] sm:$0xff] %v1660_v49 }
 0x2fa   :  { %1729 = vst [vmem:[#allocation10 + $0x1a0] sm:$0xff] %v1485_v60 }
 0x2fc   :  { %v1573_v45 = vpop.f32.mrf.mxu2  ;;  %v1662_v59 = vpop.f32.mrf.mxu3 }
 0x2fd   :  { %v1574_v21 = vadd.f32 %v1573_v45, %v2798_v10  ;;  %v1397_v37 = vpop.f32.mrf.mxu0  ;;  %v1486_v54 = vpop.f32.mrf.mxu1 }
 0x2fe   :  { %v1398_v40 = vadd.f32 %v1397_v37, %v2773_v50 }
 0x2ff   :  { %v1663_v9 = vadd.f32 %v1662_v59, %v1574_v21 }
 0x300   :  { %v1487_v4 = vadd.f32 %v1486_v54, %v1398_v40 }
 0x301   :  { %1730 = vst [vmem:[#allocation10 + $0x1a8] sm:$0xff] %v1663_v9 }
 0x302   :  { %1731 = vst [vmem:[#allocation10 + $0x1b0] sm:$0xff] %v1487_v4 }
 0x304   :  { %v1575_v57 = vpop.f32.mrf.mxu2  ;;  %v1664_v53 = vpop.f32.mrf.mxu3 }
 0x305   :  { %v1576_v12 = vadd.f32 %v1575_v57, %v2798_v10 }
 0x307   :  { %v1665_v15 = vadd.f32 %v1664_v53, %v1576_v12 }
 0x309   :  { %1732 = vst [vmem:[#allocation10 + $0x1b8] sm:$0xff] %v1665_v15 }
 0x342   :  { %v1400_v18 = vpop.f32.mrf.mxu0 }
 0x343   :  { %v1401_v22 = vadd.f32 %v1400_v18, %v2773_v50  ;;  %v1489_v51 = vpop.f32.mrf.mxu1 }
 0x345   :  { %v1490_v56 = vadd.f32 %v1489_v51, %v1401_v22 }
 0x347   :  { %1733 = vst [vmem:[#allocation10 + $0x1c0] sm:$0xff] %v1490_v56 }
 0x348   :  { %v1578_v32 = vpop.f32.mrf.mxu2 }
 0x349   :  { %v1579_v29 = vadd.f32 %v1578_v32, %v2798_v10  ;;  %v1667_v11 = vpop.f32.mrf.mxu3 }
 0x34a   :  { %v1402_v34 = vpop.f32.mrf.mxu0 }
 0x34b   :  { %v1668_v27 = vadd.f32 %v1667_v11, %v1579_v29  ;;  %v1403_v62 = vadd.f32 %v1402_v34, %v2773_v50  ;;  %v1491_v5 = vpop.f32.mrf.mxu1 }
 0x34d   :  { %1734 = vst [vmem:[#allocation10 + $0x1c8] sm:$0xff] %v1668_v27  ;;  %v1492_v55 = vadd.f32 %v1491_v5, %v1403_v62 }
 0x34f   :  { %1735 = vst [vmem:[#allocation10 + $0x1d0] sm:$0xff] %v1492_v55 }
 0x350   :  { %v1580_v48 = vpop.f32.mrf.mxu2 }
 0x351   :  { %v1581_v26 = vadd.f32 %v1580_v48, %v2798_v10  ;;  %v1669_v2 = vpop.f32.mrf.mxu3 }
 0x353   :  { %v1670_v43 = vadd.f32 %v1669_v2, %v1581_v26 }
 0x355   :  { %1736 = vst [vmem:[#allocation10 + $0x1d8] sm:$0xff] %v1670_v43 }
 0x357   :  { %v1405_v47 = vpop.f32.mrf.mxu0  ;;  %v1494_v31 = vpop.f32.mrf.mxu1 }
 0x358   :  { %v1406_v46 = vadd.f32 %v1405_v47, %v2773_v50 }
 0x35a   :  { %v1495_v3 = vadd.f32 %v1494_v31, %v1406_v46 }
 0x35c   :  { %1737 = vst [vmem:[#allocation10 + $0x1e0] sm:$0xff] %v1495_v3 }
 0x35e   :  { %v1583_v13 = vpop.f32.mrf.mxu2  ;;  %v1672_v36 = vpop.f32.mrf.mxu3 }
 0x35f   :  { %v1584_v63 = vadd.f32 %v1583_v13, %v2798_v10  ;;  %v1407_v52 = vpop.f32.mrf.mxu0  ;;  %v1496_v25 = vpop.f32.mrf.mxu1 }
 0x360   :  { %v1408_v19 = vadd.f32 %v1407_v52, %v2773_v50 }
 0x361   :  { %v1673_v20 = vadd.f32 %v1672_v36, %v1584_v63 }
 0x362   :  { %v1497_v33 = vadd.f32 %v1496_v25, %v1408_v19 }
 0x363   :  { %1738 = vst [vmem:[#allocation10 + $0x1e8] sm:$0xff] %v1673_v20 }
 0x364   :  { %1739 = vst [vmem:[#allocation10 + $0x1f0] sm:$0xff] %v1497_v33 }
 0x366   :  { %v1585_v7 = vpop.f32.mrf.mxu2  ;;  %v1674_v39 = vpop.f32.mrf.mxu3 }
 0x367   :  { %v1586_v16 = vadd.f32 %v1585_v7, %v2798_v10 }
 0x369   :  { %v1675_v42 = vadd.f32 %v1674_v39, %v1586_v16 }
 0x36b   :  { %1740 = vst [vmem:[#allocation10 + $0x1f8] sm:$0xff] %v1675_v42 }
 0x36c   :  { %1753 = dma.vmem_to_hbm [thread:$0]  %s1746_s15, 8192, %s1748_s18, [#allocation4], %s2128_s28, %s2128_s28, %s2129_s29  }
 0x36d   :  { %2124 = dma.done.wait [#allocation4], 8192  }
 0x36e   :  { %2125 = vsyncadd [#allocation4], 4294959104 }
 0x36f   :  { %1758 = vsyncpa [#allocation3], 1 }
 0x370   :  { %1759 = vsyncpa [#allocation6], 1 }
 0x371   :  { %1760 = vsyncpa [#allocation9], 1 }
 0x372   :  { %1761 = vsyncpa [#allocation4], 1 }

// kernel: tpu_custom_call.1
= control target key start
LH: loop header
LB: loop body
LE: loop exit
PB: predicated region body
PF: predicated region fallthrough
CT: control target
= control target key end

     0   :  { %10 = vsyncpa [#allocation3], 0  ;;  %s3376_s0 = inlined_call_operand.hbm [shape: f32[256,256], index: 0, kind: input, shape index: {}]   ;;  %s3377_s1 = inlined_call_operand.hbm [shape: f32[1,256], index: 1, kind: input, shape index: {}]   ;;  %s3378_s2 = inlined_call_operand.hbm [shape: f32[1,256], index: 2, kind: input, shape index: {}]   ;;  %s3379_s3 = inlined_call_operand.hbm [shape: bf16[256,256], index: 3, kind: input, shape index: {}]   ;;  %s3380_s4 = inlined_call_operand.vmem [shape: f32[1,256], index: 4, kind: input, shape index: {}]   ;;  %s3381_s5 = inlined_call_operand.hbm [shape: f32[256,256], index: 5, kind: output, shape index: {}]  }
   0x1   :  { %11 = vsyncpa [#allocation6], 0 }
   0x2   :  { %12 = vsyncpa [#allocation9], 0  ;;  %s32_s20 = sshll.u32 %s3377_s1, 4  ;;  %s33_s20 = int_to_ptr.hbm [resolvable:$true] %s32_s20 }
   0x3   :  { %13 = vsyncpa [#allocation4], 0  ;;  %s2126_s21 = smov [#allocation5]   ;;  %s18_s25 = sshll.u32 %s3376_s0, 4  ;;  %s19_s25 = int_to_ptr.hbm [resolvable:$true] %s18_s25 }
   0x4   :  { %s34_s22 = sshll.u32 %s2126_s21, 4  ;;  %s2127_s26 = smov [#allocation2]   ;;  %s35_s22 = int_to_ptr.vmem [resolvable:$true] %s34_s22 }
   0x5   :  { %37 = dma.hbm_to_vmem [thread:$0]  %s33_s20, 32, %s35_s22, [#allocation6]  }
   0x6   :  { %s20_s27 = sshll.u32 %s2127_s26, 4  ;;  %s2128_s28 = smov 256   ;;  %s21_s27 = int_to_ptr.vmem [resolvable:$true] %s20_s27 }
   0x7   :  { %s2129_s29 = smov 16   ;;  %s43_s6 = sshll.u32 %s3378_s2, 4  ;;  %s44_s6 = int_to_ptr.hbm [resolvable:$true] %s43_s6 }
   0x8   :  { %26 = dma.hbm_to_vmem [thread:$0]  %s19_s25, 8192, %s21_s27, [#allocation3], %s2128_s28, %s2128_s28, %s2129_s29  }
   0x9   :  { %s2130_s7 = smov [#allocation7]   ;;  %s53_s10 = sshll.u32 %s3379_s3, 4  ;;  %s54_s10 = int_to_ptr.hbm [resolvable:$true] %s53_s10 }
   0xa   :  { %s45_s8 = sshll.u32 %s2130_s7, 4  ;;  %s2131_s11 = smov [#allocation8]   ;;  %s46_s8 = int_to_ptr.vmem [resolvable:$true] %s45_s8 }
   0xb   :  { %48 = dma.hbm_to_vmem [thread:$0]  %s44_s6, 32, %s46_s8, [#allocation6]  }
   0xc   :  { %s55_s12 = sshll.u32 %s2131_s11, 4  ;;  %s2132_s13 = smov 128   ;;  %s56_s12 = int_to_ptr.vmem [resolvable:$true] %s55_s12 }
   0xd   :  { %s2133_s14 = smov 8  }
   0xe   :  { %61 = dma.hbm_to_vmem [thread:$0]  %s54_s10, 4096, %s56_s12, [#allocation9], %s2132_s13, %s2132_s13, %s2133_s14  }
   0xf   :  { %2118 = dma.done.wait [#allocation3], 8192  }
  0x10   :  { %2119 = vsyncadd [#allocation3], 4294959104 }
  0x11   :  { %2120 = dma.done.wait [#allocation6], 64  }
  0x12   :  { %2121 = vsyncadd [#allocation6], 4294967232 }
  0x13   :  { %2122 = dma.done.wait [#allocation9], 4096  }
  0x14   :  { %2123 = vsyncadd [#allocation9], 4294963200  ;;  %v2181_v0 = vld [vmem:[#allocation2 + $0x20] sm:$0xff]  ;;  %v2183_v1 = vld [vmem:[#allocation2 + $0x28] sm:$0xff]  ;;  %v2134_v27 = vmov 256.0   ;;  %s1747_s18 = sshll.u32 %s3381_s5, 4  ;;  %s1748_s18 = int_to_ptr.hbm [resolvable:$true] %s1747_s18 }
  0x15   :  { %v80_v2 = vld [vmem:[#allocation2] sm:$0xff]  ;;  %v150_v3 = vadd.f32 %v2183_v1, %v2181_v0  ;;  %v81_v4 = vld [vmem:[#allocation2 + $0x8] sm:$0xff]  ;;  %v86_v8 = vld [vmem:[#allocation2 + $0x30] sm:$0xff]  ;;  %1932 = vrcp.f32 %v2134_v27 }
  0x16   :  { %v144_v5 = vadd.f32 %v81_v4, %v80_v2  ;;  %v88_v6 = vld [vmem:[#allocation2 + $0x40] sm:$0xff]  ;;  %v89_v7 = vld [vmem:[#allocation2 + $0x48] sm:$0xff]  ;;  %v87_v9 = vld [vmem:[#allocation2 + $0x38] sm:$0xff] }
  0x17   :  { %151 = vadd.xlane.f32.xlu1 %v150_v3  ;;  %v156_v10 = vadd.f32 %v89_v7, %v88_v6  ;;  %v82_v11 = vld [vmem:[#allocation2 + $0x10] sm:$0xff]  ;;  %v83_v12 = vld [vmem:[#allocation2 + $0x18] sm:$0xff]  ;;  %v153_v13 = vadd.f32 %v87_v9, %v86_v8  ;;  %v2197_v20 = vld [vmem:[#allocation2 + $0x60] sm:$0xff] }
  0x18   :  { %145 = vadd.xlane.f32.xlu0 %v144_v5  ;;  %v2187_v14 = vld [vmem:[#allocation2 + $0x50] sm:$0xff]  ;;  %v2189_v15 = vld [vmem:[#allocation2 + $0x58] sm:$0xff]  ;;  %v147_v16 = vadd.f32 %v83_v12, %v82_v11  ;;  %v2199_v21 = vld [vmem:[#allocation2 + $0x68] sm:$0xff] }
  0x19   :  { %157 = vadd.xlane.f32.xlu2 %v156_v10  ;;  %v159_v17 = vadd.f32 %v2189_v15, %v2187_v14  ;;  %v2193_v18 = vld [vmem:[#allocation2 + $0x70] sm:$0xff]  ;;  %v2195_v19 = vld [vmem:[#allocation2 + $0x78] sm:$0xff]  ;;  %v162_v23 = vadd.f32 %v2199_v21, %v2197_v20  ;;  %v2205_v24 = vld [vmem:[#allocation2 + $0x80] sm:$0xff] }
  0x1a   :  { %v165_v22 = vadd.f32 %v2195_v19, %v2193_v18  ;;  %v2207_v25 = vld [vmem:[#allocation2 + $0x88] sm:$0xff]  ;;  %v2224_v47 = vld [vmem:[#allocation2 + $0x90] sm:$0xff]  ;;  %v2226_v48 = vld [vmem:[#allocation2 + $0x98] sm:$0xff] }
  0x1b   :  { %v168_v26 = vadd.f32 %v2207_v25, %v2205_v24  ;;  %v1933_v28 = vpop.eup %1932  ;;  %v171_v55 = vadd.f32 %v2226_v48, %v2224_v47  ;;  %v2288_v27 = vld [vmem:[#allocation2 + $0xb0] sm:$0xff] }
  0x1c   :  { %v241_v29 = vmul.f32 256.0, %v1933_v28  ;;  %vm245_vm0 = vweird.f32 %v1933_v28 }
  0x1e   :  { %v242_v30 = vsub.f32 1.0, %v241_v29 }
  0x1f   :  { %154 = vadd.xlane.f32.xlu1 %v153_v13 }
  0x20   :  { %148 = vadd.xlane.f32.xlu0 %v147_v16  ;;  %v243_v31 = vmul.f32 %v1933_v28, %v242_v30 }
  0x21   :  { %160 = vadd.xlane.f32.xlu2 %v159_v17 }
  0x22   :  { %v244_v32 = vadd.f32 %v1933_v28, %v243_v31 }
  0x24   :  { %v2211_v33 = vsel %vm245_vm0, %v1933_v28, %v244_v32  ;;  %v2290_v28 = vld [vmem:[#allocation2 + $0xb8] sm:$0xff] }
  0x27   :  { %166 = vadd.xlane.f32.xlu1 %v165_v22 }
  0x28   :  { %163 = vadd.xlane.f32.xlu0 %v162_v23  ;;  %v2280_v23 = vld [vmem:[#allocation2 + $0xd0] sm:$0xff] }
  0x2f   :  { %169 = vadd.xlane.f32.xlu1 %v168_v26  ;;  %v2282_v26 = vld [vmem:[#allocation2 + $0xd8] sm:$0xff] }
  0x30   :  { %v183_v29 = vadd.f32 %v2282_v26, %v2280_v23 }
  0x8a   :  { %v152_v34 = vpop.xlane.xlu1 %151 }
  0x8b   :  { %v146_v35 = vpop.xlane.xlu0 %145  ;;  %v249_v49 = vmul.f32 %v2211_v33, %v152_v34 }
  0x8c   :  { %v247_v36 = vmul.f32 %v2211_v33, %v146_v35  ;;  %v158_v39 = vpop.xlane.xlu2 %157  ;;  %v177_v35 = vadd.f32 %v2290_v28, %v2288_v27 }
  0x8d   :  { %v251_v46 = vmul.f32 %v2211_v33, %v158_v39  ;;  %v2249_v60 = vsub.f32 %v2181_v0, %v249_v49  ;;  %v2252_v61 = vsub.f32 %v2183_v1, %v249_v49  ;;  %v2303_v39 = vld [vmem:[#allocation2 + $0xe0] sm:$0xff] }
  0x8e   :  { %v2214_v37 = vsub.f32 %v80_v2, %v247_v36  ;;  %v2216_v38 = vsub.f32 %v81_v4, %v247_v36 }
  0x8f   :  { %v2240_v56 = vsub.f32 %v88_v6, %v251_v46  ;;  %v2242_v57 = vsub.f32 %v89_v7, %v251_v46  ;;  %v347_v6 = vmul.f32 %v2249_v60, %v2249_v60  ;;  %v348_v7 = vmul.f32 %v2252_v61, %v2252_v61 }
  0x90   :  { %v343_v40 = vmul.f32 %v2214_v37, %v2214_v37  ;;  %v344_v41 = vmul.f32 %v2216_v38, %v2216_v38 }
  0x91   :  { %v351_v5 = vmul.f32 %v2240_v56, %v2240_v56  ;;  %v352_v0 = vmul.f32 %v2242_v57, %v2242_v57  ;;  %v413_v16 = vadd.f32 %v348_v7, %v347_v6  ;;  %v2352_v6 = vld [vmem:[#allocation2 + $0x110] sm:$0xff]  ;;  %v2354_v7 = vld [vmem:[#allocation2 + $0x118] sm:$0xff] }
  0x92   :  { %v155_v42 = vpop.xlane.xlu1 %154  ;;  %v407_v43 = vadd.f32 %v344_v41, %v343_v40  ;;  %v2305_v40 = vld [vmem:[#allocation2 + $0xe8] sm:$0xff]  ;;  %v2311_v41 = vld [vmem:[#allocation2 + $0xc0] sm:$0xff] }
  0x93   :  { %v250_v44 = vmul.f32 %v2211_v33, %v155_v42  ;;  %v149_v45 = vpop.xlane.xlu0 %148  ;;  %v419_v10 = vadd.f32 %v352_v0, %v351_v5  ;;  %v2313_v42 = vld [vmem:[#allocation2 + $0xc8] sm:$0xff]  ;;  %v2346_v0 = vld [vmem:[#allocation2 + $0x100] sm:$0xff] }
  0x94   :  { %v248_v50 = vmul.f32 %v2211_v33, %v149_v45  ;;  %408 = vadd.xlane.f32.xlu2 %v407_v43  ;;  %v161_v3 = vpop.xlane.xlu2 %160  ;;  %v186_v43 = vadd.f32 %v2305_v40, %v2303_v39  ;;  %v180_v46 = vadd.f32 %v2313_v42, %v2311_v41 }
  0x95   :  { %v2230_v51 = vsub.f32 %v86_v8, %v250_v44  ;;  %v2232_v52 = vsub.f32 %v87_v9, %v250_v44  ;;  %v252_v1 = vmul.f32 %v2211_v33, %v161_v3  ;;  %v2267_v8 = vld [vmem:[#allocation2 + $0xa0] sm:$0xff]  ;;  %v2269_v9 = vld [vmem:[#allocation2 + $0xa8] sm:$0xff] }
  0x96   :  { %v2234_v53 = vsub.f32 %v82_v11, %v248_v50  ;;  %v2236_v54 = vsub.f32 %v83_v12, %v248_v50  ;;  %v174_v13 = vadd.f32 %v2269_v9, %v2267_v8 }
  0x97   :  { %v349_v58 = vmul.f32 %v2230_v51, %v2230_v51  ;;  %v350_v59 = vmul.f32 %v2232_v52, %v2232_v52  ;;  %v2272_v11 = vsub.f32 %v2187_v14, %v252_v1  ;;  %v2275_v12 = vsub.f32 %v2189_v15, %v252_v1  ;;  %v2348_v1 = vld [vmem:[#allocation2 + $0x108] sm:$0xff] }
  0x98   :  { %v345_v62 = vmul.f32 %v2234_v53, %v2234_v53  ;;  %v346_v63 = vmul.f32 %v2236_v54, %v2236_v54 }
  0x99   :  { %v416_v2 = vadd.f32 %v350_v59, %v349_v58  ;;  %v353_v14 = vmul.f32 %v2272_v11, %v2272_v11  ;;  %v354_v15 = vmul.f32 %v2275_v12, %v2275_v12  ;;  %v2330_v59 = vld [vmem:[#allocation2 + $0xf0] sm:$0xff] }
  0x9a   :  { %v410_v4 = vadd.f32 %v346_v63, %v345_v62  ;;  %v167_v30 = vpop.xlane.xlu1 %166 }
  0x9b   :  { %417 = vadd.xlane.f32.xlu1 %v416_v2  ;;  %v164_v17 = vpop.xlane.xlu0 %163  ;;  %v422_v34 = vadd.f32 %v354_v15, %v353_v14  ;;  %v254_v36 = vmul.f32 %v2211_v33, %v167_v30  ;;  %v1905_v14 = vld [vmem:[#allocation8 + $0x74] sm:$0xf0]  ;;  %v1884_v15 = vld [vmem:[#allocation8 + $0xf0] sm:$0xf] }
  0x9c   :  { %172 = vadd.xlane.f32.xlu2 %v171_v55  ;;  %411 = vadd.xlane.f32.xlu0 %v410_v4  ;;  %v253_v22 = vmul.f32 %v2211_v33, %v164_v17  ;;  %v1921_v30 = vld [vmem:[#allocation8 + $0xf4] sm:$0xf0] }
  0x9d   :  { %v2318_v44 = vsub.f32 %v2193_v18, %v254_v36  ;;  %v2321_v45 = vsub.f32 %v2195_v19, %v254_v36  ;;  %v2332_v19 = vld [vmem:[#allocation2 + $0xf8] sm:$0xff]  ;;  %v1885_v36 = vor.u32 %v1921_v30, %v1884_v15 }
  0x9e   :  { %v2295_v31 = vsub.f32 %v2197_v20, %v253_v22  ;;  %v2298_v32 = vsub.f32 %v2199_v21, %v253_v22  ;;  %v189_v3 = vadd.f32 %v2332_v19, %v2330_v59  ;;  %v1820_v22 = vld [vmem:[#allocation8 + $0x70] sm:$0xf]  ;;  %v1900_v30 = vld [vmem:[#allocation8 + $0x54] sm:$0xf] }
  0x9f   :  { %v357_v58 = vmul.f32 %v2318_v44, %v2318_v44  ;;  %v358_v18 = vmul.f32 %v2321_v45, %v2321_v45  ;;  %1410 = vmatpush.bf16.msra.mxu1 %v1885_v36 }
  0xa0   :  { %v355_v20 = vmul.f32 %v2295_v31, %v2295_v31  ;;  %v356_v21 = vmul.f32 %v2298_v32, %v2298_v32 }
  0xa1   :  { %v428_v2 = vadd.f32 %v358_v18, %v357_v58  ;;  %v1919_v18 = vld [vmem:[#allocation8 + $0xe4] sm:$0xf0] }
  0xa2   :  { %v425_v49 = vadd.f32 %v356_v21, %v355_v20  ;;  %v170_v50 = vpop.xlane.xlu1 %169  ;;  %v1920_v21 = vld [vmem:[#allocation8 + $0xf4] sm:$0xf] }
  0xa3   :  { %420 = vadd.xlane.f32.xlu1 %v419_v10  ;;  %v255_v55 = vmul.f32 %v2211_v33, %v170_v50  ;;  %v195_v10 = vadd.f32 %v2354_v7, %v2352_v6  ;;  %v1903_v50 = vld [vmem:[#allocation8 + $0x64] sm:$0xf0] }
  0xa4   :  { %175 = vadd.xlane.f32.xlu2 %v174_v13  ;;  %414 = vadd.xlane.f32.xlu0 %v413_v16  ;;  %v2358_v13 = vld [vmem:[#allocation2 + $0x120] sm:$0xff]  ;;  %v2360_v16 = vld [vmem:[#allocation2 + $0x128] sm:$0xff] }
  0xa5   :  { %v2335_v62 = vsub.f32 %v2205_v24, %v255_v55  ;;  %v2338_v63 = vsub.f32 %v2207_v25, %v255_v55  ;;  %v192_v25 = vadd.f32 %v2348_v1, %v2346_v0  ;;  %v198_v17 = vadd.f32 %v2360_v16, %v2358_v13  ;;  %v1876_v55 = vld [vmem:[#allocation8 + $0xe0] sm:$0xf] }
  0xa7   :  { %3409 = vst [vmem:[#allocation15_spill] sm:$0xff] %v2335_v62  ;;  %v359_v4 = vmul.f32 %v2335_v62, %v2335_v62  ;;  %v360_v5 = vmul.f32 %v2338_v63, %v2338_v63 }
  0xa8   :  { %3410 = vst [vmem:[#allocation16_spill] sm:$0xff] %v2338_v63 }
  0xa9   :  { %v431_v24 = vadd.f32 %v360_v5, %v359_v4  ;;  %v1877_v4 = vor.u32 %v1919_v18, %v1876_v55  ;;  %v1898_v18 = vld [vmem:[#allocation8 + $0x44] sm:$0xf] }
  0xab   :  { %184 = vadd.xlane.f32.xlu1 %v183_v29  ;;  %v1821_v29 = vor.u32 %v1905_v14, %v1820_v22  ;;  %1411 = vmatpush.bf16.msra.mxu1 %v1877_v4  ;;  %v1901_v22 = vld [vmem:[#allocation8 + $0x54] sm:$0xf0]  ;;  %v1868_v14 = vld [vmem:[#allocation8 + $0xd0] sm:$0xf] }
  0xac   :  { %423 = vadd.xlane.f32.xlu2 %v422_v34  ;;  %178 = vadd.xlane.f32.xlu0 %v177_v35  ;;  %v1904_v34 = vld [vmem:[#allocation8 + $0x74] sm:$0xf]  ;;  %v1822_v35 = vld [vmem:[#allocation8 + $0x78] sm:$0xf0] }
  0xad   :  { %v1825_v20 = vor.u32 %v1904_v34, %v1822_v35  ;;  %1321 = vmatpush.bf16.msra.mxu0 %v1821_v29  ;;  %v1917_v29 = vld [vmem:[#allocation8 + $0xd4] sm:$0xf0]  ;;  %v1806_v34 = vld [vmem:[#allocation8 + $0x58] sm:$0xf0] }
  0xae   :  { %v1869_v35 = vor.u32 %v1917_v29, %v1868_v14  ;;  %v1809_v36 = vor.u32 %v1900_v30, %v1806_v34  ;;  %v1896_v29 = vld [vmem:[#allocation8 + $0x34] sm:$0xf]  ;;  %v1790_v30 = vld [vmem:[#allocation8 + $0x38] sm:$0xf0] }
  0xaf   :  { %1499 = vmatpush.bf16.msra.mxu2 %v1825_v20  ;;  %v1916_v20 = vld [vmem:[#allocation8 + $0xd4] sm:$0xf] }
  0xb0   :  { %1412 = vmatpush.bf16.msra.mxu1 %v1869_v35  ;;  %v1793_v35 = vor.u32 %v1896_v29, %v1790_v30  ;;  %v1892_v29 = vld [vmem:[#allocation8 + $0x14] sm:$0xf]  ;;  %v1774_v30 = vld [vmem:[#allocation8 + $0x18] sm:$0xf0] }
  0xb3   :  { %187 = vadd.xlane.f32.xlu1 %v186_v43  ;;  %v1886_v43 = vld [vmem:[#allocation8 + $0xf8] sm:$0xf0] }
  0xb4   :  { %181 = vadd.xlane.f32.xlu0 %v180_v46  ;;  %426 = vadd.xlane.f32.xlu2 %v425_v49  ;;  %v1889_v46 = vor.u32 %v1920_v21, %v1886_v43  ;;  %v1812_v49 = vld [vmem:[#allocation8 + $0x60] sm:$0xf]  ;;  %v1870_v21 = vld [vmem:[#allocation8 + $0xd8] sm:$0xf0] }
  0xb5   :  { %v1813_v58 = vor.u32 %v1903_v50, %v1812_v49  ;;  %v1873_v43 = vor.u32 %v1916_v20, %v1870_v21  ;;  %v1899_v49 = vld [vmem:[#allocation8 + $0x44] sm:$0xf0]  ;;  %v1860_v50 = vld [vmem:[#allocation8 + $0xc0] sm:$0xf]  ;;  %v1854_v20 = vld [vmem:[#allocation8 + $0xb8] sm:$0xf0] }
  0xb6   :  { %1588 = vmatpush.bf16.msra.mxu3 %v1889_v46  ;;  %v1796_v46 = vld [vmem:[#allocation8 + $0x40] sm:$0xf] }
  0xb7   :  { %1322 = vmatpush.bf16.msra.mxu0 %v1813_v58  ;;  %v1797_v55 = vor.u32 %v1899_v49, %v1796_v46  ;;  %v1915_v58 = vld [vmem:[#allocation8 + $0xc4] sm:$0xf0]  ;;  %v1844_v49 = vld [vmem:[#allocation8 + $0xa0] sm:$0xf] }
  0xb8   :  { %v1895_v46 = vld [vmem:[#allocation8 + $0x24] sm:$0xf0] }
  0xbc   :  { %429 = vadd.xlane.f32.xlu0 %v428_v2  ;;  %190 = vadd.xlane.f32.xlu2 %v189_v3  ;;  %v1902_v2 = vld [vmem:[#allocation8 + $0x64] sm:$0xf]  ;;  %v1814_v3 = vld [vmem:[#allocation8 + $0x68] sm:$0xf0] }
  0xbd   :  { %v1817_v5 = vor.u32 %v1902_v2, %v1814_v3  ;;  %v1798_v2 = vld [vmem:[#allocation8 + $0x48] sm:$0xf0]  ;;  %v1861_v3 = vor.u32 %v1915_v58, %v1860_v50  ;;  %v1894_v58 = vld [vmem:[#allocation8 + $0x24] sm:$0xf] }
  0xbe   :  { %v1801_v4 = vor.u32 %v1898_v18, %v1798_v2  ;;  %v1782_v18 = vld [vmem:[#allocation8 + $0x28] sm:$0xf0] }
  0xbf   :  { %1500 = vmatpush.bf16.msra.mxu2 %v1817_v5  ;;  %v1914_v5 = vld [vmem:[#allocation8 + $0xc4] sm:$0xf]  ;;  %1413 = vmatpush.bf16.msra.mxu1 %v1861_v3  ;;  %v1785_v3 = vor.u32 %v1894_v58, %v1782_v18  ;;  %v1828_v58 = vld [vmem:[#allocation8 + $0x80] sm:$0xf]  ;;  %v1907_v18 = vld [vmem:[#allocation8 + $0x84] sm:$0xf0] }
  0xc3   :  { %1501 = vmatpush.bf16.msra.mxu2 %v1809_v36  ;;  %v1912_v36 = vld [vmem:[#allocation8 + $0xb4] sm:$0xf] }
  0xc4   :  { %432 = vadd.xlane.f32.xlu0 %v431_v24  ;;  %193 = vadd.xlane.f32.xlu2 %v192_v25  ;;  %v1918_v24 = vld [vmem:[#allocation8 + $0xe4] sm:$0xf]  ;;  %v1878_v25 = vld [vmem:[#allocation8 + $0xe8] sm:$0xf0]  ;;  %v1857_v21 = vor.u32 %v1912_v36, %v1854_v20  ;;  %v1777_v36 = vor.u32 %v1892_v29, %v1774_v30  ;;  %v1908_v20 = vld [vmem:[#allocation8 + $0x94] sm:$0xf] }
  0xc7   :  { %1502 = vmatpush.bf16.msra.mxu2 %v1801_v4  ;;  %v1910_v4 = vld [vmem:[#allocation8 + $0xa4] sm:$0xf] }
  0xcb   :  { %1503 = vmatpush.bf16.msra.mxu2 %v1793_v35 }
  0xcc   :  { %196 = vadd.xlane.f32.xlu0 %v195_v10  ;;  %v1881_v10 = vor.u32 %v1918_v24, %v1878_v25  ;;  %v1862_v24 = vld [vmem:[#allocation8 + $0xc8] sm:$0xf0] }
  0xcd   :  { %v1865_v25 = vor.u32 %v1914_v5, %v1862_v24  ;;  %v1846_v5 = vld [vmem:[#allocation8 + $0xa8] sm:$0xf0] }
  0xce   :  { %1589 = vmatpush.bf16.msra.mxu3 %v1881_v10  ;;  %v1788_v10 = vld [vmem:[#allocation8 + $0x30] sm:$0xf]  ;;  %v1849_v24 = vor.u32 %v1910_v4, %v1846_v5  ;;  %v1766_v4 = vld [vmem:[#allocation8 + $0x8] sm:$0xf0]  ;;  %v1906_v5 = vld [vmem:[#allocation8 + $0x84] sm:$0xf] }
  0xcf   :  { %1504 = vmatpush.bf16.msra.mxu2 %v1785_v3  ;;  %v1829_v3 = vor.u32 %v1907_v18, %v1828_v58 }
  0xd2   :  { %1590 = vmatpush.bf16.msra.mxu3 %v1873_v43  ;;  %v1780_v43 = vld [vmem:[#allocation8 + $0x20] sm:$0xf] }
  0xd3   :  { %v1781_v50 = vor.u32 %v1895_v46, %v1780_v43  ;;  %1505 = vmatpush.bf16.msra.mxu2 %v1777_v36 }
  0xd4   :  { %199 = vadd.xlane.f32.xlu0 %v198_v17  ;;  %v1804_v17 = vld [vmem:[#allocation8 + $0x50] sm:$0xf] }
  0xd5   :  { %v1805_v15 = vor.u32 %v1901_v22, %v1804_v17  ;;  %v1897_v17 = vld [vmem:[#allocation8 + $0x34] sm:$0xf0]  ;;  %v1852_v22 = vld [vmem:[#allocation8 + $0xb0] sm:$0xf] }
  0xd6   :  { %1591 = vmatpush.bf16.msra.mxu3 %v1865_v25  ;;  %v1789_v14 = vor.u32 %v1897_v17, %v1788_v10  ;;  %v1772_v25 = vld [vmem:[#allocation8 + $0x10] sm:$0xf]  ;;  %v1893_v10 = vld [vmem:[#allocation8 + $0x14] sm:$0xf0] }
  0xd7   :  { %1323 = vmatpush.bf16.msra.mxu0 %v1805_v15  ;;  %v1913_v15 = vld [vmem:[#allocation8 + $0xb4] sm:$0xf0]  ;;  %v1836_v17 = vld [vmem:[#allocation8 + $0x90] sm:$0xf] }
  0xd8   :  { %v1853_v34 = vor.u32 %v1913_v15, %v1852_v22  ;;  %v1909_v15 = vld [vmem:[#allocation8 + $0x94] sm:$0xf0] }
  0xd9   :  { %v1837_v35 = vor.u32 %v1909_v15, %v1836_v17 }
  0xda   :  { %1414 = vmatpush.bf16.msra.mxu1 %v1853_v34  ;;  %1592 = vmatpush.bf16.msra.mxu3 %v1857_v21  ;;  %v1838_v21 = vld [vmem:[#allocation8 + $0x98] sm:$0xf0] }
  0xdb   :  { %1324 = vmatpush.bf16.msra.mxu0 %v1797_v55  ;;  %v1911_v55 = vld [vmem:[#allocation8 + $0xa4] sm:$0xf0]  ;;  %v1841_v43 = vor.u32 %v1908_v20, %v1838_v21 }
  0xdc   :  { %v1845_v2 = vor.u32 %v1911_v55, %v1844_v49  ;;  %v1764_v49 = vld [vmem:[#allocation8] sm:$0xf] }
  0xde   :  { %1415 = vmatpush.bf16.msra.mxu1 %v1845_v2  ;;  %1593 = vmatpush.bf16.msra.mxu3 %v1849_v24  ;;  %v1890_v2 = vld [vmem:[#allocation8 + $0x4] sm:$0xf]  ;;  %v1830_v24 = vld [vmem:[#allocation8 + $0x88] sm:$0xf0] }
  0xdf   :  { %1325 = vmatpush.bf16.msra.mxu0 %v1789_v14  ;;  %v1773_v14 = vor.u32 %v1893_v10, %v1772_v25  ;;  %v1769_v25 = vor.u32 %v1890_v2, %v1766_v4  ;;  %v1833_v10 = vor.u32 %v1906_v5, %v1830_v24 }
  0xe1   :  { %1506 = vmatpush.bf16.msra.mxu2 %v1769_v25 }
  0xe2   :  { %1416 = vmatpush.bf16.msra.mxu1 %v1837_v35  ;;  %1594 = vmatpush.bf16.msra.mxu3 %v1841_v43 }
  0xe3   :  { %1326 = vmatpush.bf16.msra.mxu0 %v1781_v50  ;;  %v1891_v50 = vld [vmem:[#allocation8 + $0x4] sm:$0xf0] }
  0xe4   :  { %v1765_v55 = vor.u32 %v1891_v50, %v1764_v49 }
  0xe6   :  { %1417 = vmatpush.bf16.msra.mxu1 %v1829_v3  ;;  %1595 = vmatpush.bf16.msra.mxu3 %v1833_v10 }
  0xe7   :  { %1327 = vmatpush.bf16.msra.mxu0 %v1773_v14 }
  0xeb   :  { %1328 = vmatpush.bf16.msra.mxu0 %v1765_v55 }
 0x107   :  { %v409_v22 = vpop.xlane.xlu2 %408 }
 0x108   :  { %v503_v34 = vmul.f32 %v409_v22, %v2211_v33 }
 0x10a   :  { %v2365_v46 = vadd.f32 1e-05, %v503_v34 }
 0x10c   :  { %1934 = vrsqrt.f32 %v2365_v46  ;;  %vm573_vm2 = vweird.f32 %v2365_v46 }
 0x10e   :  { %v418_v17 = vpop.xlane.xlu1 %417 }
 0x10f   :  { %v506_v22 = vmul.f32 %v418_v17, %v2211_v33  ;;  %v173_v14 = vpop.xlane.xlu2 %172  ;;  %v412_v15 = vpop.xlane.xlu0 %411  ;;  %v951_v17 = vld [vmem:[#allocation5] sm:$0x3] }
 0x110   :  { %v256_v29 = vmul.f32 %v2211_v33, %v173_v14  ;;  %v504_v30 = vmul.f32 %v412_v15, %v2211_v33 }
 0x111   :  { %v2371_v34 = vadd.f32 1e-05, %v506_v22 }
 0x112   :  { %v1935_v35 = vpop.eup %1934  ;;  %v2374_v36 = vsub.f32 %v2224_v47, %v256_v29  ;;  %v2377_v20 = vsub.f32 %v2226_v48, %v256_v29  ;;  %v2379_v21 = vadd.f32 1e-05, %v504_v30 }
 0x113   :  { %v568_v43 = vmul.f32 %v1935_v35, %v2365_v46  ;;  %1936 = vrsqrt.f32 %v2371_v34  ;;  %vm574_vm1 = vweird.f32 %v1935_v35  ;;  %v2426_v46 = vperm.slane %v951_v17, 1 }
 0x114   :  { %3411 = vst [vmem:[#allocation17_spill] sm:$0xff] %v2374_v36  ;;  %1938 = vrsqrt.f32 %v2379_v21  ;;  %v361_v49 = vmul.f32 %v2374_v36, %v2374_v36  ;;  %v362_v50 = vmul.f32 %v2377_v20, %v2377_v20  ;;  %vm575_vm3 = vmor %vm573_vm2, %vm574_vm1  ;;  %vm583_vm4 = vweird.f32 %v2379_v21 }
 0x115   :  { %3412 = vst [vmem:[#allocation18_spill] sm:$0xff] %v2377_v20  ;;  %v569_v55 = vmul.f32 %v1935_v35, %v568_v43  ;;  %vm603_vm5 = vweird.f32 %v2371_v34 }
 0x116   :  { %v421_v47 = vpop.xlane.xlu1 %420  ;;  %v434_v58 = vadd.f32 %v362_v50, %v361_v49  ;;  %v1021_v49 = vld [vmem:[#allocation7] sm:$0x3] }
 0x117   :  { %v570_v18 = vmul.f32 0.5, %v569_v55  ;;  %v507_v48 = vmul.f32 %v421_v47, %v2211_v33  ;;  %v176_v2 = vpop.xlane.xlu2 %175  ;;  %v415_v3 = vpop.xlane.xlu0 %414  ;;  %v2411_v47 = vperm.slane %v951_v17, 0  ;;  %v2433_v63 = vperm.slane %v1021_v49, 1 }
 0x118   :  { %v257_v4 = vmul.f32 %v2211_v33, %v176_v2  ;;  %v505_v5 = vmul.f32 %v415_v3, %v2211_v33  ;;  %435 = vadd.xlane.f32.xlu1 %v434_v58  ;;  %v2418_v58 = vld [vmem:[#allocation2 + $0x130] sm:$0xff]  ;;  %v2424_v3 = vperm.slane %v1021_v49, 0 }
 0x119   :  { %v2391_v24 = vpop.eup %1936  ;;  %v571_v25 = vsub.f32 1.5, %v570_v18  ;;  %v2393_v10 = vadd.f32 1e-05, %v507_v48  ;;  %v2420_v18 = vld [vmem:[#allocation2 + $0x138] sm:$0xff] }
 0x11a   :  { %v2395_v22 = vpop.eup %1938  ;;  %v598_v14 = vmul.f32 %v2391_v24, %v2371_v34  ;;  %v2400_v15 = vsub.f32 %v2267_v8, %v257_v4  ;;  %v2403_v29 = vsub.f32 %v2269_v9, %v257_v4  ;;  %v2407_v50 = vadd.f32 1e-05, %v505_v5  ;;  %3415 = vst [vmem:[#allocation21_spill] sm:$0xff] %v2420_v18 }
 0x11b   :  { %v572_v30 = vmul.f32 %v1935_v35, %v571_v25  ;;  %v578_v43 = vmul.f32 %v2395_v22, %v2379_v21  ;;  %1940 = vrsqrt.f32 %v2393_v10  ;;  %vm584_vm6 = vweird.f32 %v2395_v22 }
 0x11c   :  { %3413 = vst [vmem:[#allocation19_spill] sm:$0xff] %v2400_v15  ;;  %v363_v55 = vmul.f32 %v2400_v15, %v2400_v15  ;;  %v364_v9 = vmul.f32 %v2403_v29, %v2403_v29  ;;  %v599_v48 = vmul.f32 %v2391_v24, %v598_v14  ;;  %1942 = vrsqrt.f32 %v2407_v50  ;;  %vm585_vm8 = vmor %vm583_vm4, %vm584_vm6 }
 0x11d   :  { %3414 = vst [vmem:[#allocation20_spill] sm:$0xff] %v2403_v29  ;;  %v579_v8 = vmul.f32 %v2395_v22, %v578_v43  ;;  %v576_v15 = vsel %vm575_vm3, %v1935_v35, %v572_v30  ;;  %v201_v14 = vadd.f32 %v2420_v18, %v2418_v58  ;;  %v2442_v35 = vld [vmem:[#allocation2 + $0x140] sm:$0xff]  ;;  %v2444_v30 = vld [vmem:[#allocation2 + $0x148] sm:$0xff]  ;;  %vm604_vm7 = vweird.f32 %v2391_v24 }
 0x11e   :  { %v185_v2 = vpop.xlane.xlu1 %184  ;;  %v437_v29 = vadd.f32 %v364_v9, %v363_v55  ;;  %3418 = vst [vmem:[#allocation24_spill] sm:$0xff] %v2442_v35  ;;  %v600_v55 = vmul.f32 0.5, %v599_v48  ;;  %v887_v9 = vmul.f32 %v576_v15, %v2214_v37  ;;  %v888_v37 = vmul.f32 %v576_v15, %v2216_v38  ;;  %vm2513_vm11 = vmor %vm603_vm5, %vm604_vm7 }
 0x11f   :  { %v580_v4 = vmul.f32 0.5, %v579_v8  ;;  %v260_v5 = vmul.f32 %v2211_v33, %v185_v2  ;;  %v424_v25 = vpop.xlane.xlu2 %423  ;;  %v179_v43 = vpop.xlane.xlu0 %178  ;;  %3419 = vst [vmem:[#allocation25_spill] sm:$0xff] %v2444_v30  ;;  %vm593_vm10 = vweird.f32 %v2407_v50  ;;  %vm613_vm15 = vweird.f32 %v2393_v10 }
 0x120   :  { %v508_v20 = vmul.f32 %v424_v25, %v2211_v33  ;;  %v258_v36 = vmul.f32 %v2211_v33, %v179_v43  ;;  %438 = vadd.xlane.f32.xlu1 %v437_v29  ;;  %v957_v15 = vmul.f32 %v2411_v47, %v887_v9 }
 0x121   :  { %v581_v62 = vsub.f32 1.5, %v580_v4  ;;  %v2437_v17 = vsub.f32 %v2280_v23, %v260_v5  ;;  %v2440_v8 = vsub.f32 %v2282_v26, %v260_v5  ;;  %v2451_v2 = vpop.eup %1940  ;;  %v601_v5 = vsub.f32 1.5, %v600_v55 }
 0x122   :  { %v2448_v49 = vadd.f32 1e-05, %v508_v20  ;;  %v2455_v26 = vsub.f32 %v2288_v27, %v258_v36  ;;  %v2458_v29 = vsub.f32 %v2290_v28, %v258_v36  ;;  %v1943_v4 = vpop.eup %1942  ;;  %vm614_vm0 = vweird.f32 %v2451_v2 }
 0x123   :  { %3416 = vst [vmem:[#allocation22_spill] sm:$0xff] %v2437_v17  ;;  %v582_v23 = vmul.f32 %v2395_v22, %v581_v62  ;;  %v369_v48 = vmul.f32 %v2437_v17, %v2437_v17  ;;  %v370_v20 = vmul.f32 %v2440_v8, %v2440_v8  ;;  %v204_v62 = vadd.f32 %v2444_v30, %v2442_v35  ;;  %vm615_vm2 = vmor %vm613_vm15, %vm614_vm0 }
 0x124   :  { %3417 = vst [vmem:[#allocation23_spill] sm:$0xff] %v2440_v8  ;;  %1944 = vrsqrt.f32 %v2448_v49  ;;  %v588_v27 = vmul.f32 %v1943_v4, %v2407_v50  ;;  %v365_v28 = vmul.f32 %v2455_v26, %v2455_v26  ;;  %v366_v36 = vmul.f32 %v2458_v29, %v2458_v29 }
 0x125   :  { %3420 = vst [vmem:[#allocation26_spill] sm:$0xff] %v2455_v26  ;;  %v446_v43 = vadd.f32 %v370_v20, %v369_v48  ;;  %v586_v38 = vsel %vm585_vm8, %v2395_v22, %v582_v23  ;;  %v608_v26 = vmul.f32 %v2451_v2, %v2393_v10  ;;  %v958_v22 = vmul.f32 %v2426_v46, %v888_v37 }
 0x126   :  { %3421 = vst [vmem:[#allocation27_spill] sm:$0xff] %v2458_v29  ;;  %v188_v25 = vpop.xlane.xlu1 %187  ;;  %v589_v8 = vmul.f32 %v1943_v4, %v588_v27  ;;  %v440_v35 = vadd.f32 %v366_v36, %v365_v28  ;;  %v889_v18 = vmul.f32 %v586_v38, %v2234_v53  ;;  %v890_v55 = vmul.f32 %v586_v38, %v2236_v54 }
 0x127   :  { %v261_v17 = vmul.f32 %v2211_v33, %v188_v25  ;;  %v427_v21 = vpop.xlane.xlu2 %426  ;;  %v182_v30 = vpop.xlane.xlu0 %181  ;;  %447 = vadd.xlane.f32.xlu0 %v446_v43  ;;  %vm594_vm9 = vweird.f32 %v1943_v4  ;;  %v609_v25 = vmul.f32 %v2451_v2, %v608_v26  ;;  %vm623_vm13 = vweird.f32 %v2448_v49 }
 0x128   :  { %v259_v29 = vmul.f32 %v2211_v33, %v182_v30  ;;  %v590_v23 = vmul.f32 0.5, %v589_v8  ;;  %202 = vadd.xlane.f32.xlu1 %v201_v14  ;;  %441 = vadd.xlane.f32.xlu2 %v440_v35  ;;  %v959_v48 = vmul.f32 %v2411_v47, %v889_v18  ;;  %v1027_v8 = vadd.f32 %v2424_v3, %v957_v15  ;;  %vm595_vm12 = vmor %vm593_vm10, %vm594_vm9 }
 0x129   :  { %v2486_v9 = vsub.f32 %v2303_v39, %v261_v17  ;;  %v2492_v20 = vsub.f32 %v2305_v40, %v261_v17  ;;  %v509_v14 = vmul.f32 %v427_v21, %v2211_v33  ;;  %v602_v35 = vmul.f32 %v2391_v24, %v601_v5 }
 0x12a   :  { %v2489_v53 = vpop.eup %1944  ;;  %v2495_v30 = vsub.f32 %v2311_v41, %v259_v29  ;;  %v2498_v54 = vsub.f32 %v2313_v42, %v259_v29  ;;  %v591_v37 = vsub.f32 1.5, %v590_v23  ;;  %v1029_v18 = vadd.f32 %v2424_v3, %v959_v48 }
 0x12b   :  { %v618_v39 = vmul.f32 %v2489_v53, %v2448_v49  ;;  %v960_v40 = vmul.f32 %v2426_v46, %v890_v55  ;;  %v1028_v41 = vadd.f32 %v2433_v63, %v958_v22  ;;  %v371_v28 = vmul.f32 %v2486_v9, %v2486_v9 }
 0x12c   :  { %v592_v17 = vmul.f32 %v1943_v4, %v591_v37  ;;  %v1091_v27 = vpack.c.bf16 %v1029_v18, %v1027_v8  ;;  %v372_v36 = vmul.f32 %v2492_v20, %v2492_v20  ;;  %v367_v34 = vmul.f32 %v2495_v30, %v2495_v30 }
 0x12d   :  { %v619_v29 = vmul.f32 %v2489_v53, %v618_v39  ;;  %v1030_v50 = vadd.f32 %v2433_v63, %v960_v40  ;;  %v368_v5 = vmul.f32 %v2498_v54, %v2498_v54  ;;  %v2529_v43 = vadd.f32 1e-05, %v509_v14  ;;  %v2556_v40 = vld [vmem:[#allocation2 + $0x150] sm:$0xff] }
 0x12e   :  { %1329 = vmatmul.bf16.vlgmr.msra.gmra.mxu0 %v1091_v27  ;;  %1507 = vmatmul.bf16.vlgmr.msra.gmra.mxu2 %v1091_v27  ;;  %v596_v21 = vsel %vm595_vm12, %v1943_v4, %v592_v17  ;;  %v449_v48 = vadd.f32 %v372_v36, %v371_v28  ;;  %v606_v37 = vsel %vm2513_vm11, %v2391_v24, %v602_v35  ;;  %v2550_v35 = vld [vmem:[#allocation2 + $0x178] sm:$0xff]  ;;  %vm624_vm14 = vweird.f32 %v2489_v53 }
 0x12f   :  { %v191_v38 = vpop.xlane.xlu2 %190  ;;  %v430_v15 = vpop.xlane.xlu0 %429  ;;  %v1092_v55 = vpack.c.bf16 %v1030_v50, %v1028_v41  ;;  %v443_v8 = vadd.f32 %v368_v5, %v367_v34  ;;  %v891_v26 = vmul.f32 %v596_v21, %v2249_v60  ;;  %v620_v39 = vmul.f32 0.5, %v619_v29  ;;  %v2558_v41 = vld [vmem:[#allocation2 + $0x158] sm:$0xff]  ;;  %vm2591_vm1 = vmor %vm623_vm13, %vm624_vm14 }
 0x130   :  { %v262_v22 = vmul.f32 %v2211_v33, %v191_v38  ;;  %v510_v23 = vmul.f32 %v430_v15, %v2211_v33  ;;  %205 = vadd.xlane.f32.xlu1 %v204_v62  ;;  %1946 = vrsqrt.f32 %v2529_v43  ;;  %450 = vadd.xlane.f32.xlu0 %v449_v48  ;;  %v2546_v62 = vld [vmem:[#allocation2 + $0x170] sm:$0xff]  ;;  %v893_v24 = vmul.f32 %v606_v37, %v2230_v51 }
 0x131   :  { %1418 = vmatmul.bf16.vlgmr.msra.gmra.mxu1 %v1092_v55  ;;  %1596 = vmatmul.bf16.vlgmr.msra.gmra.mxu3 %v1092_v55  ;;  %v610_v60 = vmul.f32 0.5, %v609_v25  ;;  %v961_v42 = vmul.f32 %v2411_v47, %v891_v26  ;;  %v892_v17 = vmul.f32 %v596_v21, %v2252_v61  ;;  %v621_v51 = vsub.f32 1.5, %v620_v39 }
 0x132   :  { %v2538_v14 = vsub.f32 %v2330_v59, %v262_v22  ;;  %v2541_v4 = vsub.f32 %v2332_v19, %v262_v22  ;;  %v2543_v18 = vadd.f32 1e-05, %v510_v23  ;;  %444 = vadd.xlane.f32.xlu2 %v443_v8  ;;  %v894_v27 = vmul.f32 %v606_v37, %v2232_v52  ;;  %v2637_v8 = vld [vmem:[#allocation2 + $0x190] sm:$0xff] }
 0x133   :  { %v213_v36 = vadd.f32 %v2550_v35, %v2546_v62  ;;  %v207_v34 = vadd.f32 %v2558_v41, %v2556_v40  ;;  %v963_v5 = vmul.f32 %v2411_v47, %v893_v24  ;;  %v611_v25 = vsub.f32 1.5, %v610_v60  ;;  %v2604_v24 = vld [vmem:[#allocation2 + $0x188] sm:$0xff] }
 0x134   :  { %1948 = vrsqrt.f32 %v2543_v18  ;;  %v373_v59 = vmul.f32 %v2538_v14, %v2538_v14  ;;  %v374_v19 = vmul.f32 %v2541_v4, %v2541_v4  ;;  %v962_v52 = vmul.f32 %v2426_v46, %v892_v17 }
 0x135   :  { %v1031_v15 = vadd.f32 %v2424_v3, %v961_v42  ;;  %v622_v55 = vmul.f32 %v2489_v53, %v621_v51  ;;  %v964_v48 = vmul.f32 %v2426_v46, %v894_v27  ;;  %v1033_v26 = vadd.f32 %v2424_v3, %v963_v5 }
 0x136   :  { %v452_v29 = vadd.f32 %v374_v19, %v373_v59  ;;  %v2574_v38 = vpop.eup %1946  ;;  %v1032_v49 = vadd.f32 %v2433_v63, %v962_v52  ;;  %v2608_v59 = vld [vmem:[#allocation2 + $0x160] sm:$0xff]  ;;  %v2610_v19 = vld [vmem:[#allocation2 + $0x168] sm:$0xff]  ;;  %vm643_vm3 = vweird.f32 %v2543_v18  ;;  %vm633_vm5 = vweird.f32 %v2529_v43 }
 0x137   :  { %v194_v28 = vpop.xlane.xlu2 %193  ;;  %v2564_v50 = vpop.xlane.xlu0 %432  ;;  %v628_v39 = vmul.f32 %v2574_v38, %v2529_v43  ;;  %v1093_v42 = vpack.c.bf16 %v1033_v26, %v1031_v15  ;;  %v626_v27 = vsel %vm2591_vm1, %v2489_v53, %v622_v55  ;;  %vm634_vm6 = vweird.f32 %v2574_v38 }
 0x138   :  { %v263_v61 = vmul.f32 %v2211_v33, %v194_v28  ;;  %453 = vadd.xlane.f32.xlu1 %v452_v29  ;;  %214 = vadd.xlane.f32.xlu0 %v213_v36  ;;  %v1034_v29 = vadd.f32 %v2433_v63, %v964_v48  ;;  %v897_v53 = vmul.f32 %v626_v27, %v2272_v11  ;;  %vm635_vm8 = vmor %vm633_vm5, %vm634_vm6 }
 0x139   :  { %v629_v5 = vmul.f32 %v2574_v38, %v628_v39 }
 0x13a   :  { %v2579_v21 = vpop.eup %1948  ;;  %v2583_v22 = vsub.f32 %v2346_v0, %v263_v61  ;;  %v2586_v23 = vsub.f32 %v2348_v1, %v263_v61  ;;  %208 = vadd.xlane.f32.xlu2 %v207_v34  ;;  %v2598_v0 = vld [vmem:[#allocation2 + $0x180] sm:$0xff]  ;;  %v612_v1 = vmul.f32 %v2451_v2, %v611_v25  ;;  %v210_v34 = vadd.f32 %v2610_v19, %v2608_v59 }
 0x13b   :  { %v638_v37 = vmul.f32 %v2579_v21, %v2543_v18  ;;  %v216_v36 = vadd.f32 %v2604_v24, %v2598_v0  ;;  %v1094_v25 = vpack.c.bf16 %v1034_v29, %v1032_v49  ;;  %v630_v26 = vmul.f32 0.5, %v629_v5  ;;  %v2669_v5 = vld [vmem:[#allocation2 + $0x1a8] sm:$0xff] }
 0x13c   :  { %3424 = vst [vmem:[#allocation28_spill] sm:$0xff] %v2586_v23  ;;  %v375_v60 = vmul.f32 %v2583_v22, %v2583_v22  ;;  %v376_v17 = vmul.f32 %v2586_v23, %v2586_v23  ;;  %v616_v52 = vsel %vm615_vm2, %v2451_v2, %v612_v1  ;;  %v967_v39 = vmul.f32 %v2411_v47, %v897_v53 }
 0x13d   :  { %v639_v51 = vmul.f32 %v2579_v21, %v638_v37  ;;  %v2639_v37 = vld [vmem:[#allocation2 + $0x198] sm:$0xff]  ;;  %v895_v2 = vmul.f32 %v616_v52, %v2240_v56  ;;  %vm644_vm4 = vweird.f32 %v2579_v21 }
 0x13e   :  { %1334 = vmatmul.bf16.gmra.mxu0 %v1093_v42  ;;  %1512 = vmatmul.bf16.gmra.mxu2 %v1093_v42  ;;  %v455_v10 = vadd.f32 %v376_v17, %v375_v60  ;;  %v896_v60 = vmul.f32 %v616_v52, %v2242_v57  ;;  %v1037_v57 = vadd.f32 %v2424_v3, %v967_v39  ;;  %vm645_vm7 = vmor %vm643_vm3, %vm644_vm4  ;;  %v2693_v39 = vld [vmem:[#allocation2 + $0x1b8] sm:$0xff] }
 0x13f   :  { %v197_v28 = vpop.xlane.xlu0 %196  ;;  %v640_v15 = vmul.f32 0.5, %v639_v51  ;;  %v965_v17 = vmul.f32 %v2411_v47, %v895_v2  ;;  %v631_v51 = vsub.f32 1.5, %v630_v26 }
 0x140   :  { %v264_v61 = vmul.f32 %v2211_v33, %v197_v28  ;;  %456 = vadd.xlane.f32.xlu1 %v455_v10  ;;  %217 = vadd.xlane.f32.xlu0 %v216_v36  ;;  %v966_v10 = vmul.f32 %v2426_v46, %v896_v60 }
 0x141   :  { %1423 = vmatmul.bf16.gmra.mxu1 %v1094_v25  ;;  %1601 = vmatmul.bf16.gmra.mxu3 %v1094_v25  ;;  %v641_v49 = vsub.f32 1.5, %v640_v15  ;;  %v1035_v25 = vadd.f32 %v2424_v3, %v965_v17 }
 0x142   :  { %v2632_v55 = vsub.f32 %v2352_v6, %v264_v61  ;;  %v2635_v48 = vsub.f32 %v2354_v7, %v264_v61  ;;  %211 = vadd.xlane.f32.xlu2 %v210_v34  ;;  %v898_v6 = vmul.f32 %v626_v27, %v2275_v12  ;;  %v219_v7 = vadd.f32 %v2639_v37, %v2637_v8  ;;  %v2667_v34 = vld [vmem:[#allocation2 + $0x1a0] sm:$0xff] }
 0x143   :  { %v642_v27 = vmul.f32 %v2579_v21, %v641_v49  ;;  %v632_v61 = vmul.f32 %v2574_v38, %v631_v51  ;;  %v1095_v18 = vpack.c.bf16 %v1037_v57, %v1035_v25  ;;  %v222_v53 = vadd.f32 %v2669_v5, %v2667_v34  ;;  %v2706_v51 = vld [vmem:[#allocation2 + $0x1c0] sm:$0xff] }
 0x144   :  { %v377_v11 = vmul.f32 %v2632_v55, %v2632_v55  ;;  %v378_v1 = vmul.f32 %v2635_v48, %v2635_v48  ;;  %v968_v12 = vmul.f32 %v2426_v46, %v898_v6  ;;  %v1036_v15 = vadd.f32 %v2433_v63, %v966_v10 }
 0x145   :  { %v646_v2 = vsel %vm645_vm7, %v2579_v21, %v642_v27  ;;  %v511_v10 = vmul.f32 %v2564_v50, %v2211_v33 }
 0x146   :  { %v458_v42 = vadd.f32 %v378_v1, %v377_v11  ;;  %v636_v1 = vsel %vm635_vm8, %v2574_v38, %v632_v61  ;;  %v901_v6 = vmul.f32 %v646_v2, %v2318_v44  ;;  %v902_v21 = vmul.f32 %v646_v2, %v2321_v45 }
 0x147   :  { %v200_v56 = vpop.xlane.xlu0 %199  ;;  %v899_v43 = vmul.f32 %v636_v1, %v2295_v31  ;;  %v900_v60 = vmul.f32 %v636_v1, %v2298_v32  ;;  %v543_v25 = vadd.f32 1e-05, %v511_v10 }
 0x148   :  { %v265_v29 = vmul.f32 %v2211_v33, %v200_v56  ;;  %220 = vadd.xlane.f32.xlu1 %v219_v7  ;;  %v2691_v7 = vld [vmem:[#allocation2 + $0x1b0] sm:$0xff]  ;;  %v971_v49 = vmul.f32 %v2411_v47, %v901_v6  ;;  %v972_v56 = vmul.f32 %v2426_v46, %v902_v21 }
 0x149   :  { %v225_v38 = vadd.f32 %v2693_v39, %v2691_v7  ;;  %v969_v44 = vmul.f32 %v2411_v47, %v899_v43  ;;  %v970_v31 = vmul.f32 %v2426_v46, %v900_v60  ;;  %1950 = vrsqrt.f32 %v543_v25 }
 0x14a   :  { %v2661_v28 = vsub.f32 %v2358_v13, %v265_v29  ;;  %v2664_v36 = vsub.f32 %v2360_v16, %v265_v29  ;;  %459 = vadd.xlane.f32.xlu2 %v458_v42  ;;  %v1038_v13 = vadd.f32 %v2433_v63, %v968_v12  ;;  %v1041_v42 = vadd.f32 %v2424_v3, %v971_v49  ;;  %v2708_v29 = vld [vmem:[#allocation2 + $0x1c8] sm:$0xff] }
 0x14b   :  { %v1039_v17 = vadd.f32 %v2424_v3, %v969_v44  ;;  %v1042_v45 = vadd.f32 %v2433_v63, %v972_v56  ;;  %v1040_v12 = vadd.f32 %v2433_v63, %v970_v31  ;;  %v228_v57 = vadd.f32 %v2708_v29, %v2706_v51 }
 0x14c   :  { %3427 = vst [vmem:[#allocation29_spill] sm:$0xff] %v2661_v28  ;;  %v379_v16 = vmul.f32 %v2661_v28, %v2661_v28  ;;  %v380_v52 = vmul.f32 %v2664_v36, %v2664_v36  ;;  %v1096_v11 = vpack.c.bf16 %v1038_v13, %v1036_v15  ;;  %vm653_vm9 = vweird.f32 %v543_v25  ;;  %v3449_v28 = vld [vmem:[#allocation20_spill] sm:$0xff] }
 0x14d   :  { %3428 = vst [vmem:[#allocation30_spill] sm:$0xff] %v2664_v36  ;;  %v1097_v32 = vpack.c.bf16 %v1041_v42, %v1039_v17  ;;  %v1098_v27 = vpack.c.bf16 %v1042_v45, %v1040_v12  ;;  %v3429_v12 = vld [vmem:[#allocation15_spill] sm:$0xff] }
 0x14e   :  { %1339 = vmatmul.bf16.gmra.mxu0 %v1095_v18  ;;  %1517 = vmatmul.bf16.gmra.mxu2 %v1095_v18  ;;  %v461_v26 = vadd.f32 %v380_v52, %v379_v16  ;;  %v2848_v36 = vld [vmem:[#allocation2 + $0x1e0] sm:$0xff] }
 0x14f   :  { %v1951_v61 = vpop.eup %1950 }
 0x150   :  { %223 = vadd.xlane.f32.xlu1 %v222_v53  ;;  %v648_v13 = vmul.f32 %v1951_v61, %v543_v25  ;;  %vm654_vm10 = vweird.f32 %v1951_v61 }
 0x151   :  { %1428 = vmatmul.bf16.gmra.mxu1 %v1096_v11  ;;  %1606 = vmatmul.bf16.gmra.mxu3 %v1096_v11  ;;  %vm655_vm11 = vmor %vm653_vm9, %vm654_vm10 }
 0x152   :  { %462 = vadd.xlane.f32.xlu2 %v461_v26  ;;  %v649_v16 = vmul.f32 %v1951_v61, %v648_v13 }
 0x154   :  { %v650_v15 = vmul.f32 0.5, %v649_v16  ;;  %v3432_v16 = vld [vmem:[#allocation21_spill] sm:$0xff] }
 0x156   :  { %v651_v2 = vsub.f32 1.5, %v650_v15 }
 0x158   :  { %v652_v6 = vmul.f32 %v1951_v61, %v651_v2 }
 0x15a   :  { %226 = vadd.xlane.f32.xlu2 %v225_v38  ;;  %v656_v38 = vsel %vm655_vm11, %v1951_v61, %v652_v6 }
 0x15e   :  { %1344 = vmatmul.bf16.gmra.mxu0 %v1097_v32  ;;  %1522 = vmatmul.bf16.gmra.mxu2 %v1097_v32 }
 0x161   :  { %1433 = vmatmul.bf16.gmra.mxu1 %v1098_v27  ;;  %1611 = vmatmul.bf16.gmra.mxu3 %v1098_v27  ;;  %v3430_v27 = vld [vmem:[#allocation16_spill] sm:$0xff] }
 0x162   :  { %229 = vadd.xlane.f32.xlu2 %v228_v57  ;;  %v903_v57 = vmul.f32 %v656_v38, %v3429_v12  ;;  %v904_v10 = vmul.f32 %v656_v38, %v3430_v27 }
 0x164   :  { %v973_v6 = vmul.f32 %v2411_v47, %v903_v57  ;;  %v974_v38 = vmul.f32 %v2426_v46, %v904_v10  ;;  %v3436_v10 = vld [vmem:[#allocation24_spill] sm:$0xff] }
 0x18b   :  { %v436_v52 = vpop.xlane.xlu1 %435 }
 0x18c   :  { %v512_v18 = vmul.f32 %v436_v52, %v2211_v33 }
 0x18e   :  { %v544_v53 = vadd.f32 1e-05, %v512_v18 }
 0x190   :  { %1952 = vrsqrt.f32 %v544_v53  ;;  %vm663_vm13 = vweird.f32 %v544_v53 }
 0x193   :  { %v439_v26 = vpop.xlane.xlu1 %438 }
 0x194   :  { %v513_v11 = vmul.f32 %v439_v26, %v2211_v33 }
 0x196   :  { %v1953_v1 = vpop.eup %1952  ;;  %v2717_v43 = vadd.f32 1e-05, %v513_v11 }
 0x197   :  { %v658_v50 = vmul.f32 %v1953_v1, %v544_v53  ;;  %vm664_vm12 = vweird.f32 %v1953_v1 }
 0x198   :  { %1954 = vrsqrt.f32 %v2717_v43  ;;  %vm665_vm14 = vmor %vm663_vm13, %vm664_vm12  ;;  %vm673_vm0 = vweird.f32 %v2717_v43 }
 0x199   :  { %v659_v21 = vmul.f32 %v1953_v1, %v658_v50  ;;  %v3434_v50 = vld [vmem:[#allocation17_spill] sm:$0xff] }
 0x19a   :  { %v448_v60 = vpop.xlane.xlu0 %447 }
 0x19b   :  { %v660_v49 = vmul.f32 0.5, %v659_v21  ;;  %v203_v44 = vpop.xlane.xlu1 %202  ;;  %v442_v56 = vpop.xlane.xlu2 %441  ;;  %v516_v42 = vmul.f32 %v448_v60, %v2211_v33 }
 0x19c   :  { %v266_v17 = vmul.f32 %v2211_v33, %v203_v44  ;;  %v514_v45 = vmul.f32 %v442_v56, %v2211_v33 }
 0x19d   :  { %v661_v31 = vsub.f32 1.5, %v660_v49  ;;  %v2723_v32 = vadd.f32 1e-05, %v516_v42  ;;  %v3435_v49 = vld [vmem:[#allocation18_spill] sm:$0xff] }
 0x19e   :  { %v2727_v25 = vpop.eup %1954  ;;  %v2730_v61 = vsub.f32 %v2418_v58, %v266_v17  ;;  %v2733_v52 = vsub.f32 %v3432_v16, %v266_v17  ;;  %v2735_v18 = vadd.f32 1e-05, %v514_v45  ;;  %v3438_v16 = vld [vmem:[#allocation25_spill] sm:$0xff] }
 0x19f   :  { %v662_v13 = vmul.f32 %v1953_v1, %v661_v31  ;;  %v668_v15 = vmul.f32 %v2727_v25, %v2717_v43  ;;  %1956 = vrsqrt.f32 %v2723_v32  ;;  %vm674_vm15 = vweird.f32 %v2727_v25 }
 0x1a0   :  { %3431 = vst [vmem:[#allocation15_spill] sm:$0xff] %v2730_v61  ;;  %1958 = vrsqrt.f32 %v2735_v18  ;;  %v381_v2 = vmul.f32 %v2730_v61, %v2730_v61  ;;  %v382_v58 = vmul.f32 %v2733_v52, %v2733_v52  ;;  %vm683_vm1 = vweird.f32 %v2735_v18  ;;  %vm675_vm2 = vmor %vm673_vm0, %vm674_vm15 }
 0x1a1   :  { %3433 = vst [vmem:[#allocation16_spill] sm:$0xff] %v2733_v52  ;;  %v669_v26 = vmul.f32 %v2727_v25, %v668_v15  ;;  %v666_v11 = vsel %vm665_vm14, %v1953_v1, %v662_v13  ;;  %v1155_v1 = vld [vmem:[%s3380_s4] sm:$0x3]  ;;  %vm703_vm5 = vweird.f32 %v2723_v32  ;;  %s2135_s4 = smov [#allocation10]  }
 0x1a2   :  { %v464_v53 = vadd.f32 %v382_v58, %v381_v2  ;;  %v905_v21 = vmul.f32 %v666_v11, %v3434_v50  ;;  %v906_v60 = vmul.f32 %v666_v11, %v3435_v49  ;;  %v1043_v2 = vadd.f32 %v2424_v3, %v973_v6  ;;  %s1745_s15 = sshll.u32 %s2135_s4, 4  ;;  %s1746_s15 = int_to_ptr.vmem [resolvable:$true] %s1745_s15 }
 0x1a3   :  { %v206_v44 = vpop.xlane.xlu1 %205  ;;  %v670_v56 = vmul.f32 0.5, %v669_v26  ;;  %v451_v57 = vpop.xlane.xlu0 %450  ;;  %v1044_v58 = vadd.f32 %v2433_v63, %v974_v38  ;;  %v2773_v50 = vperm.slane %v1155_v1, 0 }
 0x1a4   :  { %v267_v42 = vmul.f32 %v2211_v33, %v206_v44  ;;  %465 = vadd.xlane.f32.xlu0 %v464_v53  ;;  %v975_v31 = vmul.f32 %v2411_v47, %v905_v21  ;;  %v976_v17 = vmul.f32 %v2426_v46, %v906_v60  ;;  %v517_v49 = vmul.f32 %v451_v57, %v2211_v33 }
 0x1a5   :  { %v2756_v45 = vpop.eup %1956  ;;  %v445_v12 = vpop.xlane.xlu2 %444  ;;  %v671_v21 = vsub.f32 1.5, %v670_v56 }
 0x1a6   :  { %v2758_v27 = vpop.eup %1958  ;;  %v2761_v13 = vsub.f32 %v3436_v10, %v267_v42  ;;  %v2764_v15 = vsub.f32 %v3438_v16, %v267_v42  ;;  %v698_v11 = vmul.f32 %v2756_v45, %v2723_v32  ;;  %v515_v53 = vmul.f32 %v445_v12, %v2211_v33 }
 0x1a7   :  { %v678_v26 = vmul.f32 %v2758_v27, %v2735_v18  ;;  %v1045_v60 = vadd.f32 %v2424_v3, %v975_v31  ;;  %v1046_v44 = vadd.f32 %v2433_v63, %v976_v17  ;;  %v2785_v12 = vadd.f32 1e-05, %v517_v49 }
 0x1a8   :  { %3437 = vst [vmem:[#allocation21_spill] sm:$0xff] %v2761_v13  ;;  %v2779_v38 = vadd.f32 1e-05, %v515_v53  ;;  %v383_v42 = vmul.f32 %v2761_v13, %v2761_v13  ;;  %v384_v10 = vmul.f32 %v2764_v15, %v2764_v15  ;;  %v699_v57 = vmul.f32 %v2756_v45, %v698_v11 }
 0x1a9   :  { %3439 = vst [vmem:[#allocation17_spill] sm:$0xff] %v2764_v15  ;;  %v679_v6 = vmul.f32 %v2758_v27, %v678_v26  ;;  %v1099_v16 = vpack.c.bf16 %v1045_v60, %v1043_v2  ;;  %v1100_v56 = vpack.c.bf16 %v1046_v44, %v1044_v58  ;;  %v672_v15 = vmul.f32 %v2727_v25, %v671_v21  ;;  %v2800_v21 = vld [vmem:[#allocation2 + $0x1d0] sm:$0xff] }
 0x1aa   :  { %1960 = vrsqrt.f32 %v2779_v38  ;;  %v467_v26 = vadd.f32 %v384_v10, %v383_v42  ;;  %v2798_v10 = vperm.slane %v1155_v1, 1  ;;  %3440 = vst [vmem:[#allocation18_spill] sm:$0xff] %v2800_v21  ;;  %vm684_vm3 = vweird.f32 %v2758_v27 }
 0x1ab   :  { %v680_v52 = vmul.f32 0.5, %v679_v6  ;;  %v454_v31 = vpop.xlane.xlu1 %453  ;;  %v1330_v17 = vpop.f32.mrf.mxu0  ;;  %1962 = vrsqrt.f32 %v2785_v12  ;;  %1349 = vmatmul.bf16.gmra.mxu0 %v1099_v16  ;;  %1438 = vmatmul.bf16.gmra.mxu1 %v1100_v56  ;;  %vm685_vm4 = vmor %vm683_vm1, %vm684_vm3  ;;  %vm704_vm6 = vweird.f32 %v2756_v45  ;;  %vm693_vm9 = vweird.f32 %v2779_v38 }
 0x1ac   :  { %v518_v53 = vmul.f32 %v454_v31, %v2211_v33  ;;  %1527 = vmatmul.bf16.gmra.mxu2 %v1099_v16  ;;  %1616 = vmatmul.bf16.gmra.mxu3 %v1100_v56  ;;  %v1331_v58 = vadd.f32 %v1330_v17, %v2773_v50  ;;  %v215_v49 = vpop.xlane.xlu0 %214  ;;  %v2802_v31 = vld [vmem:[#allocation2 + $0x1d8] sm:$0xff]  ;;  %vm2930_vm8 = vmor %vm703_vm5, %vm704_vm6  ;;  %vm713_vm11 = vweird.f32 %v2785_v12 }
 0x1ad   :  { %v681_v2 = vsub.f32 1.5, %v680_v52  ;;  %v209_v11 = vpop.xlane.xlu2 %208  ;;  %v270_v42 = vmul.f32 %v2211_v33, %v215_v49  ;;  %468 = vadd.xlane.f32.xlu0 %v467_v26  ;;  %3441 = vst [vmem:[#allocation24_spill] sm:$0xff] %v2802_v31  ;;  %v700_v52 = vmul.f32 0.5, %v699_v57 }
 0x1ae   :  { %v2794_v60 = vadd.f32 1e-05, %v518_v53  ;;  %v1419_v44 = vpop.f32.mrf.mxu1  ;;  %v268_v6 = vmul.f32 %v2211_v33, %v209_v11  ;;  %v231_v53 = vadd.f32 %v2802_v31, %v2800_v21 }
 0x1af   :  { %v1420_v16 = vadd.f32 %v1419_v44, %v1331_v58  ;;  %v682_v56 = vmul.f32 %v2758_v27, %v681_v2  ;;  %v2820_v43 = vsub.f32 %v2546_v62, %v270_v42  ;;  %v676_v2 = vsel %vm675_vm2, %v2727_v25, %v672_v15 }
 0x1b0   :  { %v2811_v1 = vsub.f32 %v2556_v40, %v268_v6  ;;  %v2814_v17 = vsub.f32 %v2558_v41, %v268_v6  ;;  %v2816_v26 = vpop.eup %1960  ;;  %1964 = vrsqrt.f32 %v2794_v60  ;;  %v2830_v41 = vsub.f32 %v2550_v35, %v270_v42 }
 0x1b1   :  { %1677 = vst [vmem:[#allocation10] sm:$0xff] %v1420_v16  ;;  %v1508_v57 = vpop.f32.mrf.mxu2  ;;  %v2825_v58 = vpop.eup %1962  ;;  %v688_v40 = vmul.f32 %v2816_v26, %v2779_v38  ;;  %v701_v49 = vsub.f32 1.5, %v700_v52  ;;  %v686_v16 = vsel %vm685_vm4, %v2758_v27, %v682_v56  ;;  %v389_v27 = vmul.f32 %v2820_v43, %v2820_v43 }
 0x1b2   :  { %3442 = vst [vmem:[#allocation25_spill] sm:$0xff] %v2811_v1  ;;  %v1509_v11 = vadd.f32 %v1508_v57, %v2798_v10  ;;  %v385_v62 = vmul.f32 %v2811_v1, %v2811_v1  ;;  %v386_v44 = vmul.f32 %v2814_v17, %v2814_v17  ;;  %v3446_v57 = vld [vmem:[#allocation19_spill] sm:$0xff]  ;;  %v708_v13 = vmul.f32 %v2825_v58, %v2785_v12 }
 0x1b3   :  { %3443 = vst [vmem:[#allocation31_spill] sm:$0xff] %v2814_v17  ;;  %v457_v25 = vpop.xlane.xlu1 %456  ;;  %v1332_v15 = vpop.f32.mrf.mxu0  ;;  %v689_v6 = vmul.f32 %v2816_v26, %v688_v40  ;;  %v907_v1 = vmul.f32 %v676_v2, %v3446_v57  ;;  %v2850_v17 = vld [vmem:[#allocation2 + $0x1e8] sm:$0xff]  ;;  %v390_v56 = vmul.f32 %v2830_v41, %v2830_v41  ;;  %v908_v23 = vmul.f32 %v676_v2, %v3449_v28 }
 0x1b4   :  { %3444 = vst [vmem:[#allocation32_spill] sm:$0xff] %v2820_v43  ;;  %v1597_v35 = vpop.f32.mrf.mxu3  ;;  %v1333_v42 = vadd.f32 %v1332_v15, %v2773_v50  ;;  %v519_v52 = vmul.f32 %v457_v25, %v2211_v33  ;;  %v218_v31 = vpop.xlane.xlu0 %217  ;;  %v470_v21 = vadd.f32 %v386_v44, %v385_v62  ;;  %v3448_v44 = vld [vmem:[#allocation26_spill] sm:$0xff]  ;;  %vm694_vm7 = vweird.f32 %v2816_v26  ;;  %v3450_v43 = vld [vmem:[#allocation27_spill] sm:$0xff] }
 0x1b5   :  { %3445 = vst [vmem:[#allocation33_spill] sm:$0xff] %v2830_v41  ;;  %v1598_v18 = vadd.f32 %v1597_v35, %v1509_v11  ;;  %v212_v61 = vpop.xlane.xlu2 %211  ;;  %232 = vadd.xlane.f32.xlu0 %v231_v53  ;;  %v690_v25 = vmul.f32 0.5, %v689_v6  ;;  %v271_v62 = vmul.f32 %v2211_v33, %v218_v31  ;;  %v909_v57 = vmul.f32 %v686_v16, %v3448_v44  ;;  %vm695_vm10 = vmor %vm693_vm9, %vm694_vm7 }
 0x1b6   :  { %3447 = vst [vmem:[#allocation19_spill] sm:$0xff] %v2850_v17  ;;  %v1421_v40 = vpop.f32.mrf.mxu1  ;;  %v269_v15 = vmul.f32 %v2211_v33, %v212_v61  ;;  %v2857_v11 = vpop.eup %1964  ;;  %471 = vadd.xlane.f32.xlu1 %v470_v21  ;;  %v234_v61 = vadd.f32 %v2850_v17, %v2848_v36  ;;  %v2865_v53 = vmul.f32 %v2756_v45, %v701_v49  ;;  %vm723_vm12 = vweird.f32 %v2794_v60 }
 0x1b7   :  { %1678 = vst [vmem:[#allocation10 + $0x8] sm:$0xff] %v1598_v18  ;;  %v1422_v35 = vadd.f32 %v1421_v40, %v1333_v42  ;;  %v709_v6 = vmul.f32 %v2825_v58, %v708_v13  ;;  %v2870_v42 = vadd.f32 1e-05, %v519_v52  ;;  %v977_v31 = vmul.f32 %v2411_v47, %v907_v1 }
 0x1b8   :  { %v718_v28 = vmul.f32 %v2857_v11, %v2794_v60  ;;  %v2877_v2 = vsub.f32 %v2608_v59, %v269_v15  ;;  %v476_v49 = vadd.f32 %v390_v56, %v389_v27  ;;  %v691_v40 = vsub.f32 1.5, %v690_v25 }
 0x1b9   :  { %1679 = vst [vmem:[#allocation10 + $0x10] sm:$0xff] %v1422_v35  ;;  %v1510_v21 = vpop.f32.mrf.mxu2  ;;  %v2881_v13 = vsub.f32 %v2610_v19, %v269_v15  ;;  %v2884_v52 = vsub.f32 %v2598_v0, %v271_v62  ;;  %v979_v1 = vmul.f32 %v2411_v47, %v909_v57  ;;  %v910_v17 = vmul.f32 %v686_v16, %v3450_v43 }
 0x1ba   :  { %v1511_v18 = vadd.f32 %v1510_v21, %v2798_v10  ;;  %477 = vadd.xlane.f32.xlu2 %v476_v49  ;;  %v978_v59 = vmul.f32 %v2426_v46, %v908_v23  ;;  %v2892_v19 = vsub.f32 %v2604_v24, %v271_v62  ;;  %v1047_v0 = vadd.f32 %v2424_v3, %v977_v31 }
 0x1bb   :  { %v221_v35 = vpop.xlane.xlu1 %220  ;;  %v1335_v44 = vpop.f32.mrf.mxu0  ;;  %v1049_v25 = vadd.f32 %v2424_v3, %v979_v1  ;;  %v2896_v21 = vmul.f32 0.5, %v709_v6  ;;  %v719_v49 = vmul.f32 %v2857_v11, %v718_v28  ;;  %v980_v43 = vmul.f32 %v2426_v46, %v910_v17 }
 0x1bc   :  { %v1599_v41 = vpop.f32.mrf.mxu3  ;;  %v272_v27 = vmul.f32 %v2211_v33, %v221_v35  ;;  %v1336_v56 = vadd.f32 %v1335_v44, %v2773_v50  ;;  %v387_v16 = vmul.f32 %v2877_v2, %v2877_v2  ;;  %1966 = vrsqrt.f32 %v2870_v42 }
 0x1bd   :  { %v1600_v15 = vadd.f32 %v1599_v41, %v1511_v18  ;;  %v460_v57 = vpop.xlane.xlu2 %459  ;;  %235 = vadd.xlane.f32.xlu0 %v234_v61  ;;  %v1101_v24 = vpack.c.bf16 %v1049_v25, %v1047_v0  ;;  %v1048_v41 = vadd.f32 %v2433_v63, %v978_v59  ;;  %v1050_v6 = vadd.f32 %v2433_v63, %v980_v43 }
 0x1be   :  { %v1424_v23 = vpop.f32.mrf.mxu1  ;;  %v2904_v62 = vsub.f32 %v2637_v8, %v272_v27  ;;  %v2907_v31 = vsub.f32 %v2639_v37, %v272_v27  ;;  %v520_v17 = vmul.f32 %v460_v57, %v2211_v33  ;;  %v388_v61 = vmul.f32 %v2881_v13, %v2881_v13 }
 0x1bf   :  { %1680 = vst [vmem:[#allocation10 + $0x18] sm:$0xff] %v1600_v15  ;;  %v1425_v28 = vadd.f32 %v1424_v23, %v1336_v56  ;;  %v692_v18 = vmul.f32 %v2816_v26, %v691_v40  ;;  %1354 = vmatmul.bf16.gmra.mxu0 %v1101_v24  ;;  %1532 = vmatmul.bf16.gmra.mxu2 %v1101_v24  ;;  %v720_v56 = vmul.f32 0.5, %v719_v49  ;;  %v711_v38 = vsub.f32 1.5, %v2896_v21 }
 0x1c0   :  { %v391_v8 = vmul.f32 %v2884_v52, %v2884_v52  ;;  %v392_v37 = vmul.f32 %v2892_v19, %v2892_v19  ;;  %v1102_v35 = vpack.c.bf16 %v1050_v6, %v1048_v41  ;;  %v2919_v44 = vadd.f32 1e-05, %v520_v17  ;;  %v2946_v17 = vld [vmem:[#allocation2 + $0x1f8] sm:$0xff] }
 0x1c1   :  { %v1513_v1 = vpop.f32.mrf.mxu2  ;;  %1681 = vst [vmem:[#allocation10 + $0x20] sm:$0xff] %v1425_v28  ;;  %v473_v59 = vadd.f32 %v388_v61, %v387_v16  ;;  %v393_v25 = vmul.f32 %v2904_v62, %v2904_v62  ;;  %v394_v57 = vmul.f32 %v2907_v31, %v2907_v31  ;;  %v2944_v28 = vld [vmem:[#allocation2 + $0x1f0] sm:$0xff]  ;;  %v696_v61 = vsel %vm695_vm10, %v2816_v26, %v692_v18 }
 0x1c2   :  { %v1514_v27 = vadd.f32 %v1513_v1, %v2798_v10  ;;  %v479_v40 = vadd.f32 %v392_v37, %v391_v8  ;;  %1443 = vmatmul.bf16.gmra.mxu1 %v1102_v35  ;;  %1621 = vmatmul.bf16.gmra.mxu3 %v1102_v35  ;;  %1968 = vrsqrt.f32 %v2919_v44  ;;  %v2949_v8 = vpop.eup %1966  ;;  %v721_v37 = vsub.f32 1.5, %v720_v56 }
 0x1c3   :  { %v224_v15 = vpop.xlane.xlu1 %223  ;;  %v1337_v0 = vpop.f32.mrf.mxu0  ;;  %474 = vadd.xlane.f32.xlu1 %v473_v59  ;;  %v482_v41 = vadd.f32 %v394_v57, %v393_v25  ;;  %v706_v21 = vsel %vm2930_vm8, %v2756_v45, %v2865_v53  ;;  %vm714_vm13 = vweird.f32 %v2825_v58  ;;  %v911_v35 = vmul.f32 %v696_v61, %v2495_v30  ;;  %v3453_v59 = vld [vmem:[#allocation22_spill] sm:$0xff]  ;;  %v3454_v45 = vld [vmem:[#allocation23_spill] sm:$0xff] }
 0x1c4   :  { %v1602_v49 = vpop.f32.mrf.mxu3  ;;  %v1338_v23 = vadd.f32 %v1337_v0, %v2773_v50  ;;  %480 = vadd.xlane.f32.xlu2 %v479_v40  ;;  %v273_v32 = vmul.f32 %v2211_v33, %v224_v15  ;;  %v912_v26 = vmul.f32 %v696_v61, %v2498_v54  ;;  %v237_v40 = vadd.f32 %v2946_v17, %v2944_v28  ;;  %vm3000_vm0 = vmor %vm713_vm11, %vm714_vm13 }
 0x1c5   :  { %v1603_v16 = vadd.f32 %v1602_v49, %v1514_v27  ;;  %v2940_v24 = vpop.xlane.xlu2 %462  ;;  %483 = vadd.xlane.f32.xlu0 %v482_v41  ;;  %v913_v27 = vmul.f32 %v706_v21, %v3453_v59  ;;  %v914_v53 = vmul.f32 %v706_v21, %v3454_v45  ;;  %v712_v30 = vmul.f32 %v2825_v58, %v711_v38 }
 0x1c6   :  { %v1426_v6 = vpop.f32.mrf.mxu1  ;;  %v2961_v18 = vsub.f32 %v2667_v34, %v273_v32  ;;  %v2964_v56 = vsub.f32 %v2669_v5, %v273_v32  ;;  %vm724_vm14 = vweird.f32 %v2857_v11  ;;  %v981_v34 = vmul.f32 %v2411_v47, %v911_v35 }
 0x1c7   :  { %1682 = vst [vmem:[#allocation10 + $0x28] sm:$0xff] %v1603_v16  ;;  %v1427_v1 = vadd.f32 %v1426_v6, %v1338_v23  ;;  %v722_v5 = vmul.f32 %v2857_v11, %v721_v37  ;;  %v983_v57 = vmul.f32 %v2411_v47, %v913_v27  ;;  %v982_v43 = vmul.f32 %v2426_v46, %v912_v26  ;;  %vm2987_vm15 = vmor %vm723_vm12, %vm724_vm14 }
 0x1c8   :  { %v2969_v0 = vpop.eup %1968  ;;  %v728_v23 = vmul.f32 %v2949_v8, %v2870_v42  ;;  %v1051_v32 = vadd.f32 %v2424_v3, %v981_v34  ;;  %v984_v41 = vmul.f32 %v2426_v46, %v914_v53  ;;  %v395_v21 = vmul.f32 %v2961_v18, %v2961_v18 }
 0x1c9   :  { %1683 = vst [vmem:[#allocation10 + $0x30] sm:$0xff] %v1427_v1  ;;  %v1515_v15 = vpop.f32.mrf.mxu2  ;;  %v738_v25 = vmul.f32 %v2969_v0, %v2919_v44  ;;  %v1053_v37 = vadd.f32 %v2424_v3, %v983_v57  ;;  %v396_v35 = vmul.f32 %v2964_v56, %v2964_v56  ;;  %v1052_v59 = vadd.f32 %v2433_v63, %v982_v43 }
 0x1ca   :  { %v1516_v54 = vadd.f32 %v1515_v15, %v2798_v10  ;;  %v1054_v53 = vadd.f32 %v2433_v63, %v984_v41  ;;  %v726_v34 = vsel %vm2987_vm15, %v2857_v11, %v722_v5  ;;  %v729_v57 = vmul.f32 %v2949_v8, %v728_v23 }
 0x1cb   :  { %v1340_v49 = vpop.f32.mrf.mxu0  ;;  %238 = vadd.xlane.f32.xlu1 %v237_v40  ;;  %v739_v40 = vmul.f32 %v2969_v0, %v738_v25  ;;  %v1103_v15 = vpack.c.bf16 %v1053_v37, %v1051_v32  ;;  %v485_v25 = vadd.f32 %v396_v35, %v395_v21  ;;  %v917_v23 = vmul.f32 %v726_v34, %v2538_v14 }
 0x1cc   :  { %v1604_v16 = vpop.f32.mrf.mxu3  ;;  %v1341_v38 = vadd.f32 %v1340_v49, %v2773_v50  ;;  %v716_v49 = vsel %vm3000_vm0, %v2825_v58, %v712_v30  ;;  %v730_v58 = vmul.f32 0.5, %v729_v57  ;;  %v918_v35 = vmul.f32 %v726_v34, %v2541_v4 }
 0x1cd   :  { %v1605_v61 = vadd.f32 %v1604_v16, %v1516_v54  ;;  %v227_v1 = vpop.xlane.xlu2 %226  ;;  %v740_v32 = vmul.f32 0.5, %v739_v40  ;;  %v915_v37 = vmul.f32 %v716_v49, %v2486_v9  ;;  %v987_v60 = vmul.f32 %v2411_v47, %v917_v23 }
 0x1ce   :  { %v1429_v27 = vpop.f32.mrf.mxu1  ;;  %v274_v26 = vmul.f32 %v2211_v33, %v227_v1  ;;  %v916_v40 = vmul.f32 %v716_v49, %v2492_v20  ;;  %v731_v9 = vsub.f32 1.5, %v730_v58  ;;  %vm743_vm1 = vweird.f32 %v2919_v44 }
 0x1cf   :  { %1684 = vst [vmem:[#allocation10 + $0x38] sm:$0xff] %v1605_v61  ;;  %v1430_v45 = vadd.f32 %v1429_v27, %v1341_v38  ;;  %1359 = vmatmul.bf16.gmra.mxu0 %v1103_v15  ;;  %1537 = vmatmul.bf16.gmra.mxu2 %v1103_v15  ;;  %vm744_vm2 = vweird.f32 %v2969_v0  ;;  %v985_v15 = vmul.f32 %v2411_v47, %v915_v37  ;;  %vm733_vm3 = vweird.f32 %v2870_v42 }
 0x1d0   :  { %v3009_v54 = vsub.f32 %v2691_v7, %v274_v26  ;;  %v3012_v12 = vsub.f32 %v2693_v39, %v274_v26  ;;  %v1104_v7 = vpack.c.bf16 %v1054_v53, %v1052_v59  ;;  %v741_v59 = vsub.f32 1.5, %v740_v32  ;;  %vm745_vm5 = vmor %vm743_vm1, %vm744_vm2 }
 0x1d1   :  { %1685 = vst [vmem:[#allocation10 + $0x40] sm:$0xff] %v1430_v45  ;;  %v1518_v43 = vpop.f32.mrf.mxu2  ;;  %v988_v53 = vmul.f32 %v2426_v46, %v918_v35  ;;  %vm734_vm4 = vweird.f32 %v2949_v8  ;;  %v1057_v20 = vadd.f32 %v2424_v3, %v987_v60 }
 0x1d2   :  { %v1519_v16 = vadd.f32 %v1518_v43, %v2798_v10  ;;  %v397_v39 = vmul.f32 %v3009_v54, %v3009_v54  ;;  %v398_v11 = vmul.f32 %v3012_v12, %v3012_v12  ;;  %1448 = vmatmul.bf16.gmra.mxu1 %v1104_v7  ;;  %1626 = vmatmul.bf16.gmra.mxu3 %v1104_v7  ;;  %vm735_vm6 = vmor %vm733_vm3, %vm734_vm4 }
 0x1d3   :  { %v1342_v5 = vpop.f32.mrf.mxu0  ;;  %486 = vadd.xlane.f32.xlu1 %v485_v25  ;;  %v742_v57 = vmul.f32 %v2969_v0, %v741_v59  ;;  %v986_v43 = vmul.f32 %v2426_v46, %v916_v40 }
 0x1d4   :  { %v1607_v41 = vpop.f32.mrf.mxu3  ;;  %v1343_v38 = vadd.f32 %v1342_v5, %v2773_v50  ;;  %v488_v6 = vadd.f32 %v398_v11, %v397_v39  ;;  %v1055_v39 = vadd.f32 %v2424_v3, %v985_v15  ;;  %v732_v11 = vmul.f32 %v2949_v8, %v731_v9  ;;  %v3459_v9 = vld [vmem:[#allocation28_spill] sm:$0xff] }
 0x1d5   :  { %v1608_v30 = vadd.f32 %v1607_v41, %v1519_v16  ;;  %v230_v61 = vpop.xlane.xlu2 %229  ;;  %v1058_v5 = vadd.f32 %v2433_v63, %v988_v53  ;;  %v1056_v44 = vadd.f32 %v2433_v63, %v986_v43  ;;  %v521_v43 = vmul.f32 %v2940_v24, %v2211_v33 }
 0x1d6   :  { %v1431_v1 = vpop.f32.mrf.mxu1  ;;  %v275_v21 = vmul.f32 %v2211_v33, %v230_v61  ;;  %489 = vadd.xlane.f32.xlu2 %v488_v6  ;;  %v1105_v32 = vpack.c.bf16 %v1057_v20, %v1055_v39  ;;  %v736_v61 = vsel %vm735_vm6, %v2949_v8, %v732_v11 }
 0x1d7   :  { %1686 = vst [vmem:[#allocation10 + $0x48] sm:$0xff] %v1608_v30  ;;  %v1432_v14 = vadd.f32 %v1431_v1, %v1343_v38  ;;  %v746_v38 = vsel %vm745_vm5, %v2969_v0, %v742_v57  ;;  %v1106_v58 = vpack.c.bf16 %v1058_v5, %v1056_v44  ;;  %v919_v0 = vmul.f32 %v736_v61, %v2583_v22 }
 0x1d8   :  { %v3033_v27 = vsub.f32 %v2706_v51, %v275_v21  ;;  %v3036_v26 = vsub.f32 %v2708_v29, %v275_v21  ;;  %v921_v42 = vmul.f32 %v746_v38, %v2632_v55  ;;  %v922_v60 = vmul.f32 %v746_v38, %v2635_v48 }
 0x1d9   :  { %1687 = vst [vmem:[#allocation10 + $0x50] sm:$0xff] %v1432_v14  ;;  %v1520_v4 = vpop.f32.mrf.mxu2  ;;  %v920_v8 = vmul.f32 %v736_v61, %v3459_v9  ;;  %v989_v55 = vmul.f32 %v2411_v47, %v919_v0 }
 0x1da   :  { %v1521_v45 = vadd.f32 %v1520_v4, %v2798_v10  ;;  %v399_v51 = vmul.f32 %v3033_v27, %v3033_v27  ;;  %v400_v29 = vmul.f32 %v3036_v26, %v3036_v26  ;;  %v991_v40 = vmul.f32 %v2411_v47, %v921_v42 }
 0x1db   :  { %v1345_v34 = vpop.f32.mrf.mxu0 }
 0x1dc   :  { %v1609_v25 = vpop.f32.mrf.mxu3  ;;  %v1346_v49 = vadd.f32 %v1345_v34, %v2773_v50  ;;  %v491_v7 = vadd.f32 %v400_v29, %v399_v51  ;;  %v1061_v53 = vadd.f32 %v2424_v3, %v991_v40  ;;  %v990_v51 = vmul.f32 %v2426_v46, %v920_v8 }
 0x1dd   :  { %v1610_v16 = vadd.f32 %v1609_v25, %v1521_v45  ;;  %v992_v45 = vmul.f32 %v2426_v46, %v922_v60  ;;  %v1059_v29 = vadd.f32 %v2424_v3, %v989_v55  ;;  %v3461_v60 = vld [vmem:[#allocation30_spill] sm:$0xff] }
 0x1de   :  { %v1434_v23 = vpop.f32.mrf.mxu1  ;;  %492 = vadd.xlane.f32.xlu0 %v491_v7  ;;  %v1060_v57 = vadd.f32 %v2433_v63, %v990_v51 }
 0x1df   :  { %1688 = vst [vmem:[#allocation10 + $0x58] sm:$0xff] %v1610_v16  ;;  %v1435_v41 = vadd.f32 %v1434_v23, %v1346_v49  ;;  %1364 = vmatmul.bf16.gmra.mxu0 %v1105_v32  ;;  %1542 = vmatmul.bf16.gmra.mxu2 %v1105_v32  ;;  %v1062_v20 = vadd.f32 %v2433_v63, %v992_v45  ;;  %v553_v49 = vadd.f32 1e-05, %v521_v43 }
 0x1e0   :  { %v1107_v34 = vpack.c.bf16 %v1061_v53, %v1059_v29  ;;  %v3462_v29 = vld [vmem:[#allocation18_spill] sm:$0xff] }
 0x1e1   :  { %1689 = vst [vmem:[#allocation10 + $0x60] sm:$0xff] %v1435_v41  ;;  %v1523_v6 = vpop.f32.mrf.mxu2  ;;  %v1108_v25 = vpack.c.bf16 %v1062_v20, %v1060_v57  ;;  %1970 = vrsqrt.f32 %v553_v49  ;;  %vm753_vm7 = vweird.f32 %v553_v49  ;;  %v3463_v57 = vld [vmem:[#allocation24_spill] sm:$0xff] }
 0x1e2   :  { %v1524_v30 = vadd.f32 %v1523_v6, %v2798_v10  ;;  %1453 = vmatmul.bf16.gmra.mxu1 %v1106_v58  ;;  %1631 = vmatmul.bf16.gmra.mxu3 %v1106_v58 }
 0x1e3   :  { %v1347_v37 = vpop.f32.mrf.mxu0 }
 0x1e4   :  { %v1612_v1 = vpop.f32.mrf.mxu3  ;;  %v1348_v21 = vadd.f32 %v1347_v37, %v2773_v50 }
 0x1e5   :  { %v1613_v35 = vadd.f32 %v1612_v1, %v1524_v30  ;;  %v3460_v1 = vld [vmem:[#allocation29_spill] sm:$0xff] }
 0x1e6   :  { %v1436_v14 = vpop.f32.mrf.mxu1 }
 0x1e7   :  { %1690 = vst [vmem:[#allocation10 + $0x68] sm:$0xff] %v1613_v35  ;;  %v1437_v59 = vadd.f32 %v1436_v14, %v1348_v21  ;;  %v1971_v7 = vpop.eup %1970 }
 0x1e8   :  { %v748_v16 = vmul.f32 %v1971_v7, %v553_v49  ;;  %vm754_vm8 = vweird.f32 %v1971_v7 }
 0x1e9   :  { %1691 = vst [vmem:[#allocation10 + $0x70] sm:$0xff] %v1437_v59  ;;  %v1525_v4 = vpop.f32.mrf.mxu2  ;;  %vm755_vm9 = vmor %vm753_vm7, %vm754_vm8 }
 0x1ea   :  { %v1526_v15 = vadd.f32 %v1525_v4, %v2798_v10  ;;  %v749_v39 = vmul.f32 %v1971_v7, %v748_v16 }
 0x1ec   :  { %v1614_v22 = vpop.f32.mrf.mxu3  ;;  %v750_v23 = vmul.f32 0.5, %v749_v39 }
 0x1ed   :  { %v1615_v48 = vadd.f32 %v1614_v22, %v1526_v15 }
 0x1ee   :  { %v751_v41 = vsub.f32 1.5, %v750_v23  ;;  %v3464_v23 = vld [vmem:[#allocation15_spill] sm:$0xff] }
 0x1ef   :  { %1692 = vst [vmem:[#allocation10 + $0x78] sm:$0xff] %v1615_v48  ;;  %1369 = vmatmul.bf16.gmra.mxu0 %v1107_v34  ;;  %1547 = vmatmul.bf16.gmra.mxu2 %v1107_v34 }
 0x1f0   :  { %v752_v44 = vmul.f32 %v1971_v7, %v751_v41  ;;  %v3465_v41 = vld [vmem:[#allocation16_spill] sm:$0xff] }
 0x1f2   :  { %1458 = vmatmul.bf16.gmra.mxu1 %v1108_v25  ;;  %1636 = vmatmul.bf16.gmra.mxu3 %v1108_v25  ;;  %v756_v37 = vsel %vm755_vm9, %v1971_v7, %v752_v44 }
 0x1f3   :  { %v923_v21 = vmul.f32 %v756_v37, %v3460_v1  ;;  %v924_v59 = vmul.f32 %v756_v37, %v3461_v60 }
 0x1f5   :  { %v993_v22 = vmul.f32 %v2411_v47, %v923_v21  ;;  %v994_v34 = vmul.f32 %v2426_v46, %v924_v59 }
 0x1f7   :  { %v1064_v37 = vadd.f32 %v2433_v63, %v994_v34 }
 0x217   :  { %v466_v11 = vpop.xlane.xlu0 %465 }
 0x218   :  { %v522_v5 = vmul.f32 %v466_v11, %v2211_v33 }
 0x21a   :  { %v554_v32 = vadd.f32 1e-05, %v522_v5 }
 0x21c   :  { %1972 = vrsqrt.f32 %v554_v32  ;;  %vm763_vm11 = vweird.f32 %v554_v32 }
 0x220   :  { %v469_v38 = vpop.xlane.xlu0 %468 }
 0x221   :  { %v523_v24 = vmul.f32 %v469_v38, %v2211_v33 }
 0x222   :  { %v1973_v6 = vpop.eup %1972 }
 0x223   :  { %v758_v58 = vmul.f32 %v1973_v6, %v554_v32  ;;  %v3087_v30 = vadd.f32 1e-05, %v523_v24  ;;  %vm764_vm10 = vweird.f32 %v1973_v6 }
 0x224   :  { %vm765_vm12 = vmor %vm763_vm11, %vm764_vm10 }
 0x225   :  { %v759_v61 = vmul.f32 %v1973_v6, %v758_v58  ;;  %1974 = vrsqrt.f32 %v3087_v30  ;;  %vm773_vm14 = vweird.f32 %v3087_v30 }
 0x227   :  { %v760_v42 = vmul.f32 0.5, %v759_v61  ;;  %v1063_v61 = vadd.f32 %v2424_v3, %v993_v22  ;;  %v3466_v22 = vld [vmem:[#allocation19_spill] sm:$0xff] }
 0x228   :  { %v1350_v0 = vpop.f32.mrf.mxu0  ;;  %v1439_v14 = vpop.f32.mrf.mxu1 }
 0x229   :  { %v761_v35 = vsub.f32 1.5, %v760_v42  ;;  %v472_v40 = vpop.xlane.xlu1 %471  ;;  %v1351_v9 = vadd.f32 %v1350_v0, %v2773_v50  ;;  %v233_v8 = vpop.xlane.xlu0 %232 }
 0x22a   :  { %v524_v55 = vmul.f32 %v472_v40, %v2211_v33  ;;  %v276_v15 = vmul.f32 %v2211_v33, %v233_v8 }
 0x22b   :  { %v762_v4 = vmul.f32 %v1973_v6, %v761_v35  ;;  %v1975_v45 = vpop.eup %1974  ;;  %v1440_v53 = vadd.f32 %v1439_v14, %v1351_v9 }
 0x22c   :  { %v768_v51 = vmul.f32 %v1975_v45, %v3087_v30  ;;  %v3097_v48 = vadd.f32 1e-05, %v524_v55  ;;  %v3100_v20 = vsub.f32 %v3462_v29, %v276_v15  ;;  %v3104_v25 = vsub.f32 %v3463_v57, %v276_v15 }
 0x22d   :  { %1693 = vst [vmem:[#allocation10 + $0x80] sm:$0xff] %v1440_v53  ;;  %v766_v43 = vsel %vm765_vm12, %v1973_v6, %v762_v4  ;;  %v478_v7 = vpop.xlane.xlu2 %477  ;;  %vm774_vm13 = vweird.f32 %v1975_v45 }
 0x22e   :  { %v769_v49 = vmul.f32 %v1975_v45, %v768_v51  ;;  %1976 = vrsqrt.f32 %v3097_v48  ;;  %v401_v16 = vmul.f32 %v3100_v20, %v3100_v20  ;;  %v526_v39 = vmul.f32 %v478_v7, %v2211_v33  ;;  %vm775_vm15 = vmor %vm773_vm14, %vm774_vm13 }
 0x22f   :  { %v1528_v11 = vpop.f32.mrf.mxu2  ;;  %v402_v5 = vmul.f32 %v3104_v25, %v3104_v25  ;;  %v925_v32 = vmul.f32 %v766_v43, %v3464_v23  ;;  %v926_v44 = vmul.f32 %v766_v43, %v3465_v41  ;;  %v1617_v24 = vpop.f32.mrf.mxu3  ;;  %vm783_vm1 = vweird.f32 %v3097_v48 }
 0x230   :  { %v770_v38 = vmul.f32 0.5, %v769_v49  ;;  %v1529_v6 = vadd.f32 %v1528_v11, %v2798_v10  ;;  %v1352_v58 = vpop.f32.mrf.mxu0  ;;  %v3117_v42 = vadd.f32 1e-05, %v526_v39  ;;  %v1441_v59 = vpop.f32.mrf.mxu1 }
 0x231   :  { %v1353_v1 = vadd.f32 %v1352_v58, %v2773_v50  ;;  %v236_v21 = vpop.xlane.xlu0 %235  ;;  %v494_v35 = vadd.f32 %v402_v5, %v401_v16  ;;  %v995_v0 = vmul.f32 %v2411_v47, %v925_v32  ;;  %v996_v9 = vmul.f32 %v2426_v46, %v926_v44 }
 0x232   :  { %v771_v14 = vsub.f32 1.5, %v770_v38  ;;  %v1618_v60 = vadd.f32 %v1617_v24, %v1529_v6  ;;  %v277_v40 = vmul.f32 %v2211_v33, %v236_v21  ;;  %1978 = vrsqrt.f32 %v3117_v42 }
 0x233   :  { %v1442_v8 = vadd.f32 %v1441_v59, %v1353_v1  ;;  %495 = vadd.xlane.f32.xlu1 %v494_v35  ;;  %v1065_v4 = vadd.f32 %v2424_v3, %v995_v0  ;;  %v1066_v29 = vadd.f32 %v2433_v63, %v996_v9  ;;  %v3467_v35 = vld [vmem:[#allocation21_spill] sm:$0xff]  ;;  %vm803_vm3 = vweird.f32 %v3117_v42 }
 0x234   :  { %v1977_v55 = vpop.eup %1976  ;;  %v772_v15 = vmul.f32 %v1975_v45, %v771_v14  ;;  %1694 = vst [vmem:[#allocation10 + $0x88] sm:$0xff] %v1618_v60  ;;  %v3126_v53 = vsub.f32 %v2848_v36, %v277_v40  ;;  %v3129_v51 = vsub.f32 %v3466_v22, %v277_v40  ;;  %v3468_v60 = vld [vmem:[#allocation17_spill] sm:$0xff] }
 0x235   :  { %v778_v34 = vmul.f32 %v1977_v55, %v3097_v48  ;;  %1695 = vst [vmem:[#allocation10 + $0x90] sm:$0xff] %v1442_v8  ;;  %v1109_v57 = vpack.c.bf16 %v1065_v4, %v1063_v61  ;;  %v1110_v43 = vpack.c.bf16 %v1066_v29, %v1064_v37  ;;  %vm784_vm0 = vweird.f32 %v1977_v55 }
 0x236   :  { %v403_v49 = vmul.f32 %v3126_v53, %v3126_v53  ;;  %v404_v36 = vmul.f32 %v3129_v51, %v3129_v51  ;;  %v475_v16 = vpop.xlane.xlu1 %474  ;;  %v776_v11 = vsel %vm775_vm15, %v1975_v45, %v772_v15  ;;  %vm785_vm2 = vmor %vm783_vm1, %vm784_vm0 }
 0x237   :  { %v779_v7 = vmul.f32 %v1977_v55, %v778_v34  ;;  %v481_v39 = vpop.xlane.xlu2 %480  ;;  %1374 = vmatmul.bf16.gmra.mxu0 %v1109_v57  ;;  %1552 = vmatmul.bf16.gmra.mxu2 %v1109_v57  ;;  %v525_v30 = vmul.f32 %v475_v16, %v2211_v33  ;;  %v1530_v23 = vpop.f32.mrf.mxu2  ;;  %v927_v0 = vmul.f32 %v776_v11, %v3467_v35 }
 0x238   :  { %v527_v5 = vmul.f32 %v481_v39, %v2211_v33  ;;  %1463 = vmatmul.bf16.gmra.mxu1 %v1110_v43  ;;  %1641 = vmatmul.bf16.gmra.mxu3 %v1110_v43  ;;  %v497_v32 = vadd.f32 %v404_v36, %v403_v49  ;;  %v3141_v41 = vpop.eup %1978  ;;  %v1531_v38 = vadd.f32 %v1530_v23, %v2798_v10  ;;  %v1619_v61 = vpop.f32.mrf.mxu3  ;;  %v3469_v43 = vld [vmem:[#allocation25_spill] sm:$0xff]  ;;  %v3470_v36 = vld [vmem:[#allocation31_spill] sm:$0xff] }
 0x239   :  { %v780_v44 = vmul.f32 0.5, %v779_v7  ;;  %v484_v6 = vpop.xlane.xlu0 %483  ;;  %v798_v24 = vmul.f32 %v3141_v41, %v3117_v42  ;;  %v3146_v58 = vadd.f32 1e-05, %v525_v30  ;;  %v928_v59 = vmul.f32 %v776_v11, %v3468_v60 }
 0x23a   :  { %v3148_v45 = vadd.f32 1e-05, %v527_v5  ;;  %498 = vadd.xlane.f32.xlu2 %v497_v32  ;;  %v1620_v1 = vadd.f32 %v1619_v61, %v1531_v38  ;;  %v528_v21 = vmul.f32 %v484_v6, %v2211_v33  ;;  %v997_v34 = vmul.f32 %v2411_v47, %v927_v0 }
 0x23b   :  { %v781_v37 = vsub.f32 1.5, %v780_v44  ;;  %v799_v14 = vmul.f32 %v3141_v41, %v798_v24  ;;  %1980 = vrsqrt.f32 %v3146_v58  ;;  %v998_v16 = vmul.f32 %v2426_v46, %v928_v59 }
 0x23c   :  { %1982 = vrsqrt.f32 %v3148_v45  ;;  %1696 = vst [vmem:[#allocation10 + $0x98] sm:$0xff] %v1620_v1  ;;  %v1355_v9 = vpop.f32.mrf.mxu0  ;;  %v3157_v8 = vadd.f32 1e-05, %v528_v21  ;;  %vm804_vm4 = vweird.f32 %v3141_v41  ;;  %v1067_v24 = vadd.f32 %v2424_v3, %v997_v34 }
 0x23d   :  { %v782_v40 = vmul.f32 %v1977_v55, %v781_v37  ;;  %v800_v4 = vmul.f32 0.5, %v799_v14  ;;  %v1356_v15 = vadd.f32 %v1355_v9, %v2773_v50  ;;  %v1068_v61 = vadd.f32 %v2433_v63, %v998_v16  ;;  %vm3205_vm5 = vmor %vm803_vm3, %vm804_vm4 }
 0x23e   :  { %v239_v22 = vpop.xlane.xlu1 %238  ;;  %1984 = vrsqrt.f32 %v3157_v8  ;;  %vm793_vm7 = vweird.f32 %v3146_v58  ;;  %vm823_vm9 = vweird.f32 %v3157_v8  ;;  %vm813_vm11 = vweird.f32 %v3148_v45 }
 0x23f   :  { %v786_v29 = vsel %vm785_vm2, %v1977_v55, %v782_v40  ;;  %v278_v57 = vmul.f32 %v2211_v33, %v239_v22  ;;  %v1444_v48 = vpop.f32.mrf.mxu1  ;;  %v801_v30 = vsub.f32 1.5, %v800_v4 }
 0x240   :  { %v929_v49 = vmul.f32 %v786_v29, %v3469_v43  ;;  %v930_v7 = vmul.f32 %v786_v29, %v3470_v36  ;;  %v1445_v39 = vadd.f32 %v1444_v48, %v1356_v15 }
 0x241   :  { %v3167_v11 = vpop.eup %1980  ;;  %v3170_v5 = vsub.f32 %v2944_v28, %v278_v57  ;;  %v3173_v55 = vsub.f32 %v2946_v17, %v278_v57  ;;  %v802_v60 = vmul.f32 %v3141_v41, %v801_v30 }
 0x242   :  { %v999_v23 = vmul.f32 %v2411_v47, %v929_v49  ;;  %v3176_v32 = vpop.eup %1982  ;;  %v788_v44 = vmul.f32 %v3167_v11, %v3146_v58  ;;  %1697 = vst [vmem:[#allocation10 + $0xa0] sm:$0xff] %v1445_v39  ;;  %v1533_v38 = vpop.f32.mrf.mxu2  ;;  %v1000_v6 = vmul.f32 %v2426_v46, %v930_v7  ;;  %vm794_vm6 = vweird.f32 %v3167_v11 }
 0x243   :  { %v1534_v28 = vadd.f32 %v1533_v38, %v2798_v10  ;;  %v405_v17 = vmul.f32 %v3170_v5, %v3170_v5  ;;  %v406_v35 = vmul.f32 %v3173_v55, %v3173_v55  ;;  %v808_v59 = vmul.f32 %v3176_v32, %v3148_v45  ;;  %vm795_vm8 = vmor %vm793_vm7, %vm794_vm6 }
 0x244   :  { %v3188_v37 = vpop.eup %1984  ;;  %v789_v1 = vmul.f32 %v3167_v11, %v788_v44  ;;  %v1357_v21 = vpop.f32.mrf.mxu0  ;;  %v1069_v0 = vadd.f32 %v2424_v3, %v999_v23  ;;  %v1070_v14 = vadd.f32 %v2433_v63, %v1000_v6  ;;  %v806_v38 = vsel %vm3205_vm5, %v3141_v41, %v802_v60 }
 0x245   :  { %v818_v40 = vmul.f32 %v3188_v37, %v3157_v8  ;;  %v1622_v9 = vpop.f32.mrf.mxu3  ;;  %v1358_v4 = vadd.f32 %v1357_v21, %v2773_v50  ;;  %v500_v57 = vadd.f32 %v406_v35, %v405_v17  ;;  %v809_v23 = vmul.f32 %v3176_v32, %v808_v59  ;;  %v3473_v21 = vld [vmem:[#allocation32_spill] sm:$0xff]  ;;  %v3474_v59 = vld [vmem:[#allocation33_spill] sm:$0xff] }
 0x246   :  { %v790_v22 = vmul.f32 0.5, %v789_v1  ;;  %v1623_v29 = vadd.f32 %v1622_v9, %v1534_v28  ;;  %v487_v34 = vpop.xlane.xlu1 %486  ;;  %v1111_v48 = vpack.c.bf16 %v1069_v0, %v1067_v24  ;;  %v1112_v7 = vpack.c.bf16 %v1070_v14, %v1068_v61 }
 0x247   :  { %v819_v43 = vmul.f32 %v3188_v37, %v818_v40  ;;  %v529_v49 = vmul.f32 %v487_v34, %v2211_v33  ;;  %v1446_v36 = vpop.f32.mrf.mxu1  ;;  %501 = vadd.xlane.f32.xlu0 %v500_v57  ;;  %v933_v58 = vmul.f32 %v806_v38, %v3473_v21  ;;  %v810_v35 = vmul.f32 0.5, %v809_v23 }
 0x248   :  { %v791_v39 = vsub.f32 1.5, %v790_v22  ;;  %1698 = vst [vmem:[#allocation10 + $0xa8] sm:$0xff] %v1623_v29  ;;  %v1447_v42 = vadd.f32 %v1446_v36, %v1358_v4  ;;  %1379 = vmatmul.bf16.gmra.mxu0 %v1111_v48  ;;  %1468 = vmatmul.bf16.gmra.mxu1 %v1112_v7  ;;  %v934_v40 = vmul.f32 %v806_v38, %v3474_v59  ;;  %vm824_vm10 = vweird.f32 %v3188_v37 }
 0x249   :  { %v490_v16 = vpop.xlane.xlu2 %489  ;;  %v3214_v44 = vadd.f32 1e-05, %v529_v49  ;;  %1557 = vmatmul.bf16.gmra.mxu2 %v1111_v48  ;;  %1646 = vmatmul.bf16.gmra.mxu3 %v1112_v7  ;;  %v820_v24 = vmul.f32 0.5, %v819_v43  ;;  %v1003_v34 = vmul.f32 %v2411_v47, %v933_v58  ;;  %v811_v48 = vsub.f32 1.5, %v810_v35  ;;  %vm825_vm13 = vmor %vm823_vm9, %vm824_vm10 }
 0x24a   :  { %v530_v30 = vmul.f32 %v490_v16, %v2211_v33  ;;  %v792_v6 = vmul.f32 %v3167_v11, %v791_v39  ;;  %1699 = vst [vmem:[#allocation10 + $0xb0] sm:$0xff] %v1447_v42  ;;  %v1535_v28 = vpop.f32.mrf.mxu2  ;;  %v1004_v43 = vmul.f32 %v2426_v46, %v934_v40  ;;  %vm814_vm12 = vweird.f32 %v3176_v32 }
 0x24b   :  { %1986 = vrsqrt.f32 %v3214_v44  ;;  %v1536_v61 = vadd.f32 %v1535_v28, %v2798_v10  ;;  %v821_v4 = vsub.f32 1.5, %v820_v24  ;;  %v812_v38 = vmul.f32 %v3176_v32, %v811_v48  ;;  %vm815_vm14 = vmor %vm813_vm11, %vm814_vm12 }
 0x24c   :  { %v3221_v17 = vadd.f32 1e-05, %v530_v30  ;;  %v1360_v1 = vpop.f32.mrf.mxu0  ;;  %v796_v41 = vsel %vm795_vm8, %v3167_v11, %v792_v6  ;;  %v1073_v30 = vadd.f32 %v2424_v3, %v1003_v34  ;;  %vm833_vm1 = vweird.f32 %v3214_v44 }
 0x24d   :  { %v1624_v0 = vpop.f32.mrf.mxu3  ;;  %v1361_v14 = vadd.f32 %v1360_v1, %v2773_v50  ;;  %v931_v60 = vmul.f32 %v796_v41, %v2877_v2  ;;  %v932_v29 = vmul.f32 %v796_v41, %v2881_v13  ;;  %v822_v7 = vmul.f32 %v3188_v37, %v821_v4 }
 0x24e   :  { %1988 = vrsqrt.f32 %v3221_v17  ;;  %v1625_v9 = vadd.f32 %v1624_v0, %v1536_v61  ;;  %v1074_v61 = vadd.f32 %v2433_v63, %v1004_v43  ;;  %vm843_vm15 = vweird.f32 %v3221_v17 }
 0x24f   :  { %v1449_v15 = vpop.f32.mrf.mxu1  ;;  %v1001_v22 = vmul.f32 %v2411_v47, %v931_v60  ;;  %v1002_v2 = vmul.f32 %v2426_v46, %v932_v29  ;;  %v826_v41 = vsel %vm825_vm13, %v3188_v37, %v822_v7 }
 0x250   :  { %1700 = vst [vmem:[#allocation10 + $0xb8] sm:$0xff] %v1625_v9  ;;  %v1450_v11 = vadd.f32 %v1449_v15, %v1361_v14  ;;  %v816_v14 = vsel %vm815_vm14, %v3176_v32, %v812_v38  ;;  %v937_v45 = vmul.f32 %v826_v41, %v2904_v62  ;;  %v938_v37 = vmul.f32 %v826_v41, %v2907_v31 }
 0x251   :  { %v3237_v57 = vpop.eup %1986  ;;  %v1071_v36 = vadd.f32 %v2424_v3, %v1001_v22  ;;  %v1072_v23 = vadd.f32 %v2433_v63, %v1002_v2  ;;  %v935_v4 = vmul.f32 %v816_v14, %v2884_v52  ;;  %v936_v22 = vmul.f32 %v816_v14, %v2892_v19 }
 0x252   :  { %1701 = vst [vmem:[#allocation10 + $0xc0] sm:$0xff] %v1450_v11  ;;  %v1538_v13 = vpop.f32.mrf.mxu2  ;;  %v828_v6 = vmul.f32 %v3237_v57, %v3214_v44  ;;  %v1007_v62 = vmul.f32 %v2411_v47, %v937_v45  ;;  %v1008_v43 = vmul.f32 %v2426_v46, %v938_v37  ;;  %vm834_vm2 = vweird.f32 %v3237_v57 }
 0x253   :  { %v1539_v39 = vadd.f32 %v1538_v13, %v2798_v10  ;;  %v1113_v1 = vpack.c.bf16 %v1073_v30, %v1071_v36  ;;  %v1114_v35 = vpack.c.bf16 %v1074_v61, %v1072_v23  ;;  %v1005_v13 = vmul.f32 %v2411_v47, %v935_v4  ;;  %vm835_vm4 = vmor %vm833_vm1, %vm834_vm2 }
 0x254   :  { %v3242_v49 = vpop.eup %1988  ;;  %v1362_v42 = vpop.f32.mrf.mxu0  ;;  %v829_v60 = vmul.f32 %v3237_v57, %v828_v6  ;;  %v1006_v52 = vmul.f32 %v2426_v46, %v936_v22  ;;  %v1077_v7 = vadd.f32 %v2424_v3, %v1007_v62 }
 0x255   :  { %v838_v16 = vmul.f32 %v3242_v49, %v3221_v17  ;;  %v1627_v28 = vpop.f32.mrf.mxu3  ;;  %v1363_v24 = vadd.f32 %v1362_v42, %v2773_v50  ;;  %vm844_vm0 = vweird.f32 %v3242_v49  ;;  %v1078_v42 = vadd.f32 %v2433_v63, %v1008_v43 }
 0x256   :  { %v1628_v8 = vadd.f32 %v1627_v28, %v1539_v39  ;;  %v830_v32 = vmul.f32 0.5, %v829_v60  ;;  %vm845_vm3 = vmor %vm843_vm15, %vm844_vm0  ;;  %v1075_v30 = vadd.f32 %v2424_v3, %v1005_v13  ;;  %v1076_v28 = vadd.f32 %v2433_v63, %v1006_v52 }
 0x257   :  { %v839_v21 = vmul.f32 %v3242_v49, %v838_v16  ;;  %v1451_v58 = vpop.f32.mrf.mxu1 }
 0x258   :  { %1702 = vst [vmem:[#allocation10 + $0xc8] sm:$0xff] %v1628_v8  ;;  %v1452_v0 = vadd.f32 %v1451_v58, %v1363_v24  ;;  %1384 = vmatmul.bf16.gmra.mxu0 %v1113_v1  ;;  %1473 = vmatmul.bf16.gmra.mxu1 %v1114_v35  ;;  %v831_v36 = vsub.f32 1.5, %v830_v32  ;;  %v1115_v61 = vpack.c.bf16 %v1077_v7, %v1075_v30 }
 0x259   :  { %1562 = vmatmul.bf16.gmra.mxu2 %v1113_v1  ;;  %1651 = vmatmul.bf16.gmra.mxu3 %v1114_v35  ;;  %v840_v40 = vmul.f32 0.5, %v839_v21  ;;  %v1116_v41 = vpack.c.bf16 %v1078_v42, %v1076_v28 }
 0x25a   :  { %1703 = vst [vmem:[#allocation10 + $0xd0] sm:$0xff] %v1452_v0  ;;  %v1540_v59 = vpop.f32.mrf.mxu2  ;;  %v832_v23 = vmul.f32 %v3237_v57, %v831_v36 }
 0x25b   :  { %v1541_v9 = vadd.f32 %v1540_v59, %v2798_v10  ;;  %v841_v48 = vsub.f32 1.5, %v840_v40 }
 0x25c   :  { %v1365_v15 = vpop.f32.mrf.mxu0  ;;  %v836_v58 = vsel %vm835_vm4, %v3237_v57, %v832_v23 }
 0x25d   :  { %v1629_v29 = vpop.f32.mrf.mxu3  ;;  %v1366_v34 = vadd.f32 %v1365_v15, %v2773_v50  ;;  %v842_v16 = vmul.f32 %v3242_v49, %v841_v48  ;;  %v940_v45 = vmul.f32 %v836_v58, %v2964_v56 }
 0x25e   :  { %v1630_v11 = vadd.f32 %v1629_v29, %v1541_v9 }
 0x25f   :  { %v1454_v2 = vpop.f32.mrf.mxu1  ;;  %v846_v8 = vsel %vm845_vm3, %v3242_v49, %v842_v16  ;;  %v939_v49 = vmul.f32 %v836_v58, %v2961_v18  ;;  %v1010_v15 = vmul.f32 %v2426_v46, %v940_v45 }
 0x260   :  { %1704 = vst [vmem:[#allocation10 + $0xd8] sm:$0xff] %v1630_v11  ;;  %v1455_v31 = vadd.f32 %v1454_v2, %v1366_v34  ;;  %v941_v35 = vmul.f32 %v846_v8, %v3009_v54  ;;  %v942_v44 = vmul.f32 %v846_v8, %v3012_v12 }
 0x261   :  { %v1009_v12 = vmul.f32 %v2411_v47, %v939_v49  ;;  %v1080_v48 = vadd.f32 %v2433_v63, %v1010_v15 }
 0x262   :  { %1705 = vst [vmem:[#allocation10 + $0xe0] sm:$0xff] %v1455_v31  ;;  %v1543_v19 = vpop.f32.mrf.mxu2  ;;  %v1011_v40 = vmul.f32 %v2411_v47, %v941_v35  ;;  %v1012_v54 = vmul.f32 %v2426_v46, %v942_v44 }
 0x263   :  { %v1544_v39 = vadd.f32 %v1543_v19, %v2798_v10  ;;  %v1079_v11 = vadd.f32 %v2424_v3, %v1009_v12 }
 0x264   :  { %v1367_v17 = vpop.f32.mrf.mxu0  ;;  %v1081_v22 = vadd.f32 %v2424_v3, %v1011_v40  ;;  %v1082_v32 = vadd.f32 %v2433_v63, %v1012_v54 }
 0x265   :  { %v1632_v38 = vpop.f32.mrf.mxu3  ;;  %v1368_v6 = vadd.f32 %v1367_v17, %v2773_v50 }
 0x266   :  { %v1633_v24 = vadd.f32 %v1632_v38, %v1544_v39  ;;  %v1117_v43 = vpack.c.bf16 %v1081_v22, %v1079_v11  ;;  %v1118_v13 = vpack.c.bf16 %v1082_v32, %v1080_v48  ;;  %v493_v39 = vpop.xlane.xlu0 %492 }
 0x267   :  { %v1456_v1 = vpop.f32.mrf.mxu1  ;;  %v531_v42 = vmul.f32 %v493_v39, %v2211_v33 }
 0x268   :  { %1706 = vst [vmem:[#allocation10 + $0xe8] sm:$0xff] %v1633_v24  ;;  %v1457_v21 = vadd.f32 %v1456_v1, %v1368_v6  ;;  %1389 = vmatmul.bf16.gmra.mxu0 %v1115_v61  ;;  %1478 = vmatmul.bf16.gmra.mxu1 %v1116_v41 }
 0x269   :  { %1567 = vmatmul.bf16.gmra.mxu2 %v1115_v61  ;;  %1656 = vmatmul.bf16.gmra.mxu3 %v1116_v41  ;;  %v563_v17 = vadd.f32 1e-05, %v531_v42 }
 0x26a   :  { %1707 = vst [vmem:[#allocation10 + $0xf0] sm:$0xff] %v1457_v21  ;;  %v1545_v0 = vpop.f32.mrf.mxu2 }
 0x26b   :  { %v1546_v14 = vadd.f32 %v1545_v0, %v2798_v10  ;;  %1990 = vrsqrt.f32 %v563_v17  ;;  %vm853_vm5 = vweird.f32 %v563_v17 }
 0x26c   :  { %v1370_v60 = vpop.f32.mrf.mxu0 }
 0x26d   :  { %v1634_v59 = vpop.f32.mrf.mxu3  ;;  %v1371_v37 = vadd.f32 %v1370_v60, %v2773_v50 }
 0x26e   :  { %v1635_v57 = vadd.f32 %v1634_v59, %v1546_v14 }
 0x26f   :  { %v1459_v9 = vpop.f32.mrf.mxu1 }
 0x270   :  { %1708 = vst [vmem:[#allocation10 + $0xf8] sm:$0xff] %v1635_v57  ;;  %v1460_v4 = vadd.f32 %v1459_v9, %v1371_v37 }
 0x271   :  { %v1991_v30 = vpop.eup %1990 }
 0x272   :  { %1709 = vst [vmem:[#allocation10 + $0x100] sm:$0xff] %v1460_v4  ;;  %v1548_v18 = vpop.f32.mrf.mxu2  ;;  %v848_v23 = vmul.f32 %v1991_v30, %v563_v17  ;;  %vm854_vm6 = vweird.f32 %v1991_v30 }
 0x273   :  { %v1549_v56 = vadd.f32 %v1548_v18, %v2798_v10  ;;  %vm855_vm7 = vmor %vm853_vm5, %vm854_vm6 }
 0x274   :  { %v1372_v29 = vpop.f32.mrf.mxu0  ;;  %v849_v38 = vmul.f32 %v1991_v30, %v848_v23 }
 0x275   :  { %v1637_v34 = vpop.f32.mrf.mxu3  ;;  %v1373_v62 = vadd.f32 %v1372_v29, %v2773_v50 }
 0x276   :  { %v1638_v2 = vadd.f32 %v1637_v34, %v1549_v56  ;;  %v850_v61 = vmul.f32 0.5, %v849_v38 }
 0x277   :  { %v1461_v31 = vpop.f32.mrf.mxu1 }
 0x278   :  { %1710 = vst [vmem:[#allocation10 + $0x108] sm:$0xff] %v1638_v2  ;;  %v1462_v36 = vadd.f32 %v1461_v31, %v1373_v62  ;;  %1394 = vmatmul.bf16.gmra.mxu0 %v1117_v43  ;;  %1483 = vmatmul.bf16.gmra.mxu1 %v1118_v13  ;;  %v851_v1 = vsub.f32 1.5, %v850_v61 }
 0x279   :  { %1572 = vmatmul.bf16.gmra.mxu2 %v1117_v43  ;;  %1661 = vmatmul.bf16.gmra.mxu3 %v1118_v13 }
 0x27a   :  { %1711 = vst [vmem:[#allocation10 + $0x110] sm:$0xff] %v1462_v36  ;;  %v1550_v52 = vpop.f32.mrf.mxu2  ;;  %v852_v35 = vmul.f32 %v1991_v30, %v851_v1 }
 0x27b   :  { %v1551_v19 = vadd.f32 %v1550_v52, %v2798_v10 }
 0x27c   :  { %v856_v45 = vsel %vm855_vm7, %v1991_v30, %v852_v35 }
 0x27d   :  { %v1639_v7 = vpop.f32.mrf.mxu3  ;;  %v943_v9 = vmul.f32 %v856_v45, %v3033_v27  ;;  %v944_v4 = vmul.f32 %v856_v45, %v3036_v26 }
 0x27e   :  { %v1640_v16 = vadd.f32 %v1639_v7, %v1551_v19 }
 0x27f   :  { %v1013_v26 = vmul.f32 %v2411_v47, %v943_v9  ;;  %v1014_v31 = vmul.f32 %v2426_v46, %v944_v4 }
 0x280   :  { %1712 = vst [vmem:[#allocation10 + $0x118] sm:$0xff] %v1640_v16 }
 0x281   :  { %v1084_v16 = vadd.f32 %v2433_v63, %v1014_v31 }
 0x2a6   :  { %v496_v6 = vpop.xlane.xlu1 %495 }
 0x2a7   :  { %v532_v28 = vmul.f32 %v496_v6, %v2211_v33 }
 0x2a9   :  { %v564_v24 = vadd.f32 1e-05, %v532_v28 }
 0x2ab   :  { %1992 = vrsqrt.f32 %v564_v24  ;;  %vm863_vm9 = vweird.f32 %v564_v24 }
 0x2ad   :  { %v499_v8 = vpop.xlane.xlu2 %498 }
 0x2ae   :  { %v533_v41 = vmul.f32 %v499_v8, %v2211_v33 }
 0x2b0   :  { %v3312_v21 = vadd.f32 1e-05, %v533_v41 }
 0x2b1   :  { %v1993_v58 = vpop.eup %1992 }
 0x2b2   :  { %v858_v0 = vmul.f32 %v1993_v58, %v564_v24  ;;  %1994 = vrsqrt.f32 %v3312_v21  ;;  %vm864_vm8 = vweird.f32 %v1993_v58  ;;  %vm873_vm11 = vweird.f32 %v3312_v21 }
 0x2b3   :  { %vm865_vm10 = vmor %vm863_vm9, %vm864_vm8 }
 0x2b4   :  { %v859_v44 = vmul.f32 %v1993_v58, %v858_v0  ;;  %v1375_v14 = vpop.f32.mrf.mxu0 }
 0x2b5   :  { %v1376_v49 = vadd.f32 %v1375_v14, %v2773_v50  ;;  %v1464_v60 = vpop.f32.mrf.mxu1 }
 0x2b6   :  { %v860_v59 = vmul.f32 0.5, %v859_v44 }
 0x2b7   :  { %v1465_v37 = vadd.f32 %v1464_v60, %v1376_v49 }
 0x2b8   :  { %v1995_v57 = vpop.eup %1994  ;;  %v861_v40 = vsub.f32 1.5, %v860_v59 }
 0x2b9   :  { %v868_v54 = vmul.f32 %v1995_v57, %v3312_v21  ;;  %1713 = vst [vmem:[#allocation10 + $0x120] sm:$0xff] %v1465_v37  ;;  %vm874_vm12 = vweird.f32 %v1995_v57 }
 0x2ba   :  { %v862_v12 = vmul.f32 %v1993_v58, %v861_v40  ;;  %v1553_v15 = vpop.f32.mrf.mxu2  ;;  %v502_v29 = vpop.xlane.xlu0 %501  ;;  %vm875_vm13 = vmor %vm873_vm11, %vm874_vm12 }
 0x2bb   :  { %v869_v18 = vmul.f32 %v1995_v57, %v868_v54  ;;  %v1554_v22 = vadd.f32 %v1553_v15, %v2798_v10  ;;  %v1642_v56 = vpop.f32.mrf.mxu3  ;;  %v534_v62 = vmul.f32 %v502_v29, %v2211_v33 }
 0x2bc   :  { %v866_v32 = vsel %vm865_vm10, %v1993_v58, %v862_v12  ;;  %v1377_v11 = vpop.f32.mrf.mxu0 }
 0x2bd   :  { %v945_v34 = vmul.f32 %v866_v32, %v3100_v20  ;;  %v946_v27 = vmul.f32 %v866_v32, %v3104_v25  ;;  %v1466_v48 = vpop.f32.mrf.mxu1  ;;  %v1643_v2 = vadd.f32 %v1642_v56, %v1554_v22  ;;  %v1378_v43 = vadd.f32 %v1377_v11, %v2773_v50 }
 0x2be   :  { %v870_v13 = vmul.f32 0.5, %v869_v18  ;;  %v566_v36 = vadd.f32 1e-05, %v534_v62  ;;  %v1083_v25 = vadd.f32 %v2424_v3, %v1013_v26 }
 0x2bf   :  { %v1015_v52 = vmul.f32 %v2411_v47, %v945_v34  ;;  %v1016_v19 = vmul.f32 %v2426_v46, %v946_v27  ;;  %1714 = vst [vmem:[#allocation10 + $0x128] sm:$0xff] %v1643_v2  ;;  %v1467_v20 = vadd.f32 %v1466_v48, %v1378_v43 }
 0x2c0   :  { %1996 = vrsqrt.f32 %v566_v36  ;;  %v871_v42 = vsub.f32 1.5, %v870_v13  ;;  %vm883_vm15 = vweird.f32 %v566_v36 }
 0x2c1   :  { %v1085_v33 = vadd.f32 %v2424_v3, %v1015_v52  ;;  %1715 = vst [vmem:[#allocation10 + $0x130] sm:$0xff] %v1467_v20  ;;  %v1086_v39 = vadd.f32 %v2433_v63, %v1016_v19 }
 0x2c2   :  { %v1555_v7 = vpop.f32.mrf.mxu2  ;;  %v872_v61 = vmul.f32 %v1995_v57, %v871_v42 }
 0x2c3   :  { %v1556_v17 = vadd.f32 %v1555_v7, %v2798_v10  ;;  %v1119_v30 = vpack.c.bf16 %v1085_v33, %v1083_v25  ;;  %v1644_v23 = vpop.f32.mrf.mxu3  ;;  %v1120_v38 = vpack.c.bf16 %v1086_v39, %v1084_v16 }
 0x2c4   :  { %v876_v0 = vsel %vm875_vm13, %v1995_v57, %v872_v61 }
 0x2c5   :  { %v1645_v6 = vadd.f32 %v1644_v23, %v1556_v17  ;;  %1399 = vmatmul.bf16.gmra.mxu0 %v1119_v30  ;;  %1577 = vmatmul.bf16.gmra.mxu2 %v1119_v30  ;;  %v1380_v28 = vpop.f32.mrf.mxu0  ;;  %v1469_v1 = vpop.f32.mrf.mxu1  ;;  %v947_v49 = vmul.f32 %v876_v0, %v3126_v53  ;;  %v948_v37 = vmul.f32 %v876_v0, %v3129_v51 }
 0x2c6   :  { %1488 = vmatmul.bf16.gmra.mxu1 %v1120_v38  ;;  %1666 = vmatmul.bf16.gmra.mxu3 %v1120_v38  ;;  %v1997_v24 = vpop.eup %1996  ;;  %v1381_v8 = vadd.f32 %v1380_v28, %v2773_v50 }
 0x2c7   :  { %1716 = vst [vmem:[#allocation10 + $0x138] sm:$0xff] %v1645_v6  ;;  %v878_v41 = vmul.f32 %v1997_v24, %v566_v36  ;;  %vm884_vm14 = vweird.f32 %v1997_v24  ;;  %v1017_v53 = vmul.f32 %v2411_v47, %v947_v49  ;;  %v1018_v22 = vmul.f32 %v2426_v46, %v948_v37 }
 0x2c8   :  { %v1470_v58 = vadd.f32 %v1469_v1, %v1381_v8  ;;  %vm885_vm0 = vmor %vm883_vm15, %vm884_vm14 }
 0x2c9   :  { %v879_v35 = vmul.f32 %v1997_v24, %v878_v41  ;;  %v1087_v34 = vadd.f32 %v2424_v3, %v1017_v53 }
 0x2ca   :  { %1717 = vst [vmem:[#allocation10 + $0x140] sm:$0xff] %v1470_v58 }
 0x2cb   :  { %v880_v44 = vmul.f32 0.5, %v879_v35 }
 0x2cc   :  { %v1558_v14 = vpop.f32.mrf.mxu2  ;;  %v1647_v21 = vpop.f32.mrf.mxu3 }
 0x2cd   :  { %v881_v60 = vsub.f32 1.5, %v880_v44  ;;  %v1559_v45 = vadd.f32 %v1558_v14, %v2798_v10  ;;  %v1382_v59 = vpop.f32.mrf.mxu0  ;;  %v1471_v9 = vpop.f32.mrf.mxu1 }
 0x2ce   :  { %v1383_v40 = vadd.f32 %v1382_v59, %v2773_v50 }
 0x2cf   :  { %v882_v54 = vmul.f32 %v1997_v24, %v881_v60  ;;  %v1648_v4 = vadd.f32 %v1647_v21, %v1559_v45 }
 0x2d0   :  { %v1472_v57 = vadd.f32 %v1471_v9, %v1383_v40 }
 0x2d1   :  { %v886_v12 = vsel %vm885_vm0, %v1997_v24, %v882_v54  ;;  %1718 = vst [vmem:[#allocation10 + $0x148] sm:$0xff] %v1648_v4 }
 0x2d2   :  { %v949_v15 = vmul.f32 %v886_v12, %v3170_v5  ;;  %v950_v18 = vmul.f32 %v886_v12, %v3173_v55  ;;  %1719 = vst [vmem:[#allocation10 + $0x150] sm:$0xff] %v1472_v57  ;;  %v1088_v5 = vadd.f32 %v2433_v63, %v1018_v22 }
 0x2d4   :  { %v1560_v51 = vpop.f32.mrf.mxu2  ;;  %v1019_v56 = vmul.f32 %v2411_v47, %v949_v15  ;;  %v1020_v32 = vmul.f32 %v2426_v46, %v950_v18  ;;  %v1649_v11 = vpop.f32.mrf.mxu3 }
 0x2d5   :  { %v1561_v29 = vadd.f32 %v1560_v51, %v2798_v10  ;;  %v1385_v27 = vpop.f32.mrf.mxu0  ;;  %v1474_v26 = vpop.f32.mrf.mxu1 }
 0x2d6   :  { %v1089_v62 = vadd.f32 %v2424_v3, %v1019_v56  ;;  %v1090_v55 = vadd.f32 %v2433_v63, %v1020_v32  ;;  %v1386_v48 = vadd.f32 %v1385_v27, %v2773_v50 }
 0x2d7   :  { %v1650_v2 = vadd.f32 %v1649_v11, %v1561_v29 }
 0x2d8   :  { %v1121_v43 = vpack.c.bf16 %v1089_v62, %v1087_v34  ;;  %v1122_v47 = vpack.c.bf16 %v1090_v55, %v1088_v5  ;;  %v1475_v31 = vadd.f32 %v1474_v26, %v1386_v48 }
 0x2d9   :  { %1720 = vst [vmem:[#allocation10 + $0x158] sm:$0xff] %v1650_v2 }
 0x2da   :  { %1404 = vmatmul.bf16.gmra.mxu0 %v1121_v43  ;;  %1493 = vmatmul.bf16.gmra.mxu1 %v1122_v47  ;;  %1721 = vst [vmem:[#allocation10 + $0x160] sm:$0xff] %v1475_v31 }
 0x2db   :  { %1582 = vmatmul.bf16.gmra.mxu2 %v1121_v43  ;;  %1671 = vmatmul.bf16.gmra.mxu3 %v1122_v47 }
 0x2dc   :  { %v1563_v46 = vpop.f32.mrf.mxu2  ;;  %v1652_v13 = vpop.f32.mrf.mxu3 }
 0x2dd   :  { %v1564_v3 = vadd.f32 %v1563_v46, %v2798_v10  ;;  %v1387_v36 = vpop.f32.mrf.mxu0  ;;  %v1476_v52 = vpop.f32.mrf.mxu1 }
 0x2de   :  { %v1388_v63 = vadd.f32 %v1387_v36, %v2773_v50 }
 0x2df   :  { %v1653_v19 = vadd.f32 %v1652_v13, %v1564_v3 }
 0x2e0   :  { %v1477_v20 = vadd.f32 %v1476_v52, %v1388_v63 }
 0x2e1   :  { %1722 = vst [vmem:[#allocation10 + $0x168] sm:$0xff] %v1653_v19 }
 0x2e2   :  { %1723 = vst [vmem:[#allocation10 + $0x170] sm:$0xff] %v1477_v20 }
 0x2e4   :  { %v1565_v25 = vpop.f32.mrf.mxu2  ;;  %v1654_v7 = vpop.f32.mrf.mxu3 }
 0x2e5   :  { %v1566_v33 = vadd.f32 %v1565_v25, %v2798_v10  ;;  %v1390_v16 = vpop.f32.mrf.mxu0  ;;  %v1479_v42 = vpop.f32.mrf.mxu1 }
 0x2e6   :  { %v1391_v39 = vadd.f32 %v1390_v16, %v2773_v50 }
 0x2e7   :  { %v1655_v17 = vadd.f32 %v1654_v7, %v1566_v33 }
 0x2e8   :  { %v1480_v30 = vadd.f32 %v1479_v42, %v1391_v39 }
 0x2e9   :  { %1724 = vst [vmem:[#allocation10 + $0x178] sm:$0xff] %v1655_v17 }
 0x2ea   :  { %1725 = vst [vmem:[#allocation10 + $0x180] sm:$0xff] %v1480_v30 }
 0x2ec   :  { %v1568_v23 = vpop.f32.mrf.mxu2  ;;  %v1657_v6 = vpop.f32.mrf.mxu3 }
 0x2ed   :  { %v1569_v38 = vadd.f32 %v1568_v23, %v2798_v10  ;;  %v1392_v28 = vpop.f32.mrf.mxu0  ;;  %v1481_v61 = vpop.f32.mrf.mxu1 }
 0x2ee   :  { %v1393_v24 = vadd.f32 %v1392_v28, %v2773_v50 }
 0x2ef   :  { %v1658_v8 = vadd.f32 %v1657_v6, %v1569_v38 }
 0x2f0   :  { %v1482_v1 = vadd.f32 %v1481_v61, %v1393_v24 }
 0x2f1   :  { %1726 = vst [vmem:[#allocation10 + $0x188] sm:$0xff] %v1658_v8 }
 0x2f2   :  { %1727 = vst [vmem:[#allocation10 + $0x190] sm:$0xff] %v1482_v1 }
 0x2f4   :  { %v1570_v41 = vpop.f32.mrf.mxu2  ;;  %v1659_v35 = vpop.f32.mrf.mxu3 }
 0x2f5   :  { %v1571_v58 = vadd.f32 %v1570_v41, %v2798_v10  ;;  %v1395_v0 = vpop.f32.mrf.mxu0  ;;  %v1484_v14 = vpop.f32.mrf.mxu1 }
 0x2f6   :  { %v1396_v44 = vadd.f32 %v1395_v0, %v2773_v50 }
 0x2f7   :  { %v1660_v49 = vadd.f32 %v1659_v35, %v1571_v58 }
 0x2f8   :  { %v1485_v60 = vadd.f32 %v1484_v14, %v1396_v44 }
 0x2f9   :  { %1728 = vst [vmem:[#allocation10 + $0x198] sm:$0xff] %v1660_v49 }
 0x2fa   :  { %1729 = vst [vmem:[#allocation10 + $0x1a0] sm:$0xff] %v1485_v60 }
 0x2fc   :  { %v1573_v45 = vpop.f32.mrf.mxu2  ;;  %v1662_v59 = vpop.f32.mrf.mxu3 }
 0x2fd   :  { %v1574_v21 = vadd.f32 %v1573_v45, %v2798_v10  ;;  %v1397_v37 = vpop.f32.mrf.mxu0  ;;  %v1486_v54 = vpop.f32.mrf.mxu1 }
 0x2fe   :  { %v1398_v40 = vadd.f32 %v1397_v37, %v2773_v50 }
 0x2ff   :  { %v1663_v9 = vadd.f32 %v1662_v59, %v1574_v21 }
 0x300   :  { %v1487_v4 = vadd.f32 %v1486_v54, %v1398_v40 }
 0x301   :  { %1730 = vst [vmem:[#allocation10 + $0x1a8] sm:$0xff] %v1663_v9 }
 0x302   :  { %1731 = vst [vmem:[#allocation10 + $0x1b0] sm:$0xff] %v1487_v4 }
 0x304   :  { %v1575_v57 = vpop.f32.mrf.mxu2  ;;  %v1664_v53 = vpop.f32.mrf.mxu3 }
 0x305   :  { %v1576_v12 = vadd.f32 %v1575_v57, %v2798_v10 }
 0x307   :  { %v1665_v15 = vadd.f32 %v1664_v53, %v1576_v12 }
 0x309   :  { %1732 = vst [vmem:[#allocation10 + $0x1b8] sm:$0xff] %v1665_v15 }
 0x342   :  { %v1400_v18 = vpop.f32.mrf.mxu0 }
 0x343   :  { %v1401_v22 = vadd.f32 %v1400_v18, %v2773_v50  ;;  %v1489_v51 = vpop.f32.mrf.mxu1 }
 0x345   :  { %v1490_v56 = vadd.f32 %v1489_v51, %v1401_v22 }
 0x347   :  { %1733 = vst [vmem:[#allocation10 + $0x1c0] sm:$0xff] %v1490_v56 }
 0x348   :  { %v1578_v32 = vpop.f32.mrf.mxu2 }
 0x349   :  { %v1579_v29 = vadd.f32 %v1578_v32, %v2798_v10  ;;  %v1667_v11 = vpop.f32.mrf.mxu3 }
 0x34a   :  { %v1402_v34 = vpop.f32.mrf.mxu0 }
 0x34b   :  { %v1668_v27 = vadd.f32 %v1667_v11, %v1579_v29  ;;  %v1403_v62 = vadd.f32 %v1402_v34, %v2773_v50  ;;  %v1491_v5 = vpop.f32.mrf.mxu1 }
 0x34d   :  { %1734 = vst [vmem:[#allocation10 + $0x1c8] sm:$0xff] %v1668_v27  ;;  %v1492_v55 = vadd.f32 %v1491_v5, %v1403_v62 }
 0x34f   :  { %1735 = vst [vmem:[#allocation10 + $0x1d0] sm:$0xff] %v1492_v55 }
 0x350   :  { %v1580_v48 = vpop.f32.mrf.mxu2 }
 0x351   :  { %v1581_v26 = vadd.f32 %v1580_v48, %v2798_v10  ;;  %v1669_v2 = vpop.f32.mrf.mxu3 }
 0x353   :  { %v1670_v43 = vadd.f32 %v1669_v2, %v1581_v26 }
 0x355   :  { %1736 = vst [vmem:[#allocation10 + $0x1d8] sm:$0xff] %v1670_v43 }
 0x357   :  { %v1405_v47 = vpop.f32.mrf.mxu0  ;;  %v1494_v31 = vpop.f32.mrf.mxu1 }
 0x358   :  { %v1406_v46 = vadd.f32 %v1405_v47, %v2773_v50 }
 0x35a   :  { %v1495_v3 = vadd.f32 %v1494_v31, %v1406_v46 }
 0x35c   :  { %1737 = vst [vmem:[#allocation10 + $0x1e0] sm:$0xff] %v1495_v3 }
 0x35e   :  { %v1583_v13 = vpop.f32.mrf.mxu2  ;;  %v1672_v36 = vpop.f32.mrf.mxu3 }
 0x35f   :  { %v1584_v63 = vadd.f32 %v1583_v13, %v2798_v10  ;;  %v1407_v52 = vpop.f32.mrf.mxu0  ;;  %v1496_v25 = vpop.f32.mrf.mxu1 }
 0x360   :  { %v1408_v19 = vadd.f32 %v1407_v52, %v2773_v50 }
 0x361   :  { %v1673_v20 = vadd.f32 %v1672_v36, %v1584_v63 }
 0x362   :  { %v1497_v33 = vadd.f32 %v1496_v25, %v1408_v19 }
 0x363   :  { %1738 = vst [vmem:[#allocation10 + $0x1e8] sm:$0xff] %v1673_v20 }
 0x364   :  { %1739 = vst [vmem:[#allocation10 + $0x1f0] sm:$0xff] %v1497_v33 }
 0x366   :  { %v1585_v7 = vpop.f32.mrf.mxu2  ;;  %v1674_v39 = vpop.f32.mrf.mxu3 }
 0x367   :  { %v1586_v16 = vadd.f32 %v1585_v7, %v2798_v10 }
 0x369   :  { %v1675_v42 = vadd.f32 %v1674_v39, %v1586_v16 }
 0x36b   :  { %1740 = vst [vmem:[#allocation10 + $0x1f8] sm:$0xff] %v1675_v42 }
 0x36c   :  { %1753 = dma.vmem_to_hbm [thread:$0]  %s1746_s15, 8192, %s1748_s18, [#allocation4], %s2128_s28, %s2128_s28, %s2129_s29  }
 0x36d   :  { %2124 = dma.done.wait [#allocation4], 8192  }
 0x36e   :  { %2125 = vsyncadd [#allocation4], 4294959104 }
 0x36f   :  { %1758 = vsyncpa [#allocation3], 1 }
 0x370   :  { %1759 = vsyncpa [#allocation6], 1 }
 0x371   :  { %1760 = vsyncpa [#allocation9], 1 }
 0x372   :  { %1761 = vsyncpa [#allocation4], 1 }

</bundles_post_ra>
